<compile_context>
chip_gen: v7x
topology: tpu7x:2x2x1
jax: 0.10.0
libtpu: 0.0.40
codegen_flags: <defaults>
</compile_context>

<pallas_src>
import functools

import jax
import jax.numpy as jnp
from jax.experimental import pallas as pl
from jax.experimental.pallas import tpu as pltpu


# Row-block caps (lane axis).  conv1x1 is HBM-bound -> big blocks; the fused
# head kernel materializes a (128, nblk) f32 hidden activation in VMEM, so it
# gets a tighter cap that is also safe on v7x's 64 MiB VMEM.
_CONV_N_CAP = 8192
_HEAD_N_CAP = 4096


def _round_up(v, m):
    return (v + m - 1) // m * m


def _row_blocking(n, cap):
    """Lane-dense row blocking.

    Returns (n_padded, nblk) with nblk % 128 == 0, n_padded % nblk == 0 (every
    block full -> unmasked stores) and >= 2 blocks whenever n allows it so both
    v7x TensorCores get work.  Wasted padding is bounded by ~128 * n_blocks.
    """
    n128 = _round_up(max(n, 1), 128)
    g = max(2, pl.cdiv(n128, cap)) if n128 > 128 else 1
    nblk = min(n128, _round_up(pl.cdiv(n128, g), 128))
    return _round_up(n128, nblk), nblk


def _mode_block_cap(co):
    # Keep the two (Co, mblk) f32 accumulators a small fraction of the
    # 64 x 4 KiB vreg file as Co (= width) grows.
    return max(128, min(512, (8192 // max(co, 1)) // 128 * 128))


def _mode_blocking(two_m, co):
    """(padded mode count Mp, mode block mblk); Mp % mblk == 0, mblk % 128 == 0."""
    cap = _mode_block_cap(co)
    mp = _round_up(max(two_m, 1), 128)
    if mp <= cap:
        return mp, mp
    return _round_up(mp, cap), cap


# ----------------------------------------------------------------------------
# In-kernel math helpers (guaranteed-lowerable ops only)
# ----------------------------------------------------------------------------

_ERF_P = 0.3275911
_ERF_A = (0.254829592, -0.284496736, 1.421413741, -1.453152027, 1.061405429)


def _erf(x):
    # Abramowitz & Stegun 7.1.26 (max abs error ~1.5e-7): exact erf to f32 eps,
    # built from mul/add/select/exp so it always lowers in Mosaic.
    sgn = jnp.where(x >= 0.0, 1.0, -1.0)
    a = jnp.abs(x)
    t = 1.0 / (1.0 + _ERF_P * a)
    a1, a2, a3, a4, a5 = _ERF_A
    poly = ((((a5 * t + a4) * t + a3) * t + a2) * t + a1) * t
    return sgn * (1.0 - poly * jnp.exp(-a * a))


def _gelu(x):
    # torch.nn.functional.gelu default (exact erf form), to f32 precision.
    return 0.5 * x * (1.0 + _erf(x * 0.7071067811865476))


# ----------------------------------------------------------------------------
# Pallas kernels
# ----------------------------------------------------------------------------

def _conv1x1_add_kernel(x_ref, w_ref, b_ref, a_ref, o_ref, *, gelu):
    # x: (Cin, nblk), w: (Cout, Cin), b: (Cout, 1), a: (Cout, nblk)
    # y = W @ x + b + spectral_branch  (+ exact-erf gelu)
    y = jnp.dot(w_ref[...], x_ref[...], preferred_element_type=jnp.float32)
    y = y + b_ref[...] + a_ref[...]
    if gelu:
        y = _gelu(y)
    o_ref[...] = y.astype(o_ref.dtype)


def _conv_head_kernel(x_ref, a_ref, cw_ref, cb_ref, w1_ref, b1_ref,
                      w2_ref, b2_ref, o_ref):
    # Fused last layer: conv1x1 + bias + spectral add (no gelu), then
    # fc1 -> gelu -> fc2.  Output is a lane-dense (1, nblk) slab.
    y = jnp.dot(cw_ref[...], x_ref[...], preferred_element_type=jnp.float32)
    y = y + cb_ref[...] + a_ref[...]
    h = jnp.dot(w1_ref[...], y, preferred_element_type=jnp.float32) + b1_ref[...]
    h = _gelu(h)
    o = jnp.dot(w2_ref[...], h, preferred_element_type=jnp.float32) + b2_ref[...]
    o_ref[...] = o.astype(o_ref.dtype)


def _spectral_mul_kernel(xr_ref, xi_ref, wr_ref, wi_ref, or_ref, oi_ref, *, ci):
    # Per-(batch, mode-block) complex contraction over input channels:
    #   out[o, m] = sum_i x[i, m] * w[i, o, m]   (complex)
    # xr/xi: (1, Ci, mblk)   wr/wi: (Ci, Co, mblk)   or/oi: (1, Co, mblk)
    # Dense (Ci, mblk)/(Co, mblk) tiles (full sublanes); static unroll over Ci
    # with per-i weight rows loaded on demand so only the two (Co, mblk)
    # accumulators stay live across iterations.
    co, mblk = or_ref.shape[1], or_ref.shape[2]
    xr_all = xr_ref[0]                     # (Ci, mblk), dense load
    xi_all = xi_ref[0]
    acc_r = jnp.zeros((co, mblk), jnp.float32)
    acc_i = jnp.zeros((co, mblk), jnp.float32)
    for i in range(ci):                    # static unroll; temps die each iter
        xr = xr_all[i:i + 1]               # (1, mblk) -> broadcast over Co
        xi = xi_all[i:i + 1]
        wr = wr_ref[i]                     # (Co, mblk)
        wi = wi_ref[i]
        acc_r = acc_r + xr * wr - xi * wi
        acc_i = acc_i + xr * wi + xi * wr
    or_ref[0] = acc_r
    oi_ref[0] = acc_i


# ----------------------------------------------------------------------------
# Pallas wrappers
# ----------------------------------------------------------------------------

def conv1x1_add(x, w, b, add, *, gelu):
    """y = w @ x + b + add [-> gelu].  x/add: (C, N), w: (Co, Ci), b: (Co, 1)."""
    cin, n = x.shape
    cout = w.shape[0]
    n_pad, nblk = _row_blocking(n, _CONV_N_CAP)
    if n_pad != n:
        pad = ((0, 0), (0, n_pad - n))
        x = jnp.pad(x, pad)
        add = jnp.pad(add, pad)
    out = pl.pallas_call(
        functools.partial(_conv1x1_add_kernel, gelu=gelu),
        out_shape=jax.ShapeDtypeStruct((cout, n_pad), jnp.float32),
        grid=(n_pad // nblk,),
        in_specs=[
            pl.BlockSpec((cin, nblk), lambda i: (0, i)),
            pl.BlockSpec((cout, cin), lambda i: (0, 0)),
            pl.BlockSpec((cout, 1), lambda i: (0, 0)),
            pl.BlockSpec((cout, nblk), lambda i: (0, i)),
        ],
        out_specs=pl.BlockSpec((cout, nblk), lambda i: (0, i)),
        compiler_params=pltpu.CompilerParams(dimension_semantics=("parallel",)),
    )(x, w, b, add)
    return out[:, :n] if n_pad != n else out


def conv_head(x, add, cw, cb, w1, b1, w2, b2):
    """Fused last layer: (cw @ x + cb + add) -> fc1 -> gelu -> fc2 -> (1, N)."""
    cin, n = x.shape
    cout = cw.shape[0]
    hid = w1.shape[0]
    n_pad, nblk = _row_blocking(n, _HEAD_N_CAP)
    if n_pad != n:
        pad = ((0, 0), (0, n_pad - n))
        x = jnp.pad(x, pad)
        add = jnp.pad(add, pad)
    out = pl.pallas_call(
        _conv_head_kernel,
        out_shape=jax.ShapeDtypeStruct((1, n_pad), jnp.float32),
        grid=(n_pad // nblk,),
        in_specs=[
            pl.BlockSpec((cin, nblk), lambda i: (0, i)),
            pl.BlockSpec((cout, nblk), lambda i: (0, i)),
            pl.BlockSpec((cout, cin), lambda i: (0, 0)),
            pl.BlockSpec((cout, 1), lambda i: (0, 0)),
            pl.BlockSpec((hid, cin), lambda i: (0, 0)),
            pl.BlockSpec((hid, 1), lambda i: (0, 0)),
            pl.BlockSpec((1, hid), lambda i: (0, 0)),
            pl.BlockSpec((1, 1), lambda i: (0, 0)),
        ],
        out_specs=pl.BlockSpec((1, nblk), lambda i: (0, i)),
        compiler_params=pltpu.CompilerParams(dimension_semantics=("parallel",)),
    )(x, add, cw, cb, w1, b1, w2, b2)
    return out[:, :n] if n_pad != n else out


def spectral_mul(xr, xi, wr, wi):
    """Complex contraction over input channels.

    xr, xi: (B, Ci, Mp);  wr, wi: (Ci, Co, Mp)  ->  (B, Co, Mp) real / imag.
    Mp is a multiple of the mode block (zero-padded modes contribute zeros).
    """
    b, ci, mp = xr.shape
    co = wr.shape[1]
    cap = _mode_block_cap(co)
    mblk = mp if mp <= cap else cap
    assert mp % mblk == 0
    return pl.pallas_call(
        functools.partial(_spectral_mul_kernel, ci=ci),
        out_shape=(jax.ShapeDtypeStruct((b, co, mp), jnp.float32),
                   jax.ShapeDtypeStruct((b, co, mp), jnp.float32)),
        grid=(b, mp // mblk),
        in_specs=[
            pl.BlockSpec((1, ci, mblk), lambda bi, mi: (bi, 0, mi)),
            pl.BlockSpec((1, ci, mblk), lambda bi, mi: (bi, 0, mi)),
            pl.BlockSpec((ci, co, mblk), lambda bi, mi: (0, 0, mi)),
            pl.BlockSpec((ci, co, mblk), lambda bi, mi: (0, 0, mi)),
        ],
        out_specs=(
            pl.BlockSpec((1, co, mblk), lambda bi, mi: (bi, 0, mi)),
            pl.BlockSpec((1, co, mblk), lambda bi, mi: (bi, 0, mi)),
        ),
        compiler_params=pltpu.CompilerParams(
            dimension_semantics=("parallel", "parallel")),
    )(xr, xi, wr, wi)


# ----------------------------------------------------------------------------
# SpectralConv2d / FNO_WOR forward (FFT + small glue in XLA, hot paths Pallas)
# ----------------------------------------------------------------------------

def spectral_conv2d(x, wr, wi, modes1, modes2):
    # x: (Ci, B, H, W) f32; wr/wi: (Ci, Co, Mp) ([w1 | w2] along flattened
    # modes, zero-padded to Mp).  Returns (Co, B, H, W) f32.
    ci, b, h, w = x.shape
    co = wr.shape[1]
    mp = wr.shape[2]
    wf = w // 2 + 1
    m = 2 * modes1 * modes2

    # TODO(synk): rfft2 / irfft2 have no Pallas TPU primitive; they stay in XLA.
    x_ft = jnp.fft.rfft2(x)                                   # (Ci,B,H,Wf) c64
    top = x_ft[:, :, :modes1, :modes2]
    bot = x_ft[:, :, h - modes1:, :modes2]
    x_sel = jnp.concatenate([top, bot], axis=2).reshape(ci, b, m)
    x_sel = jnp.transpose(x_sel, (1, 0, 2))                   # (B, Ci, m) tiny
    x_sel = jnp.pad(x_sel, ((0, 0), (0, 0), (0, mp - m)))     # pad once (complex)
    xr = jnp.real(x_sel)
    xi = jnp.imag(x_sel)

    out_r, out_i = spectral_mul(xr, xi, wr, wi)               # (B, Co, Mp)
    out = jax.lax.complex(out_r[:, :, :m], out_i[:, :, :m])
    out = jnp.transpose(out, (1, 0, 2)).reshape(co, b, 2 * modes1, modes2)

    # Build out_ft by concatenation (no dynamic-update-slice scatter).
    top_o = out[:, :, :modes1, :]
    bot_o = out[:, :, modes1:, :]
    if h >= 2 * modes1:
        mid = jnp.zeros((co, b, h - 2 * modes1, modes2), out.dtype)
        left = jnp.concatenate([top_o, mid, bot_o], axis=2)   # (Co,B,H,m2)
    else:  # overlapping mode rows: replicate torch's overwrite order
        left = jnp.zeros((co, b, h, modes2), out.dtype)
        left = left.at[:, :, :modes1, :].set(top_o)
        left = left.at[:, :, h - modes1:, :].set(bot_o)
    right = jnp.zeros((co, b, h, wf - modes2), out.dtype)
    out_ft = jnp.concatenate([left, right], axis=3)           # (Co,B,H,Wf)
    return jnp.fft.irfft2(out_ft, s=(h, w)).astype(jnp.float32)


def fno_wor_forward(x, params, *, modes1, modes2, n_layers, padding_frac):
    # x: (B, s, s, width) channels-last, as the torch module receives it.
    b = x.shape[0]
    x = jnp.transpose(x, (3, 0, 1, 2))                        # (C, B, H, W)
    c = x.shape[0]

    # Same padding amounts / axes as the torch code (x1 from W, x2 from H).
    x1_padding = int(round(x.shape[-1] * padding_frac))
    x2_padding = int(round(x.shape[-2] * padding_frac))
    x = jnp.pad(x, ((0, 0), (0, 0), (0, x2_padding), (0, x1_padding)))
    _, _, h, w = x.shape
    n = b * h * w

    out = None
    for k in range(n_layers):
        wr, wi = params["spectral"][k]
        x1 = spectral_conv2d(x, wr, wi, modes1, modes2)       # (C, B, H, W)
        cw, cb = params["conv"][k]
        if k != n_layers - 1:
            y = conv1x1_add(x.reshape(c, n), cw, cb, x1.reshape(c, n), gelu=True)
            x = y.reshape(c, b, h, w)
        else:
            # Fused last conv (no gelu) + fc1 + gelu + fc2 over the padded
            # spatial domain; crop afterwards (per-pixel ops commute with it).
            out = conv_head(x.reshape(c, n), x1.reshape(c, n), cw, cb,
                            params["fc1_w"], params["fc1_b"],
                            params["fc2_w"], params["fc2_b"])  # (1, N)

    out = out.reshape(b, h, w)
    # Crop — same index/axis pairing as torch's `x[..., :-x1, :-x2]` quirk
    # (identical for square inputs); explicit end indices so a rounded-to-zero
    # padding is a no-op instead of an empty slice (documented deviation).
    hc = h - x1_padding
    wc = w - x2_padding
    out = out[:, :hc, :wc]
    return out[..., None]                                     # (B, hc, wc, 1)


# ----------------------------------------------------------------------------
# Deterministic parameter initialization (layouts pre-arranged for the kernels)
# ----------------------------------------------------------------------------

def init_params(key, width, modes1, modes2, n_layers):
    m = modes1 * modes2
    mp, _ = _mode_blocking(2 * m, width)
    scale = 1.0 / (width * width)
    params = {"spectral": [], "conv": []}
    for k in range(n_layers):
        ks = jax.random.split(jax.random.fold_in(key, k), 6)
        w1r = scale * jax.random.uniform(ks[0], (width, width, m), jnp.float32)
        w1i = scale * jax.random.uniform(ks[1], (width, width, m), jnp.float32)
        w2r = scale * jax.random.uniform(ks[2], (width, width, m), jnp.float32)
        w2i = scale * jax.random.uniform(ks[3], (width, width, m), jnp.float32)
        # Pre-concatenate [weights1 | weights2] along the flattened-mode axis
        # (matching the top/bottom mode-block concat in the forward) and
        # zero-pad once, at init time, to the lane-dense padded mode count.
        wr = jnp.pad(jnp.concatenate([w1r, w2r], axis=-1),
                     ((0, 0), (0, 0), (0, mp - 2 * m)))
        wi = jnp.pad(jnp.concatenate([w1i, w2i], axis=-1),
                     ((0, 0), (0, 0), (0, mp - 2 * m)))
        params["spectral"].append((wr, wi))

        bound = 1.0 / (width ** 0.5)
        cw = jax.random.uniform(ks[4], (width, width), jnp.float32, -bound, bound)
        cb = jax.random.uniform(ks[5], (width, 1), jnp.float32, -bound, bound)
        params["conv"].append((cw, cb))

    kf = jax.random.split(jax.random.fold_in(key, 1000), 4)
    b1 = 1.0 / (width ** 0.5)
    b2 = 1.0 / (128.0 ** 0.5)
    params["fc1_w"] = jax.random.uniform(kf[0], (128, width), jnp.float32, -b1, b1)
    params["fc1_b"] = jax.random.uniform(kf[1], (128, 1), jnp.float32, -b1, b1)
    params["fc2_w"] = jax.random.uniform(kf[2], (1, 128), jnp.float32, -b2, b2)
    params["fc2_b"] = jax.random.uniform(kf[3], (1, 1), jnp.float32, -b2, b2)
    return params


# ----------------------------------------------------------------------------
# Main
# ----------------------------------------------------------------------------

if __name__ == "__main__":
    fno_architecture = {"modes": 6, "width": 16, "n_layers": 2, "retrain_fno": 0}
    modes = fno_architecture["modes"]
    width = fno_architecture["width"]
    n_layers = fno_architecture["n_layers"]
    padding_frac = 1.0 / 4.0

    B, S = 2, 16
    key = jax.random.PRNGKey(0)
    kx, kp = jax.random.split(key)
    x = jax.random.normal(kx, (B, S, S, width), jnp.float32)
    params = init_params(kp, width, modes, modes, n_layers)

    fwd = jax.jit(functools.partial(
        fno_wor_forward, modes1=modes, modes2=modes,
        n_layers=n_layers, padding_frac=padding_frac))
    out = fwd(x, params)
    jax.block_until_ready(out)
    assert out.shape == (B, S, S, 1), out.shape
    assert bool(jnp.all(jnp.isfinite(out)))
    print("KERNEL_OK")
</pallas_src>

<mosaic_0001>
module attributes {stable_mosaic.version = 11 : i64} {
  func.func @_spectral_mul_kernel(%arg0: i32, %arg1: i32, %arg2: memref<1x16x128xf32, #tpu.memory_space<vmem>>, %arg3: memref<1x16x128xf32, #tpu.memory_space<vmem>>, %arg4: memref<16x16x128xf32, #tpu.memory_space<vmem>>, %arg5: memref<16x16x128xf32, #tpu.memory_space<vmem>>, %arg6: memref<1x16x128xf32, #tpu.memory_space<vmem>>, %arg7: memref<1x16x128xf32, #tpu.memory_space<vmem>>) attributes {dimension_semantics = [#tpu.dimension_semantics<parallel>, #tpu.dimension_semantics<parallel>], iteration_bounds = array<i64: 2, 1>, scalar_prefetch = 0 : i64, scratch_operands = 0 : i64, tpu.core_type = #tpu.core_type<tc>, window_params = [{transform_indices = @transform_0, window_bounds = array<i64: 1, 16, 128>}, {transform_indices = @transform_1, window_bounds = array<i64: 1, 16, 128>}, {transform_indices = @transform_2, window_bounds = array<i64: 16, 16, 128>}, {transform_indices = @transform_3, window_bounds = array<i64: 16, 16, 128>}, {transform_indices = @transform_4, window_bounds = array<i64: 1, 16, 128>}, {transform_indices = @transform_5, window_bounds = array<i64: 1, 16, 128>}]} {
    %c0 = arith.constant 0 : index
    %c0_0 = arith.constant 0 : index
    %c0_1 = arith.constant 0 : index
    %0 = vector.load %arg2[%c0, %c0_0, %c0_1] : memref<1x16x128xf32, #tpu.memory_space<vmem>>, vector<1x16x128xf32>
    %1 = vector.shape_cast %0 : vector<1x16x128xf32> to vector<16x128xf32>
    %c0_2 = arith.constant 0 : index
    %c0_3 = arith.constant 0 : index
    %c0_4 = arith.constant 0 : index
    %2 = vector.load %arg3[%c0_2, %c0_3, %c0_4] : memref<1x16x128xf32, #tpu.memory_space<vmem>>, vector<1x16x128xf32>
    %3 = vector.shape_cast %2 : vector<1x16x128xf32> to vector<16x128xf32>
    %cst = arith.constant 0.000000e+00 : f32
    %4 = vector.broadcast %cst : f32 to vector<16x128xf32>
    %cst_5 = arith.constant 0.000000e+00 : f32
    %5 = vector.broadcast %cst_5 : f32 to vector<16x128xf32>
    %6 = vector.extract_strided_slice %1 {offsets = [0, 0], sizes = [1, 128], strides = [1, 1]} : vector<16x128xf32> to vector<1x128xf32>
    %7 = vector.extract_strided_slice %3 {offsets = [0, 0], sizes = [1, 128], strides = [1, 1]} : vector<16x128xf32> to vector<1x128xf32>
    %c0_6 = arith.constant 0 : index
    %c0_7 = arith.constant 0 : index
    %c0_8 = arith.constant 0 : index
    %8 = vector.load %arg4[%c0_6, %c0_7, %c0_8] : memref<16x16x128xf32, #tpu.memory_space<vmem>>, vector<1x16x128xf32>
    %9 = vector.shape_cast %8 : vector<1x16x128xf32> to vector<16x128xf32>
    %c0_9 = arith.constant 0 : index
    %c0_10 = arith.constant 0 : index
    %c0_11 = arith.constant 0 : index
    %10 = vector.load %arg5[%c0_9, %c0_10, %c0_11] : memref<16x16x128xf32, #tpu.memory_space<vmem>>, vector<1x16x128xf32>
    %11 = vector.shape_cast %10 : vector<1x16x128xf32> to vector<16x128xf32>
    %12 = vector.broadcast %6 : vector<1x128xf32> to vector<16x128xf32>
    %13 = arith.mulf %12, %9 : vector<16x128xf32>
    %14 = arith.addf %4, %13 : vector<16x128xf32>
    %15 = vector.broadcast %7 : vector<1x128xf32> to vector<16x128xf32>
    %16 = arith.mulf %15, %11 : vector<16x128xf32>
    %17 = arith.subf %14, %16 : vector<16x128xf32>
    %18 = vector.broadcast %6 : vector<1x128xf32> to vector<16x128xf32>
    %19 = arith.mulf %18, %11 : vector<16x128xf32>
    %20 = arith.addf %5, %19 : vector<16x128xf32>
    %21 = vector.broadcast %7 : vector<1x128xf32> to vector<16x128xf32>
    %22 = arith.mulf %21, %9 : vector<16x128xf32>
    %23 = arith.addf %20, %22 : vector<16x128xf32>
    %24 = vector.extract_strided_slice %1 {offsets = [1, 0], sizes = [1, 128], strides = [1, 1]} : vector<16x128xf32> to vector<1x128xf32>
    %25 = vector.extract_strided_slice %3 {offsets = [1, 0], sizes = [1, 128], strides = [1, 1]} : vector<16x128xf32> to vector<1x128xf32>
    %c1 = arith.constant 1 : index
    %c0_12 = arith.constant 0 : index
    %c0_13 = arith.constant 0 : index
    %26 = vector.load %arg4[%c1, %c0_12, %c0_13] : memref<16x16x128xf32, #tpu.memory_space<vmem>>, vector<1x16x128xf32>
    %27 = vector.shape_cast %26 : vector<1x16x128xf32> to vector<16x128xf32>
    %c1_14 = arith.constant 1 : index
    %c0_15 = arith.constant 0 : index
    %c0_16 = arith.constant 0 : index
    %28 = vector.load %arg5[%c1_14, %c0_15, %c0_16] : memref<16x16x128xf32, #tpu.memory_space<vmem>>, vector<1x16x128xf32>
    %29 = vector.shape_cast %28 : vector<1x16x128xf32> to vector<16x128xf32>
    %30 = vector.broadcast %24 : vector<1x128xf32> to vector<16x128xf32>
    %31 = arith.mulf %30, %27 : vector<16x128xf32>
    %32 = arith.addf %17, %31 : vector<16x128xf32>
    %33 = vector.broadcast %25 : vector<1x128xf32> to vector<16x128xf32>
    %34 = arith.mulf %33, %29 : vector<16x128xf32>
    %35 = arith.subf %32, %34 : vector<16x128xf32>
    %36 = vector.broadcast %24 : vector<1x128xf32> to vector<16x128xf32>
    %37 = arith.mulf %36, %29 : vector<16x128xf32>
    %38 = arith.addf %23, %37 : vector<16x128xf32>
    %39 = vector.broadcast %25 : vector<1x128xf32> to vector<16x128xf32>
    %40 = arith.mulf %39, %27 : vector<16x128xf32>
    %41 = arith.addf %38, %40 : vector<16x128xf32>
    %42 = vector.extract_strided_slice %1 {offsets = [2, 0], sizes = [1, 128], strides = [1, 1]} : vector<16x128xf32> to vector<1x128xf32>
    %43 = vector.extract_strided_slice %3 {offsets = [2, 0], sizes = [1, 128], strides = [1, 1]} : vector<16x128xf32> to vector<1x128xf32>
    %c2 = arith.constant 2 : index
    %c0_17 = arith.constant 0 : index
    %c0_18 = arith.constant 0 : index
    %44 = vector.load %arg4[%c2, %c0_17, %c0_18] : memref<16x16x128xf32, #tpu.memory_space<vmem>>, vector<1x16x128xf32>
    %45 = vector.shape_cast %44 : vector<1x16x128xf32> to vector<16x128xf32>
    %c2_19 = arith.constant 2 : index
    %c0_20 = arith.constant 0 : index
    %c0_21 = arith.constant 0 : index
    %46 = vector.load %arg5[%c2_19, %c0_20, %c0_21] : memref<16x16x128xf32, #tpu.memory_space<vmem>>, vector<1x16x128xf32>
    %47 = vector.shape_cast %46 : vector<1x16x128xf32> to vector<16x128xf32>
    %48 = vector.broadcast %42 : vector<1x128xf32> to vector<16x128xf32>
    %49 = arith.mulf %48, %45 : vector<16x128xf32>
    %50 = arith.addf %35, %49 : vector<16x128xf32>
    %51 = vector.broadcast %43 : vector<1x128xf32> to vector<16x128xf32>
    %52 = arith.mulf %51, %47 : vector<16x128xf32>
    %53 = arith.subf %50, %52 : vector<16x128xf32>
    %54 = vector.broadcast %42 : vector<1x128xf32> to vector<16x128xf32>
    %55 = arith.mulf %54, %47 : vector<16x128xf32>
    %56 = arith.addf %41, %55 : vector<16x128xf32>
    %57 = vector.broadcast %43 : vector<1x128xf32> to vector<16x128xf32>
    %58 = arith.mulf %57, %45 : vector<16x128xf32>
    %59 = arith.addf %56, %58 : vector<16x128xf32>
    %60 = vector.extract_strided_slice %1 {offsets = [3, 0], sizes = [1, 128], strides = [1, 1]} : vector<16x128xf32> to vector<1x128xf32>
    %61 = vector.extract_strided_slice %3 {offsets = [3, 0], sizes = [1, 128], strides = [1, 1]} : vector<16x128xf32> to vector<1x128xf32>
    %c3 = arith.constant 3 : index
    %c0_22 = arith.constant 0 : index
    %c0_23 = arith.constant 0 : index
    %62 = vector.load %arg4[%c3, %c0_22, %c0_23] : memref<16x16x128xf32, #tpu.memory_space<vmem>>, vector<1x16x128xf32>
    %63 = vector.shape_cast %62 : vector<1x16x128xf32> to vector<16x128xf32>
    %c3_24 = arith.constant 3 : index
    %c0_25 = arith.constant 0 : index
    %c0_26 = arith.constant 0 : index
    %64 = vector.load %arg5[%c3_24, %c0_25, %c0_26] : memref<16x16x128xf32, #tpu.memory_space<vmem>>, vector<1x16x128xf32>
    %65 = vector.shape_cast %64 : vector<1x16x128xf32> to vector<16x128xf32>
    %66 = vector.broadcast %60 : vector<1x128xf32> to vector<16x128xf32>
    %67 = arith.mulf %66, %63 : vector<16x128xf32>
    %68 = arith.addf %53, %67 : vector<16x128xf32>
    %69 = vector.broadcast %61 : vector<1x128xf32> to vector<16x128xf32>
    %70 = arith.mulf %69, %65 : vector<16x128xf32>
    %71 = arith.subf %68, %70 : vector<16x128xf32>
    %72 = vector.broadcast %60 : vector<1x128xf32> to vector<16x128xf32>
    %73 = arith.mulf %72, %65 : vector<16x128xf32>
    %74 = arith.addf %59, %73 : vector<16x128xf32>
    %75 = vector.broadcast %61 : vector<1x128xf32> to vector<16x128xf32>
    %76 = arith.mulf %75, %63 : vector<16x128xf32>
    %77 = arith.addf %74, %76 : vector<16x128xf32>
    %78 = vector.extract_strided_slice %1 {offsets = [4, 0], sizes = [1, 128], strides = [1, 1]} : vector<16x128xf32> to vector<1x128xf32>
    %79 = vector.extract_strided_slice %3 {offsets = [4, 0], sizes = [1, 128], strides = [1, 1]} : vector<16x128xf32> to vector<1x128xf32>
    %c4 = arith.constant 4 : index
    %c0_27 = arith.constant 0 : index
    %c0_28 = arith.constant 0 : index
    %80 = vector.load %arg4[%c4, %c0_27, %c0_28] : memref<16x16x128xf32, #tpu.memory_space<vmem>>, vector<1x16x128xf32>
    %81 = vector.shape_cast %80 : vector<1x16x128xf32> to vector<16x128xf32>
    %c4_29 = arith.constant 4 : index
    %c0_30 = arith.constant 0 : index
    %c0_31 = arith.constant 0 : index
    %82 = vector.load %arg5[%c4_29, %c0_30, %c0_31] : memref<16x16x128xf32, #tpu.memory_space<vmem>>, vector<1x16x128xf32>
    %83 = vector.shape_cast %82 : vector<1x16x128xf32> to vector<16x128xf32>
    %84 = vector.broadcast %78 : vector<1x128xf32> to vector<16x128xf32>
    %85 = arith.mulf %84, %81 : vector<16x128xf32>
    %86 = arith.addf %71, %85 : vector<16x128xf32>
    %87 = vector.broadcast %79 : vector<1x128xf32> to vector<16x128xf32>
    %88 = arith.mulf %87, %83 : vector<16x128xf32>
    %89 = arith.subf %86, %88 : vector<16x128xf32>
    %90 = vector.broadcast %78 : vector<1x128xf32> to vector<16x128xf32>
    %91 = arith.mulf %90, %83 : vector<16x128xf32>
    %92 = arith.addf %77, %91 : vector<16x128xf32>
    %93 = vector.broadcast %79 : vector<1x128xf32> to vector<16x128xf32>
    %94 = arith.mulf %93, %81 : vector<16x128xf32>
    %95 = arith.addf %92, %94 : vector<16x128xf32>
    %96 = vector.extract_strided_slice %1 {offsets = [5, 0], sizes = [1, 128], strides = [1, 1]} : vector<16x128xf32> to vector<1x128xf32>
    %97 = vector.extract_strided_slice %3 {offsets = [5, 0], sizes = [1, 128], strides = [1, 1]} : vector<16x128xf32> to vector<1x128xf32>
    %c5 = arith.constant 5 : index
    %c0_32 = arith.constant 0 : index
    %c0_33 = arith.constant 0 : index
    %98 = vector.load %arg4[%c5, %c0_32, %c0_33] : memref<16x16x128xf32, #tpu.memory_space<vmem>>, vector<1x16x128xf32>
    %99 = vector.shape_cast %98 : vector<1x16x128xf32> to vector<16x128xf32>
    %c5_34 = arith.constant 5 : index
    %c0_35 = arith.constant 0 : index
    %c0_36 = arith.constant 0 : index
    %100 = vector.load %arg5[%c5_34, %c0_35, %c0_36] : memref<16x16x128xf32, #tpu.memory_space<vmem>>, vector<1x16x128xf32>
    %101 = vector.shape_cast %100 : vector<1x16x128xf32> to vector<16x128xf32>
    %102 = vector.broadcast %96 : vector<1x128xf32> to vector<16x128xf32>
    %103 = arith.mulf %102, %99 : vector<16x128xf32>
    %104 = arith.addf %89, %103 : vector<16x128xf32>
    %105 = vector.broadcast %97 : vector<1x128xf32> to vector<16x128xf32>
    %106 = arith.mulf %105, %101 : vector<16x128xf32>
    %107 = arith.subf %104, %106 : vector<16x128xf32>
    %108 = vector.broadcast %96 : vector<1x128xf32> to vector<16x128xf32>
    %109 = arith.mulf %108, %101 : vector<16x128xf32>
    %110 = arith.addf %95, %109 : vector<16x128xf32>
    %111 = vector.broadcast %97 : vector<1x128xf32> to vector<16x128xf32>
    %112 = arith.mulf %111, %99 : vector<16x128xf32>
    %113 = arith.addf %110, %112 : vector<16x128xf32>
    %114 = vector.extract_strided_slice %1 {offsets = [6, 0], sizes = [1, 128], strides = [1, 1]} : vector<16x128xf32> to vector<1x128xf32>
    %115 = vector.extract_strided_slice %3 {offsets = [6, 0], sizes = [1, 128], strides = [1, 1]} : vector<16x128xf32> to vector<1x128xf32>
    %c6 = arith.constant 6 : index
    %c0_37 = arith.constant 0 : index
    %c0_38 = arith.constant 0 : index
    %116 = vector.load %arg4[%c6, %c0_37, %c0_38] : memref<16x16x128xf32, #tpu.memory_space<vmem>>, vector<1x16x128xf32>
    %117 = vector.shape_cast %116 : vector<1x16x128xf32> to vector<16x128xf32>
    %c6_39 = arith.constant 6 : index
    %c0_40 = arith.constant 0 : index
    %c0_41 = arith.constant 0 : index
    %118 = vector.load %arg5[%c6_39, %c0_40, %c0_41] : memref<16x16x128xf32, #tpu.memory_space<vmem>>, vector<1x16x128xf32>
    %119 = vector.shape_cast %118 : vector<1x16x128xf32> to vector<16x128xf32>
    %120 = vector.broadcast %114 : vector<1x128xf32> to vector<16x128xf32>
    %121 = arith.mulf %120, %117 : vector<16x128xf32>
    %122 = arith.addf %107, %121 : vector<16x128xf32>
    %123 = vector.broadcast %115 : vector<1x128xf32> to vector<16x128xf32>
    %124 = arith.mulf %123, %119 : vector<16x128xf32>
    %125 = arith.subf %122, %124 : vector<16x128xf32>
    %126 = vector.broadcast %114 : vector<1x128xf32> to vector<16x128xf32>
    %127 = arith.mulf %126, %119 : vector<16x128xf32>
    %128 = arith.addf %113, %127 : vector<16x128xf32>
    %129 = vector.broadcast %115 : vector<1x128xf32> to vector<16x128xf32>
    %130 = arith.mulf %129, %117 : vector<16x128xf32>
    %131 = arith.addf %128, %130 : vector<16x128xf32>
    %132 = vector.extract_strided_slice %1 {offsets = [7, 0], sizes = [1, 128], strides = [1, 1]} : vector<16x128xf32> to vector<1x128xf32>
    %133 = vector.extract_strided_slice %3 {offsets = [7, 0], sizes = [1, 128], strides = [1, 1]} : vector<16x128xf32> to vector<1x128xf32>
    %c7 = arith.constant 7 : index
    %c0_42 = arith.constant 0 : index
    %c0_43 = arith.constant 0 : index
    %134 = vector.load %arg4[%c7, %c0_42, %c0_43] : memref<16x16x128xf32, #tpu.memory_space<vmem>>, vector<1x16x128xf32>
    %135 = vector.shape_cast %134 : vector<1x16x128xf32> to vector<16x128xf32>
    %c7_44 = arith.constant 7 : index
    %c0_45 = arith.constant 0 : index
    %c0_46 = arith.constant 0 : index
    %136 = vector.load %arg5[%c7_44, %c0_45, %c0_46] : memref<16x16x128xf32, #tpu.memory_space<vmem>>, vector<1x16x128xf32>
    %137 = vector.shape_cast %136 : vector<1x16x128xf32> to vector<16x128xf32>
    %138 = vector.broadcast %132 : vector<1x128xf32> to vector<16x128xf32>
    %139 = arith.mulf %138, %135 : vector<16x128xf32>
    %140 = arith.addf %125, %139 : vector<16x128xf32>
    %141 = vector.broadcast %133 : vector<1x128xf32> to vector<16x128xf32>
    %142 = arith.mulf %141, %137 : vector<16x128xf32>
    %143 = arith.subf %140, %142 : vector<16x128xf32>
    %144 = vector.broadcast %132 : vector<1x128xf32> to vector<16x128xf32>
    %145 = arith.mulf %144, %137 : vector<16x128xf32>
    %146 = arith.addf %131, %145 : vector<16x128xf32>
    %147 = vector.broadcast %133 : vector<1x128xf32> to vector<16x128xf32>
    %148 = arith.mulf %147, %135 : vector<16x128xf32>
    %149 = arith.addf %146, %148 : vector<16x128xf32>
    %150 = vector.extract_strided_slice %1 {offsets = [8, 0], sizes = [1, 128], strides = [1, 1]} : vector<16x128xf32> to vector<1x128xf32>
    %151 = vector.extract_strided_slice %3 {offsets = [8, 0], sizes = [1, 128], strides = [1, 1]} : vector<16x128xf32> to vector<1x128xf32>
    %c8 = arith.constant 8 : index
    %c0_47 = arith.constant 0 : index
    %c0_48 = arith.constant 0 : index
    %152 = vector.load %arg4[%c8, %c0_47, %c0_48] : memref<16x16x128xf32, #tpu.memory_space<vmem>>, vector<1x16x128xf32>
    %153 = vector.shape_cast %152 : vector<1x16x128xf32> to vector<16x128xf32>
    %c8_49 = arith.constant 8 : index
    %c0_50 = arith.constant 0 : index
    %c0_51 = arith.constant 0 : index
    %154 = vector.load %arg5[%c8_49, %c0_50, %c0_51] : memref<16x16x128xf32, #tpu.memory_space<vmem>>, vector<1x16x128xf32>
    %155 = vector.shape_cast %154 : vector<1x16x128xf32> to vector<16x128xf32>
    %156 = vector.broadcast %150 : vector<1x128xf32> to vector<16x128xf32>
    %157 = arith.mulf %156, %153 : vector<16x128xf32>
    %158 = arith.addf %143, %157 : vector<16x128xf32>
    %159 = vector.broadcast %151 : vector<1x128xf32> to vector<16x128xf32>
    %160 = arith.mulf %159, %155 : vector<16x128xf32>
    %161 = arith.subf %158, %160 : vector<16x128xf32>
    %162 = vector.broadcast %150 : vector<1x128xf32> to vector<16x128xf32>
    %163 = arith.mulf %162, %155 : vector<16x128xf32>
    %164 = arith.addf %149, %163 : vector<16x128xf32>
    %165 = vector.broadcast %151 : vector<1x128xf32> to vector<16x128xf32>
    %166 = arith.mulf %165, %153 : vector<16x128xf32>
    %167 = arith.addf %164, %166 : vector<16x128xf32>
    %168 = vector.extract_strided_slice %1 {offsets = [9, 0], sizes = [1, 128], strides = [1, 1]} : vector<16x128xf32> to vector<1x128xf32>
    %169 = vector.extract_strided_slice %3 {offsets = [9, 0], sizes = [1, 128], strides = [1, 1]} : vector<16x128xf32> to vector<1x128xf32>
    %c9 = arith.constant 9 : index
    %c0_52 = arith.constant 0 : index
    %c0_53 = arith.constant 0 : index
    %170 = vector.load %arg4[%c9, %c0_52, %c0_53] : memref<16x16x128xf32, #tpu.memory_space<vmem>>, vector<1x16x128xf32>
    %171 = vector.shape_cast %170 : vector<1x16x128xf32> to vector<16x128xf32>
    %c9_54 = arith.constant 9 : index
    %c0_55 = arith.constant 0 : index
    %c0_56 = arith.constant 0 : index
    %172 = vector.load %arg5[%c9_54, %c0_55, %c0_56] : memref<16x16x128xf32, #tpu.memory_space<vmem>>, vector<1x16x128xf32>
    %173 = vector.shape_cast %172 : vector<1x16x128xf32> to vector<16x128xf32>
    %174 = vector.broadcast %168 : vector<1x128xf32> to vector<16x128xf32>
    %175 = arith.mulf %174, %171 : vector<16x128xf32>
    %176 = arith.addf %161, %175 : vector<16x128xf32>
    %177 = vector.broadcast %169 : vector<1x128xf32> to vector<16x128xf32>
    %178 = arith.mulf %177, %173 : vector<16x128xf32>
    %179 = arith.subf %176, %178 : vector<16x128xf32>
    %180 = vector.broadcast %168 : vector<1x128xf32> to vector<16x128xf32>
    %181 = arith.mulf %180, %173 : vector<16x128xf32>
    %182 = arith.addf %167, %181 : vector<16x128xf32>
    %183 = vector.broadcast %169 : vector<1x128xf32> to vector<16x128xf32>
    %184 = arith.mulf %183, %171 : vector<16x128xf32>
    %185 = arith.addf %182, %184 : vector<16x128xf32>
    %186 = vector.extract_strided_slice %1 {offsets = [10, 0], sizes = [1, 128], strides = [1, 1]} : vector<16x128xf32> to vector<1x128xf32>
    %187 = vector.extract_strided_slice %3 {offsets = [10, 0], sizes = [1, 128], strides = [1, 1]} : vector<16x128xf32> to vector<1x128xf32>
    %c10 = arith.constant 10 : index
    %c0_57 = arith.constant 0 : index
    %c0_58 = arith.constant 0 : index
    %188 = vector.load %arg4[%c10, %c0_57, %c0_58] : memref<16x16x128xf32, #tpu.memory_space<vmem>>, vector<1x16x128xf32>
    %189 = vector.shape_cast %188 : vector<1x16x128xf32> to vector<16x128xf32>
    %c10_59 = arith.constant 10 : index
    %c0_60 = arith.constant 0 : index
    %c0_61 = arith.constant 0 : index
    %190 = vector.load %arg5[%c10_59, %c0_60, %c0_61] : memref<16x16x128xf32, #tpu.memory_space<vmem>>, vector<1x16x128xf32>
    %191 = vector.shape_cast %190 : vector<1x16x128xf32> to vector<16x128xf32>
    %192 = vector.broadcast %186 : vector<1x128xf32> to vector<16x128xf32>
    %193 = arith.mulf %192, %189 : vector<16x128xf32>
    %194 = arith.addf %179, %193 : vector<16x128xf32>
    %195 = vector.broadcast %187 : vector<1x128xf32> to vector<16x128xf32>
    %196 = arith.mulf %195, %191 : vector<16x128xf32>
    %197 = arith.subf %194, %196 : vector<16x128xf32>
    %198 = vector.broadcast %186 : vector<1x128xf32> to vector<16x128xf32>
    %199 = arith.mulf %198, %191 : vector<16x128xf32>
    %200 = arith.addf %185, %199 : vector<16x128xf32>
    %201 = vector.broadcast %187 : vector<1x128xf32> to vector<16x128xf32>
    %202 = arith.mulf %201, %189 : vector<16x128xf32>
    %203 = arith.addf %200, %202 : vector<16x128xf32>
    %204 = vector.extract_strided_slice %1 {offsets = [11, 0], sizes = [1, 128], strides = [1, 1]} : vector<16x128xf32> to vector<1x128xf32>
    %205 = vector.extract_strided_slice %3 {offsets = [11, 0], sizes = [1, 128], strides = [1, 1]} : vector<16x128xf32> to vector<1x128xf32>
    %c11 = arith.constant 11 : index
    %c0_62 = arith.constant 0 : index
    %c0_63 = arith.constant 0 : index
    %206 = vector.load %arg4[%c11, %c0_62, %c0_63] : memref<16x16x128xf32, #tpu.memory_space<vmem>>, vector<1x16x128xf32>
    %207 = vector.shape_cast %206 : vector<1x16x128xf32> to vector<16x128xf32>
    %c11_64 = arith.constant 11 : index
    %c0_65 = arith.constant 0 : index
    %c0_66 = arith.constant 0 : index
    %208 = vector.load %arg5[%c11_64, %c0_65, %c0_66] : memref<16x16x128xf32, #tpu.memory_space<vmem>>, vector<1x16x128xf32>
    %209 = vector.shape_cast %208 : vector<1x16x128xf32> to vector<16x128xf32>
    %210 = vector.broadcast %204 : vector<1x128xf32> to vector<16x128xf32>
    %211 = arith.mulf %210, %207 : vector<16x128xf32>
    %212 = arith.addf %197, %211 : vector<16x128xf32>
    %213 = vector.broadcast %205 : vector<1x128xf32> to vector<16x128xf32>
    %214 = arith.mulf %213, %209 : vector<16x128xf32>
    %215 = arith.subf %212, %214 : vector<16x128xf32>
    %216 = vector.broadcast %204 : vector<1x128xf32> to vector<16x128xf32>
    %217 = arith.mulf %216, %209 : vector<16x128xf32>
    %218 = arith.addf %203, %217 : vector<16x128xf32>
    %219 = vector.broadcast %205 : vector<1x128xf32> to vector<16x128xf32>
    %220 = arith.mulf %219, %207 : vector<16x128xf32>
    %221 = arith.addf %218, %220 : vector<16x128xf32>
    %222 = vector.extract_strided_slice %1 {offsets = [12, 0], sizes = [1, 128], strides = [1, 1]} : vector<16x128xf32> to vector<1x128xf32>
    %223 = vector.extract_strided_slice %3 {offsets = [12, 0], sizes = [1, 128], strides = [1, 1]} : vector<16x128xf32> to vector<1x128xf32>
    %c12 = arith.constant 12 : index
    %c0_67 = arith.constant 0 : index
    %c0_68 = arith.constant 0 : index
    %224 = vector.load %arg4[%c12, %c0_67, %c0_68] : memref<16x16x128xf32, #tpu.memory_space<vmem>>, vector<1x16x128xf32>
    %225 = vector.shape_cast %224 : vector<1x16x128xf32> to vector<16x128xf32>
    %c12_69 = arith.constant 12 : index
    %c0_70 = arith.constant 0 : index
    %c0_71 = arith.constant 0 : index
    %226 = vector.load %arg5[%c12_69, %c0_70, %c0_71] : memref<16x16x128xf32, #tpu.memory_space<vmem>>, vector<1x16x128xf32>
    %227 = vector.shape_cast %226 : vector<1x16x128xf32> to vector<16x128xf32>
    %228 = vector.broadcast %222 : vector<1x128xf32> to vector<16x128xf32>
    %229 = arith.mulf %228, %225 : vector<16x128xf32>
    %230 = arith.addf %215, %229 : vector<16x128xf32>
    %231 = vector.broadcast %223 : vector<1x128xf32> to vector<16x128xf32>
    %232 = arith.mulf %231, %227 : vector<16x128xf32>
    %233 = arith.subf %230, %232 : vector<16x128xf32>
    %234 = vector.broadcast %222 : vector<1x128xf32> to vector<16x128xf32>
    %235 = arith.mulf %234, %227 : vector<16x128xf32>
    %236 = arith.addf %221, %235 : vector<16x128xf32>
    %237 = vector.broadcast %223 : vector<1x128xf32> to vector<16x128xf32>
    %238 = arith.mulf %237, %225 : vector<16x128xf32>
    %239 = arith.addf %236, %238 : vector<16x128xf32>
    %240 = vector.extract_strided_slice %1 {offsets = [13, 0], sizes = [1, 128], strides = [1, 1]} : vector<16x128xf32> to vector<1x128xf32>
    %241 = vector.extract_strided_slice %3 {offsets = [13, 0], sizes = [1, 128], strides = [1, 1]} : vector<16x128xf32> to vector<1x128xf32>
    %c13 = arith.constant 13 : index
    %c0_72 = arith.constant 0 : index
    %c0_73 = arith.constant 0 : index
    %242 = vector.load %arg4[%c13, %c0_72, %c0_73] : memref<16x16x128xf32, #tpu.memory_space<vmem>>, vector<1x16x128xf32>
    %243 = vector.shape_cast %242 : vector<1x16x128xf32> to vector<16x128xf32>
    %c13_74 = arith.constant 13 : index
    %c0_75 = arith.constant 0 : index
    %c0_76 = arith.constant 0 : index
    %244 = vector.load %arg5[%c13_74, %c0_75, %c0_76] : memref<16x16x128xf32, #tpu.memory_space<vmem>>, vector<1x16x128xf32>
    %245 = vector.shape_cast %244 : vector<1x16x128xf32> to vector<16x128xf32>
    %246 = vector.broadcast %240 : vector<1x128xf32> to vector<16x128xf32>
    %247 = arith.mulf %246, %243 : vector<16x128xf32>
    %248 = arith.addf %233, %247 : vector<16x128xf32>
    %249 = vector.broadcast %241 : vector<1x128xf32> to vector<16x128xf32>
    %250 = arith.mulf %249, %245 : vector<16x128xf32>
    %251 = arith.subf %248, %250 : vector<16x128xf32>
    %252 = vector.broadcast %240 : vector<1x128xf32> to vector<16x128xf32>
    %253 = arith.mulf %252, %245 : vector<16x128xf32>
    %254 = arith.addf %239, %253 : vector<16x128xf32>
    %255 = vector.broadcast %241 : vector<1x128xf32> to vector<16x128xf32>
    %256 = arith.mulf %255, %243 : vector<16x128xf32>
    %257 = arith.addf %254, %256 : vector<16x128xf32>
    %258 = vector.extract_strided_slice %1 {offsets = [14, 0], sizes = [1, 128], strides = [1, 1]} : vector<16x128xf32> to vector<1x128xf32>
    %259 = vector.extract_strided_slice %3 {offsets = [14, 0], sizes = [1, 128], strides = [1, 1]} : vector<16x128xf32> to vector<1x128xf32>
    %c14 = arith.constant 14 : index
    %c0_77 = arith.constant 0 : index
    %c0_78 = arith.constant 0 : index
    %260 = vector.load %arg4[%c14, %c0_77, %c0_78] : memref<16x16x128xf32, #tpu.memory_space<vmem>>, vector<1x16x128xf32>
    %261 = vector.shape_cast %260 : vector<1x16x128xf32> to vector<16x128xf32>
    %c14_79 = arith.constant 14 : index
    %c0_80 = arith.constant 0 : index
    %c0_81 = arith.constant 0 : index
    %262 = vector.load %arg5[%c14_79, %c0_80, %c0_81] : memref<16x16x128xf32, #tpu.memory_space<vmem>>, vector<1x16x128xf32>
    %263 = vector.shape_cast %262 : vector<1x16x128xf32> to vector<16x128xf32>
    %264 = vector.broadcast %258 : vector<1x128xf32> to vector<16x128xf32>
    %265 = arith.mulf %264, %261 : vector<16x128xf32>
    %266 = arith.addf %251, %265 : vector<16x128xf32>
    %267 = vector.broadcast %259 : vector<1x128xf32> to vector<16x128xf32>
    %268 = arith.mulf %267, %263 : vector<16x128xf32>
    %269 = arith.subf %266, %268 : vector<16x128xf32>
    %270 = vector.broadcast %258 : vector<1x128xf32> to vector<16x128xf32>
    %271 = arith.mulf %270, %263 : vector<16x128xf32>
    %272 = arith.addf %257, %271 : vector<16x128xf32>
    %273 = vector.broadcast %259 : vector<1x128xf32> to vector<16x128xf32>
    %274 = arith.mulf %273, %261 : vector<16x128xf32>
    %275 = arith.addf %272, %274 : vector<16x128xf32>
    %276 = vector.extract_strided_slice %1 {offsets = [15, 0], sizes = [1, 128], strides = [1, 1]} : vector<16x128xf32> to vector<1x128xf32>
    %277 = vector.extract_strided_slice %3 {offsets = [15, 0], sizes = [1, 128], strides = [1, 1]} : vector<16x128xf32> to vector<1x128xf32>
    %c15 = arith.constant 15 : index
    %c0_82 = arith.constant 0 : index
    %c0_83 = arith.constant 0 : index
    %278 = vector.load %arg4[%c15, %c0_82, %c0_83] : memref<16x16x128xf32, #tpu.memory_space<vmem>>, vector<1x16x128xf32>
    %279 = vector.shape_cast %278 : vector<1x16x128xf32> to vector<16x128xf32>
    %c15_84 = arith.constant 15 : index
    %c0_85 = arith.constant 0 : index
    %c0_86 = arith.constant 0 : index
    %280 = vector.load %arg5[%c15_84, %c0_85, %c0_86] : memref<16x16x128xf32, #tpu.memory_space<vmem>>, vector<1x16x128xf32>
    %281 = vector.shape_cast %280 : vector<1x16x128xf32> to vector<16x128xf32>
    %282 = vector.broadcast %276 : vector<1x128xf32> to vector<16x128xf32>
    %283 = arith.mulf %282, %279 : vector<16x128xf32>
    %284 = arith.addf %269, %283 : vector<16x128xf32>
    %285 = vector.broadcast %277 : vector<1x128xf32> to vector<16x128xf32>
    %286 = arith.mulf %285, %281 : vector<16x128xf32>
    %287 = arith.subf %284, %286 : vector<16x128xf32>
    %288 = vector.broadcast %276 : vector<1x128xf32> to vector<16x128xf32>
    %289 = arith.mulf %288, %281 : vector<16x128xf32>
    %290 = arith.addf %275, %289 : vector<16x128xf32>
    %291 = vector.broadcast %277 : vector<1x128xf32> to vector<16x128xf32>
    %292 = arith.mulf %291, %279 : vector<16x128xf32>
    %293 = arith.addf %290, %292 : vector<16x128xf32>
    %c0_87 = arith.constant 0 : index
    %c0_88 = arith.constant 0 : index
    %c0_89 = arith.constant 0 : index
    %294 = vector.load %arg6[%c0_87, %c0_88, %c0_89] : memref<1x16x128xf32, #tpu.memory_space<vmem>>, vector<1x16x128xf32>
    %295 = vector.shape_cast %294 : vector<1x16x128xf32> to vector<16x128xf32>
    %296 = vector.shape_cast %287 : vector<16x128xf32> to vector<1x16x128xf32>
    tpu.vector_store %arg6[%c0_87, %c0_88, %c0_89], %296 {strides = array<i32>} : memref<1x16x128xf32, #tpu.memory_space<vmem>>, vector<1x16x128xf32>,
    %c0_90 = arith.constant 0 : index
    %c0_91 = arith.constant 0 : index
    %c0_92 = arith.constant 0 : index
    %297 = vector.load %arg7[%c0_90, %c0_91, %c0_92] : memref<1x16x128xf32, #tpu.memory_space<vmem>>, vector<1x16x128xf32>
    %298 = vector.shape_cast %297 : vector<1x16x128xf32> to vector<16x128xf32>
    %299 = vector.shape_cast %293 : vector<16x128xf32> to vector<1x16x128xf32>
    tpu.vector_store %arg7[%c0_90, %c0_91, %c0_92], %299 {strides = array<i32>} : memref<1x16x128xf32, #tpu.memory_space<vmem>>, vector<1x16x128xf32>,
    return
  }
  func.func @transform_0(%arg0: i32, %arg1: i32) -> (i32, i32, i32) {
    %c0_i32 = arith.constant 0 : i32
    %c0_i32_0 = arith.constant 0 : i32
    return %arg0, %c0_i32, %arg1 : i32, i32, i32
  }
  func.func @transform_1(%arg0: i32, %arg1: i32) -> (i32, i32, i32) {
    %c0_i32 = arith.constant 0 : i32
    %c0_i32_0 = arith.constant 0 : i32
    return %arg0, %c0_i32, %arg1 : i32, i32, i32
  }
  func.func @transform_2(%arg0: i32, %arg1: i32) -> (i32, i32, i32) {
    %c0_i32 = arith.constant 0 : i32
    %c0_i32_0 = arith.constant 0 : i32
    %c0_i32_1 = arith.constant 0 : i32
    return %c0_i32, %c0_i32_0, %arg1 : i32, i32, i32
  }
  func.func @transform_3(%arg0: i32, %arg1: i32) -> (i32, i32, i32) {
    %c0_i32 = arith.constant 0 : i32
    %c0_i32_0 = arith.constant 0 : i32
    %c0_i32_1 = arith.constant 0 : i32
    return %c0_i32, %c0_i32_0, %arg1 : i32, i32, i32
  }
  func.func @transform_4(%arg0: i32, %arg1: i32) -> (i32, i32, i32) {
    %c0_i32 = arith.constant 0 : i32
    %c0_i32_0 = arith.constant 0 : i32
    return %arg0, %c0_i32, %arg1 : i32, i32, i32
  }
  func.func @transform_5(%arg0: i32, %arg1: i32) -> (i32, i32, i32) {
    %c0_i32 = arith.constant 0 : i32
    %c0_i32_0 = arith.constant 0 : i32
    return %arg0, %c0_i32, %arg1 : i32, i32, i32
  }
}

module attributes {stable_mosaic.version = 11 : i64} {
  func.func @_conv1x1_add_kernel(%arg0: i32, %arg1: memref<16x512xf32, #tpu.memory_space<vmem>>, %arg2: memref<16x16xf32, #tpu.memory_space<vmem>>, %arg3: memref<16x1xf32, #tpu.memory_space<vmem>>, %arg4: memref<16x512xf32, #tpu.memory_space<vmem>>, %arg5: memref<16x512xf32, #tpu.memory_space<vmem>>) attributes {dimension_semantics = [#tpu.dimension_semantics<parallel>], iteration_bounds = array<i64: 2>, scalar_prefetch = 0 : i64, scratch_operands = 0 : i64, tpu.core_type = #tpu.core_type<tc>, window_params = [{transform_indices = @transform_0, window_bounds = array<i64: 16, 512>}, {pipeline_mode = #tpu.pipeline_mode<synchronous>, transform_indices = @transform_1, window_bounds = array<i64: 16, 16>}, {pipeline_mode = #tpu.pipeline_mode<synchronous>, transform_indices = @transform_2, window_bounds = array<i64: 16, 1>}, {transform_indices = @transform_3, window_bounds = array<i64: 16, 512>}, {transform_indices = @transform_4, window_bounds = array<i64: 16, 512>}]} {
    %c0 = arith.constant 0 : index
    %c0_0 = arith.constant 0 : index
    %0 = vector.load %arg2[%c0, %c0_0] : memref<16x16xf32, #tpu.memory_space<vmem>>, vector<16x16xf32>
    %c0_1 = arith.constant 0 : index
    %c0_2 = arith.constant 0 : index
    %1 = vector.load %arg1[%c0_1, %c0_2] : memref<16x512xf32, #tpu.memory_space<vmem>>, vector<16x512xf32>
    %cst = arith.constant dense<0.000000e+00> : vector<16x512xf32>
    %2 = tpu.matmul %0, %1, %cst {dimension_numbers = #tpu.dot_dimension_numbers<[1], [0], [0], [1], [0, 0, 1, 1], [], []>} : vector<16x16xf32>, vector<16x512xf32>, vector<16x512xf32> -> vector<16x512xf32>
    %c0_3 = arith.constant 0 : index
    %c0_4 = arith.constant 0 : index
    %3 = vector.load %arg3[%c0_3, %c0_4] : memref<16x1xf32, #tpu.memory_space<vmem>>, vector<16x1xf32>
    %4 = vector.broadcast %3 : vector<16x1xf32> to vector<16x512xf32>
    %5 = arith.addf %2, %4 : vector<16x512xf32>
    %c0_5 = arith.constant 0 : index
    %c0_6 = arith.constant 0 : index
    %6 = vector.load %arg4[%c0_5, %c0_6] : memref<16x512xf32, #tpu.memory_space<vmem>>, vector<16x512xf32>
    %7 = arith.addf %5, %6 : vector<16x512xf32>
    %cst_7 = arith.constant 5.000000e-01 : f32
    %8 = vector.broadcast %cst_7 : f32 to vector<16x512xf32>
    %9 = arith.mulf %8, %7 : vector<16x512xf32>
    %cst_8 = arith.constant 0.707106769 : f32
    %10 = vector.broadcast %cst_8 : f32 to vector<16x512xf32>
    %11 = arith.mulf %7, %10 : vector<16x512xf32>
    %cst_9 = arith.constant 0.000000e+00 : f32
    %12 = vector.broadcast %cst_9 : f32 to vector<16x512xf32>
    %13 = arith.cmpf oge, %11, %12 : vector<16x512xf32>
    %cst_10 = arith.constant 1.000000e+00 : f32
    %cst_11 = arith.constant -1.000000e+00 : f32
    %14 = vector.broadcast %cst_10 : f32 to vector<16x512xf32>
    %15 = vector.broadcast %cst_11 : f32 to vector<16x512xf32>
    %16 = arith.select %13, %14, %15 : vector<16x512xi1>, vector<16x512xf32>
    %17 = math.absf %11 : vector<16x512xf32>
    %cst_12 = arith.constant 0.327591091 : f32
    %18 = vector.broadcast %cst_12 : f32 to vector<16x512xf32>
    %19 = arith.mulf %18, %17 : vector<16x512xf32>
    %cst_13 = arith.constant 1.000000e+00 : f32
    %20 = vector.broadcast %cst_13 : f32 to vector<16x512xf32>
    %21 = arith.addf %20, %19 : vector<16x512xf32>
    %cst_14 = arith.constant 1.000000e+00 : f32
    %22 = vector.broadcast %cst_14 : f32 to vector<16x512xf32>
    %23 = arith.divf %22, %21 : vector<16x512xf32>
    %cst_15 = arith.constant 1.06140542 : f32
    %24 = vector.broadcast %cst_15 : f32 to vector<16x512xf32>
    %25 = arith.mulf %24, %23 : vector<16x512xf32>
    %cst_16 = arith.constant -1.45315206 : f32
    %26 = vector.broadcast %cst_16 : f32 to vector<16x512xf32>
    %27 = arith.addf %25, %26 : vector<16x512xf32>
    %28 = arith.mulf %27, %23 : vector<16x512xf32>
    %cst_17 = arith.constant 1.42141378 : f32
    %29 = vector.broadcast %cst_17 : f32 to vector<16x512xf32>
    %30 = arith.addf %28, %29 : vector<16x512xf32>
    %31 = arith.mulf %30, %23 : vector<16x512xf32>
    %cst_18 = arith.constant -0.284496725 : f32
    %32 = vector.broadcast %cst_18 : f32 to vector<16x512xf32>
    %33 = arith.addf %31, %32 : vector<16x512xf32>
    %34 = arith.mulf %33, %23 : vector<16x512xf32>
    %cst_19 = arith.constant 0.254829586 : f32
    %35 = vector.broadcast %cst_19 : f32 to vector<16x512xf32>
    %36 = arith.addf %34, %35 : vector<16x512xf32>
    %37 = arith.mulf %36, %23 : vector<16x512xf32>
    %cst_20 = arith.constant 0.000000e+00 : f32
    %38 = vector.broadcast %cst_20 : f32 to vector<16x512xf32>
    %39 = arith.subf %38, %17 : vector<16x512xf32>
    %40 = arith.mulf %39, %17 : vector<16x512xf32>
    %41 = math.exp %40 : vector<16x512xf32>
    %42 = arith.mulf %37, %41 : vector<16x512xf32>
    %cst_21 = arith.constant 1.000000e+00 : f32
    %43 = vector.broadcast %cst_21 : f32 to vector<16x512xf32>
    %44 = arith.subf %43, %42 : vector<16x512xf32>
    %45 = arith.mulf %16, %44 : vector<16x512xf32>
    %cst_22 = arith.constant 1.000000e+00 : f32
    %46 = vector.broadcast %cst_22 : f32 to vector<16x512xf32>
    %47 = arith.addf %46, %45 : vector<16x512xf32>
    %48 = arith.mulf %9, %47 : vector<16x512xf32>
    %c0_23 = arith.constant 0 : index
    %c0_24 = arith.constant 0 : index
    %49 = vector.load %arg5[%c0_23, %c0_24] : memref<16x512xf32, #tpu.memory_space<vmem>>, vector<16x512xf32>
    tpu.vector_store %arg5[%c0_23, %c0_24], %48 {strides = array<i32>} : memref<16x512xf32, #tpu.memory_space<vmem>>, vector<16x512xf32>,
    return
  }
  func.func @transform_0(%arg0: i32) -> (i32, i32) {
    %c0_i32 = arith.constant 0 : i32
    %c0_i32_0 = arith.constant 0 : i32
    return %c0_i32, %arg0 : i32, i32
  }
  func.func @transform_1(%arg0: i32) -> (i32, i32) {
    %c0_i32 = arith.constant 0 : i32
    %c0_i32_0 = arith.constant 0 : i32
    %c0_i32_1 = arith.constant 0 : i32
    return %c0_i32, %c0_i32_0 : i32, i32
  }
  func.func @transform_2(%arg0: i32) -> (i32, i32) {
    %c0_i32 = arith.constant 0 : i32
    %c0_i32_0 = arith.constant 0 : i32
    %c0_i32_1 = arith.constant 0 : i32
    return %c0_i32, %c0_i32_0 : i32, i32
  }
  func.func @transform_3(%arg0: i32) -> (i32, i32) {
    %c0_i32 = arith.constant 0 : i32
    %c0_i32_0 = arith.constant 0 : i32
    return %c0_i32, %arg0 : i32, i32
  }
  func.func @transform_4(%arg0: i32) -> (i32, i32) {
    %c0_i32 = arith.constant 0 : i32
    %c0_i32_0 = arith.constant 0 : i32
    return %c0_i32, %arg0 : i32, i32
  }
}

module attributes {stable_mosaic.version = 11 : i64} {
  func.func @_conv_head_kernel(%arg0: i32, %arg1: memref<16x512xf32, #tpu.memory_space<vmem>>, %arg2: memref<16x512xf32, #tpu.memory_space<vmem>>, %arg3: memref<16x16xf32, #tpu.memory_space<vmem>>, %arg4: memref<16x1xf32, #tpu.memory_space<vmem>>, %arg5: memref<128x16xf32, #tpu.memory_space<vmem>>, %arg6: memref<128x1xf32, #tpu.memory_space<vmem>>, %arg7: memref<1x128xf32, #tpu.memory_space<vmem>>, %arg8: memref<1x1xf32, #tpu.memory_space<vmem>>, %arg9: memref<1x512xf32, #tpu.memory_space<vmem>>) attributes {dimension_semantics = [#tpu.dimension_semantics<parallel>], iteration_bounds = array<i64: 2>, scalar_prefetch = 0 : i64, scratch_operands = 0 : i64, tpu.core_type = #tpu.core_type<tc>, window_params = [{transform_indices = @transform_0, window_bounds = array<i64: 16, 512>}, {transform_indices = @transform_1, window_bounds = array<i64: 16, 512>}, {pipeline_mode = #tpu.pipeline_mode<synchronous>, transform_indices = @transform_2, window_bounds = array<i64: 16, 16>}, {pipeline_mode = #tpu.pipeline_mode<synchronous>, transform_indices = @transform_3, window_bounds = array<i64: 16, 1>}, {pipeline_mode = #tpu.pipeline_mode<synchronous>, transform_indices = @transform_4, window_bounds = array<i64: 128, 16>}, {pipeline_mode = #tpu.pipeline_mode<synchronous>, transform_indices = @transform_5, window_bounds = array<i64: 128, 1>}, {pipeline_mode = #tpu.pipeline_mode<synchronous>, transform_indices = @transform_6, window_bounds = array<i64: 1, 128>}, {pipeline_mode = #tpu.pipeline_mode<synchronous>, transform_indices = @transform_7, window_bounds = array<i64: 1, 1>}, {transform_indices = @transform_8, window_bounds = array<i64: 1, 512>}]} {
    %c0 = arith.constant 0 : index
    %c0_0 = arith.constant 0 : index
    %0 = vector.load %arg3[%c0, %c0_0] : memref<16x16xf32, #tpu.memory_space<vmem>>, vector<16x16xf32>
    %c0_1 = arith.constant 0 : index
    %c0_2 = arith.constant 0 : index
    %1 = vector.load %arg1[%c0_1, %c0_2] : memref<16x512xf32, #tpu.memory_space<vmem>>, vector<16x512xf32>
    %cst = arith.constant dense<0.000000e+00> : vector<16x512xf32>
    %2 = tpu.matmul %0, %1, %cst {dimension_numbers = #tpu.dot_dimension_numbers<[1], [0], [0], [1], [0, 0, 1, 1], [], []>} : vector<16x16xf32>, vector<16x512xf32>, vector<16x512xf32> -> vector<16x512xf32>
    %c0_3 = arith.constant 0 : index
    %c0_4 = arith.constant 0 : index
    %3 = vector.load %arg4[%c0_3, %c0_4] : memref<16x1xf32, #tpu.memory_space<vmem>>, vector<16x1xf32>
    %4 = vector.broadcast %3 : vector<16x1xf32> to vector<16x512xf32>
    %5 = arith.addf %2, %4 : vector<16x512xf32>
    %c0_5 = arith.constant 0 : index
    %c0_6 = arith.constant 0 : index
    %6 = vector.load %arg2[%c0_5, %c0_6] : memref<16x512xf32, #tpu.memory_space<vmem>>, vector<16x512xf32>
    %7 = arith.addf %5, %6 : vector<16x512xf32>
    %c0_7 = arith.constant 0 : index
    %c0_8 = arith.constant 0 : index
    %8 = vector.load %arg5[%c0_7, %c0_8] : memref<128x16xf32, #tpu.memory_space<vmem>>, vector<128x16xf32>
    %cst_9 = arith.constant dense<0.000000e+00> : vector<128x512xf32>
    %9 = tpu.matmul %8, %7, %cst_9 {dimension_numbers = #tpu.dot_dimension_numbers<[1], [0], [0], [1], [0, 0, 1, 1], [], []>} : vector<128x16xf32>, vector<16x512xf32>, vector<128x512xf32> -> vector<128x512xf32>
    %c0_10 = arith.constant 0 : index
    %c0_11 = arith.constant 0 : index
    %10 = vector.load %arg6[%c0_10, %c0_11] : memref<128x1xf32, #tpu.memory_space<vmem>>, vector<128x1xf32>
    %11 = vector.broadcast %10 : vector<128x1xf32> to vector<128x512xf32>
    %12 = arith.addf %9, %11 : vector<128x512xf32>
    %cst_12 = arith.constant 5.000000e-01 : f32
    %13 = vector.broadcast %cst_12 : f32 to vector<128x512xf32>
    %14 = arith.mulf %13, %12 : vector<128x512xf32>
    %cst_13 = arith.constant 0.707106769 : f32
    %15 = vector.broadcast %cst_13 : f32 to vector<128x512xf32>
    %16 = arith.mulf %12, %15 : vector<128x512xf32>
    %cst_14 = arith.constant 0.000000e+00 : f32
    %17 = vector.broadcast %cst_14 : f32 to vector<128x512xf32>
    %18 = arith.cmpf oge, %16, %17 : vector<128x512xf32>
    %cst_15 = arith.constant 1.000000e+00 : f32
    %cst_16 = arith.constant -1.000000e+00 : f32
    %19 = vector.broadcast %cst_15 : f32 to vector<128x512xf32>
    %20 = vector.broadcast %cst_16 : f32 to vector<128x512xf32>
    %21 = arith.select %18, %19, %20 : vector<128x512xi1>, vector<128x512xf32>
    %22 = math.absf %16 : vector<128x512xf32>
    %cst_17 = arith.constant 0.327591091 : f32
    %23 = vector.broadcast %cst_17 : f32 to vector<128x512xf32>
    %24 = arith.mulf %23, %22 : vector<128x512xf32>
    %cst_18 = arith.constant 1.000000e+00 : f32
    %25 = vector.broadcast %cst_18 : f32 to vector<128x512xf32>
    %26 = arith.addf %25, %24 : vector<128x512xf32>
    %cst_19 = arith.constant 1.000000e+00 : f32
    %27 = vector.broadcast %cst_19 : f32 to vector<128x512xf32>
    %28 = arith.divf %27, %26 : vector<128x512xf32>
    %cst_20 = arith.constant 1.06140542 : f32
    %29 = vector.broadcast %cst_20 : f32 to vector<128x512xf32>
    %30 = arith.mulf %29, %28 : vector<128x512xf32>
    %cst_21 = arith.constant -1.45315206 : f32
    %31 = vector.broadcast %cst_21 : f32 to vector<128x512xf32>
    %32 = arith.addf %30, %31 : vector<128x512xf32>
    %33 = arith.mulf %32, %28 : vector<128x512xf32>
    %cst_22 = arith.constant 1.42141378 : f32
    %34 = vector.broadcast %cst_22 : f32 to vector<128x512xf32>
    %35 = arith.addf %33, %34 : vector<128x512xf32>
    %36 = arith.mulf %35, %28 : vector<128x512xf32>
    %cst_23 = arith.constant -0.284496725 : f32
    %37 = vector.broadcast %cst_23 : f32 to vector<128x512xf32>
    %38 = arith.addf %36, %37 : vector<128x512xf32>
    %39 = arith.mulf %38, %28 : vector<128x512xf32>
    %cst_24 = arith.constant 0.254829586 : f32
    %40 = vector.broadcast %cst_24 : f32 to vector<128x512xf32>
    %41 = arith.addf %39, %40 : vector<128x512xf32>
    %42 = arith.mulf %41, %28 : vector<128x512xf32>
    %cst_25 = arith.constant 0.000000e+00 : f32
    %43 = vector.broadcast %cst_25 : f32 to vector<128x512xf32>
    %44 = arith.subf %43, %22 : vector<128x512xf32>
    %45 = arith.mulf %44, %22 : vector<128x512xf32>
    %46 = math.exp %45 : vector<128x512xf32>
    %47 = arith.mulf %42, %46 : vector<128x512xf32>
    %cst_26 = arith.constant 1.000000e+00 : f32
    %48 = vector.broadcast %cst_26 : f32 to vector<128x512xf32>
    %49 = arith.subf %48, %47 : vector<128x512xf32>
    %50 = arith.mulf %21, %49 : vector<128x512xf32>
    %cst_27 = arith.constant 1.000000e+00 : f32
    %51 = vector.broadcast %cst_27 : f32 to vector<128x512xf32>
    %52 = arith.addf %51, %50 : vector<128x512xf32>
    %53 = arith.mulf %14, %52 : vector<128x512xf32>
    %c0_28 = arith.constant 0 : index
    %c0_29 = arith.constant 0 : index
    %54 = vector.load %arg7[%c0_28, %c0_29] : memref<1x128xf32, #tpu.memory_space<vmem>>, vector<1x128xf32>
    %cst_30 = arith.constant dense<0.000000e+00> : vector<1x512xf32>
    %55 = tpu.matmul %54, %53, %cst_30 {dimension_numbers = #tpu.dot_dimension_numbers<[1], [0], [0], [1], [0, 0, 1, 1], [], []>} : vector<1x128xf32>, vector<128x512xf32>, vector<1x512xf32> -> vector<1x512xf32>
    %c0_31 = arith.constant 0 : index
    %c0_32 = arith.constant 0 : index
    %56 = vector.load %arg8[%c0_31, %c0_32] : memref<1x1xf32, #tpu.memory_space<vmem>>, vector<1x1xf32>
    %57 = vector.broadcast %56 : vector<1x1xf32> to vector<1x512xf32>
    %58 = arith.addf %55, %57 : vector<1x512xf32>
    %c0_33 = arith.constant 0 : index
    %c0_34 = arith.constant 0 : index
    %59 = vector.load %arg9[%c0_33, %c0_34] : memref<1x512xf32, #tpu.memory_space<vmem>>, vector<1x512xf32>
    tpu.vector_store %arg9[%c0_33, %c0_34], %58 {strides = array<i32>} : memref<1x512xf32, #tpu.memory_space<vmem>>, vector<1x512xf32>,
    return
  }
  func.func @transform_0(%arg0: i32) -> (i32, i32) {
    %c0_i32 = arith.constant 0 : i32
    %c0_i32_0 = arith.constant 0 : i32
    return %c0_i32, %arg0 : i32, i32
  }
  func.func @transform_1(%arg0: i32) -> (i32, i32) {
    %c0_i32 = arith.constant 0 : i32
    %c0_i32_0 = arith.constant 0 : i32
    return %c0_i32, %arg0 : i32, i32
  }
  func.func @transform_2(%arg0: i32) -> (i32, i32) {
    %c0_i32 = arith.constant 0 : i32
    %c0_i32_0 = arith.constant 0 : i32
    %c0_i32_1 = arith.constant 0 : i32
    return %c0_i32, %c0_i32_0 : i32, i32
  }
  func.func @transform_3(%arg0: i32) -> (i32, i32) {
    %c0_i32 = arith.constant 0 : i32
    %c0_i32_0 = arith.constant 0 : i32
    %c0_i32_1 = arith.constant 0 : i32
    return %c0_i32, %c0_i32_0 : i32, i32
  }
  func.func @transform_4(%arg0: i32) -> (i32, i32) {
    %c0_i32 = arith.constant 0 : i32
    %c0_i32_0 = arith.constant 0 : i32
    %c0_i32_1 = arith.constant 0 : i32
    return %c0_i32, %c0_i32_0 : i32, i32
  }
  func.func @transform_5(%arg0: i32) -> (i32, i32) {
    %c0_i32 = arith.constant 0 : i32
    %c0_i32_0 = arith.constant 0 : i32
    %c0_i32_1 = arith.constant 0 : i32
    return %c0_i32, %c0_i32_0 : i32, i32
  }
  func.func @transform_6(%arg0: i32) -> (i32, i32) {
    %c0_i32 = arith.constant 0 : i32
    %c0_i32_0 = arith.constant 0 : i32
    %c0_i32_1 = arith.constant 0 : i32
    return %c0_i32, %c0_i32_0 : i32, i32
  }
  func.func @transform_7(%arg0: i32) -> (i32, i32) {
    %c0_i32 = arith.constant 0 : i32
    %c0_i32_0 = arith.constant 0 : i32
    %c0_i32_1 = arith.constant 0 : i32
    return %c0_i32, %c0_i32_0 : i32, i32
  }
  func.func @transform_8(%arg0: i32) -> (i32, i32) {
    %c0_i32 = arith.constant 0 : i32
    %c0_i32_0 = arith.constant 0 : i32
    return %c0_i32, %arg0 : i32, i32
  }
}

</mosaic_0001>

<bundles_post_ra>
// kernel: fno_wor_forward.4
= control target key start
LH: loop header
LB: loop body
LE: loop exit
PB: predicated region body
PF: predicated region fallthrough
CT: control target
= control target key end

     0   :  { %s1166_s18 = smov 0   ;;  %s1168_s19 = smov 0   ;;  %s1505_s0 = inlined_call_operand.vmem [shape: f32[2,16,128], index: 0, kind: input, shape index: {}]   ;;  %s1506_s1 = inlined_call_operand.vmem [shape: f32[2,16,128], index: 1, kind: input, shape index: {}]   ;;  %s1507_s2 = inlined_call_operand.vmem [shape: f32[16,16,128], index: 2, kind: input, shape index: {}]   ;;  %s1508_s3 = inlined_call_operand.vmem [shape: f32[16,16,128], index: 3, kind: input, shape index: {}]   ;;  %s1509_s4 = inlined_call_operand.vmem [shape: f32[2,16,128], index: 4, kind: output, shape index: {0}]   ;;  %s1510_s5 = inlined_call_operand.vmem [shape: f32[2,16,128], index: 5, kind: output, shape index: {1}]  }
   0x1   :  { %s1170_s20 = smov 0  }
   0x2 LB: > { %s28_s21 = sadd.s32 1, %s1130_s19  ;;  %p1013_p0 = scmp.ge.s32.totalorder %s1134_s20, 1  ;;  %s1134_s20 = sphi %s1170_s20, %s16_s20   ;;  %s1130_s19 = sphi %s1168_s19, %s1512_s19   ;;  %s1126_s18 = sphi %s1166_s18, %s1511_s18  }
   0x3   : > { %p30_p1 = scmp.ge.s32.totalorder %s28_s21, 2  ;;  %p244_p2 = scmp.lt.s32.totalorder %s1134_s20, 3 }
   0x5   : > { %s1514_s21 = smov (%p30_p1, %s28_s21), 0  ;;  %p245_p3 = pnand %p1013_p0, %p244_p2 }
   0x6   : > { %p302_p4 = scmp.lt.s32.totalorder (!%p245_p3), %s1126_s18, 1  ;;  %v350_v0 = vlaneseq (!%p245_p3)  ;;  %v346_v2 = vld [vmem:[%s1507_s2] sm:$0xff] (!%p245_p3)  ;;  %v347_v6 = vld [vmem:[%s1507_s2 + $0x8] sm:$0xff] (!%p245_p3)  ;;  %v1022_v20 = vld [vmem:[%s1507_s2 + $0x10] sm:$0xff] (!%p245_p3) }
   0x7   : > { %248 = sbr.rel (%p245_p3) target bundleno = 93 (0x5d), region = 36  ;;  %v348_v7 = vld [vmem:[%s1508_s3] sm:$0xff] (!%p245_p3)  ;;  %v349_v8 = vld [vmem:[%s1508_s3 + $0x8] sm:$0xff] (!%p245_p3)  ;;  %v1023_v21 = vld [vmem:[%s1507_s2 + $0x18] sm:$0xff] (!%p245_p3) }
   0x8   : > { %v351_v1 = vshrl.u32 (!%p245_p3), %v350_v0, 7  ;;  %v1024_v34 = vld [vmem:[%s1508_s3 + $0x10] sm:$0xff] (!%p245_p3)  ;;  %v1025_v35 = vld [vmem:[%s1508_s3 + $0x18] sm:$0xff] (!%p245_p3)  ;;  %v1026_v40 = vld [vmem:[%s1507_s2 + $0x20] sm:$0xff] (!%p245_p3) }
   0x9   : > { %v1027_v41 = vld [vmem:[%s1507_s2 + $0x28] sm:$0xff] (!%p245_p3)  ;;  %v1028_v50 = vld [vmem:[%s1508_s3 + $0x20] sm:$0xff] (!%p245_p3)  ;;  %v1030_v60 = vld [vmem:[%s1507_s2 + $0x30] sm:$0xff] (!%p245_p3) }
   0xa   : > { %v1189_v3 = vsub.s32 (!%p245_p3), 0, %v351_v1  ;;  %v1191_v4 = vsub.s32 (!%p245_p3), 1, %v351_v1  ;;  %v1193_v5 = vsub.s32 (!%p245_p3), 2, %v351_v1  ;;  %v1216_v9 = vsub.s32 (!%p245_p3), 3, %v351_v1  ;;  %v1029_v51 = vld [vmem:[%s1508_s3 + $0x28] sm:$0xff] (!%p245_p3)  ;;  %v1031_v61 = vld [vmem:[%s1507_s2 + $0x38] sm:$0xff] (!%p245_p3) }
   0xb   : > { %v1224_v12 = vsub.s32 (!%p245_p3), 4, %v351_v1  ;;  %v1226_v13 = vsub.s32 (!%p245_p3), 5, %v351_v1  ;;  %v1228_v14 = vsub.s32 (!%p245_p3), 6, %v351_v1  ;;  %v1230_v15 = vsub.s32 (!%p245_p3), 7, %v351_v1 }
   0xe   : > { %s1516_s18 = smov (!%p302_p4, %s1126_s18), 1 }
   0xf   : > { %s1184_s22 = sshll.u32 %s1516_s18, 4 }
  0x10   : > { %s1199_s27 = scalar_lea.vmem %s1505_s0, %s1184_s22  ;;  %s1205_s30 = scalar_lea.vmem %s1506_s1, %s1184_s22 }
  0x11   : > { %v1219_v10 = vld [vmem:[%s1199_s27] sm:$0xff]  ;;  %s333_s12 = scalar_lea.vmem %s1509_s4, %s1184_s22  ;;  %s341_s15 = scalar_lea.vmem %s1510_s5, %s1184_s22 }
  0x12   : > { %v1222_v11 = vld [vmem:[%s1205_s30] sm:$0xff]  ;;  %v353_v16 = vrot.slane %v1219_v10, %v1189_v3  ;;  %v383_v18 = vrot.slane %v1219_v10, %v1191_v4  ;;  %v413_v22 = vrot.slane %v1219_v10, %v1193_v5  ;;  %v443_v24 = vrot.slane %v1219_v10, %v1216_v9 }
  0x13   : > { %v361_v17 = vrot.slane %v1222_v11, %v1189_v3  ;;  %v391_v19 = vrot.slane %v1222_v11, %v1191_v4  ;;  %v421_v23 = vrot.slane %v1222_v11, %v1193_v5  ;;  %v1254_v25 = vrot.slane %v1222_v11, %v1216_v9 }
  0x14   : > { %v354_v26 = vmul.f32 %v353_v16, %v346_v2  ;;  %v355_v27 = vmul.f32 %v353_v16, %v347_v6  ;;  %v366_v30 = vmul.f32 %v353_v16, %v348_v7  ;;  %v367_v31 = vmul.f32 %v353_v16, %v349_v8  ;;  %v1032_v16 = vld [vmem:[%s1508_s3 + $0x30] sm:$0xff] }
  0x15   : > { %v362_v28 = vmul.f32 %v361_v17, %v348_v7  ;;  %v363_v29 = vmul.f32 %v361_v17, %v349_v8  ;;  %v370_v32 = vmul.f32 %v361_v17, %v346_v2  ;;  %v371_v33 = vmul.f32 %v361_v17, %v347_v6  ;;  %v1033_v17 = vld [vmem:[%s1508_s3 + $0x38] sm:$0xff] }
  0x16   : > { %v384_v38 = vmul.f32 %v1022_v20, %v383_v18  ;;  %v385_v39 = vmul.f32 %v1023_v21, %v383_v18  ;;  %v392_v44 = vmul.f32 %v1024_v34, %v391_v19  ;;  %v393_v45 = vmul.f32 %v1025_v35, %v391_v19 }
  0x17   : > { %v364_v36 = vsub.f32 %v354_v26, %v362_v28  ;;  %v365_v37 = vsub.f32 %v355_v27, %v363_v29  ;;  %v372_v42 = vadd.f32 %v370_v32, %v366_v30  ;;  %v373_v43 = vadd.f32 %v371_v33, %v367_v31 }
  0x18   : > { %v396_v48 = vmul.f32 %v1024_v34, %v383_v18  ;;  %v397_v49 = vmul.f32 %v1025_v35, %v383_v18  ;;  %v400_v52 = vmul.f32 %v1022_v20, %v391_v19  ;;  %v401_v53 = vmul.f32 %v1023_v21, %v391_v19 }
  0x19   : > { %v386_v46 = vadd.f32 %v384_v38, %v364_v36  ;;  %v387_v47 = vadd.f32 %v385_v39, %v365_v37  ;;  %v414_v54 = vmul.f32 %v1026_v40, %v413_v22  ;;  %v415_v55 = vmul.f32 %v1027_v41, %v413_v22  ;;  %v1035_v37 = vld [vmem:[%s1507_s2 + $0x48] sm:$0xff] }
  0x1a   : > { %v398_v58 = vadd.f32 %v396_v48, %v372_v42  ;;  %v399_v59 = vadd.f32 %v397_v49, %v373_v43  ;;  %v422_v62 = vmul.f32 %v1028_v50, %v421_v23  ;;  %v423_v63 = vmul.f32 %v1029_v51, %v421_v23 }
  0x1b   : > { %v394_v56 = vsub.f32 %v386_v46, %v392_v44  ;;  %v395_v57 = vsub.f32 %v387_v47, %v393_v45  ;;  %v426_v0 = vmul.f32 %v1028_v50, %v413_v22  ;;  %v427_v1 = vmul.f32 %v1029_v51, %v413_v22 }
  0x1c   : > { %v402_v2 = vadd.f32 %v400_v52, %v398_v58  ;;  %v403_v6 = vadd.f32 %v401_v53, %v399_v59  ;;  %v430_v18 = vmul.f32 %v1026_v40, %v421_v23  ;;  %v431_v19 = vmul.f32 %v1027_v41, %v421_v23  ;;  %v1034_v23 = vld [vmem:[%s1507_s2 + $0x40] sm:$0xff]  ;;  %v1037_v40 = vld [vmem:[%s1508_s3 + $0x48] sm:$0xff]  ;;  %v1038_v58 = vld [vmem:[%s1507_s2 + $0x50] sm:$0xff] }
  0x1d   : > { %v416_v7 = vadd.f32 %v414_v54, %v394_v56  ;;  %v417_v8 = vadd.f32 %v415_v55, %v395_v57  ;;  %v444_v20 = vmul.f32 %v1030_v60, %v443_v24  ;;  %v445_v21 = vmul.f32 %v1031_v61, %v443_v24  ;;  %v1039_v59 = vld [vmem:[%s1507_s2 + $0x58] sm:$0xff] }
  0x1e   : > { %v428_v28 = vadd.f32 %v426_v0, %v402_v2  ;;  %v429_v22 = vadd.f32 %v427_v1, %v403_v6  ;;  %v452_v29 = vmul.f32 %v1032_v16, %v1254_v25  ;;  %v453_v30 = vmul.f32 %v1033_v17, %v1254_v25 }
  0x1f   : > { %v424_v26 = vsub.f32 %v416_v7, %v422_v62  ;;  %v425_v27 = vsub.f32 %v417_v8, %v423_v63  ;;  %v456_v31 = vmul.f32 %v1032_v16, %v443_v24  ;;  %v457_v32 = vmul.f32 %v1033_v17, %v443_v24  ;;  %v1036_v24 = vld [vmem:[%s1508_s3 + $0x40] sm:$0xff]  ;;  %v1040_v62 = vld [vmem:[%s1508_s3 + $0x50] sm:$0xff]  ;;  %v1041_v63 = vld [vmem:[%s1508_s3 + $0x58] sm:$0xff] }
  0x20   : > { %v432_v33 = vadd.f32 %v430_v18, %v428_v28  ;;  %v433_v34 = vadd.f32 %v431_v19, %v429_v22  ;;  %v460_v38 = vmul.f32 %v1030_v60, %v1254_v25  ;;  %v461_v39 = vmul.f32 %v1031_v61, %v1254_v25 }
  0x21   : > { %v446_v35 = vadd.f32 %v444_v20, %v424_v26  ;;  %v447_v36 = vadd.f32 %v445_v21, %v425_v27  ;;  %v473_v41 = vrot.slane %v1219_v10, %v1224_v12  ;;  %v481_v42 = vrot.slane %v1222_v11, %v1224_v12  ;;  %v1042_v20 = vld [vmem:[%s1507_s2 + $0x60] sm:$0xff]  ;;  %v1043_v21 = vld [vmem:[%s1507_s2 + $0x68] sm:$0xff] }
  0x22   : > { %v458_v45 = vadd.f32 %v456_v31, %v432_v33  ;;  %v459_v46 = vadd.f32 %v457_v32, %v433_v34  ;;  %v503_v0 = vrot.slane %v1219_v10, %v1226_v13  ;;  %v511_v1 = vrot.slane %v1222_v11, %v1226_v13  ;;  %v1044_v33 = vld [vmem:[%s1508_s3 + $0x60] sm:$0xff]  ;;  %v1045_v34 = vld [vmem:[%s1508_s3 + $0x68] sm:$0xff] }
  0x23   : > { %v454_v43 = vsub.f32 %v446_v35, %v452_v29  ;;  %v455_v44 = vsub.f32 %v447_v36, %v453_v30  ;;  %v474_v47 = vmul.f32 %v1034_v23, %v473_v41  ;;  %v475_v25 = vmul.f32 %v1035_v37, %v473_v41 }
  0x24   : > { %v482_v48 = vmul.f32 %v1036_v24, %v481_v42  ;;  %v483_v49 = vmul.f32 %v1037_v40, %v481_v42  ;;  %v462_v50 = vadd.f32 %v460_v38, %v458_v45  ;;  %v463_v51 = vadd.f32 %v461_v39, %v459_v46 }
  0x25   : > { %v486_v52 = vmul.f32 %v1036_v24, %v473_v41  ;;  %v487_v53 = vmul.f32 %v1037_v40, %v473_v41  ;;  %v476_v54 = vadd.f32 %v474_v47, %v454_v43  ;;  %v477_v55 = vadd.f32 %v475_v25, %v455_v44  ;;  %v1339_v41 = vld [vmem:[%s1199_s27 + $0x8] sm:$0xff] }
  0x26   : > { %v490_v56 = vmul.f32 %v1034_v23, %v481_v42  ;;  %v491_v57 = vmul.f32 %v1035_v37, %v481_v42  ;;  %v533_v7 = vrot.slane %v1219_v10, %v1228_v14  ;;  %v541_v8 = vrot.slane %v1222_v11, %v1228_v14  ;;  %v1342_v42 = vld [vmem:[%s1205_s30 + $0x8] sm:$0xff] }
  0x27   : > { %v488_v60 = vadd.f32 %v486_v52, %v462_v50  ;;  %v489_v61 = vadd.f32 %v487_v53, %v463_v51  ;;  %v484_v2 = vsub.f32 %v476_v54, %v482_v48  ;;  %v485_v6 = vsub.f32 %v477_v55, %v483_v49  ;;  %v1046_v50 = vld [vmem:[%s1507_s2 + $0x70] sm:$0xff]  ;;  %v1047_v51 = vld [vmem:[%s1507_s2 + $0x78] sm:$0xff] }
  0x28   : > { %v504_v18 = vmul.f32 %v1038_v58, %v503_v0  ;;  %v505_v19 = vmul.f32 %v1039_v59, %v503_v0  ;;  %v512_v26 = vmul.f32 %v1040_v62, %v511_v1  ;;  %v513_v27 = vmul.f32 %v1041_v63, %v511_v1  ;;  %v1048_v54 = vld [vmem:[%s1508_s3 + $0x70] sm:$0xff]  ;;  %v1049_v55 = vld [vmem:[%s1508_s3 + $0x78] sm:$0xff] }
  0x29   : > { %v492_v16 = vadd.f32 %v490_v56, %v488_v60  ;;  %v493_v17 = vadd.f32 %v491_v57, %v489_v61  ;;  %v516_v28 = vmul.f32 %v1040_v62, %v503_v0  ;;  %v517_v22 = vmul.f32 %v1041_v63, %v503_v0 }
  0x2a   : > { %v506_v29 = vadd.f32 %v504_v18, %v484_v2  ;;  %v507_v30 = vadd.f32 %v505_v19, %v485_v6  ;;  %v520_v31 = vmul.f32 %v1038_v58, %v511_v1  ;;  %v521_v32 = vmul.f32 %v1039_v59, %v511_v1  ;;  %v1050_v2 = vld [vmem:[%s1507_s2 + $0x80] sm:$0xff] }
  0x2b   : > { %v518_v35 = vadd.f32 %v516_v28, %v492_v16  ;;  %v519_v36 = vadd.f32 %v517_v22, %v493_v17  ;;  %v534_v23 = vmul.f32 %v1042_v20, %v533_v7  ;;  %v535_v37 = vmul.f32 %v1043_v21, %v533_v7  ;;  %v1052_v19 = vld [vmem:[%s1508_s3 + $0x80] sm:$0xff] }
  0x2c   : > { %v514_v38 = vsub.f32 %v506_v29, %v512_v26  ;;  %v515_v39 = vsub.f32 %v507_v30, %v513_v27  ;;  %v542_v24 = vmul.f32 %v1044_v33, %v541_v8  ;;  %v543_v40 = vmul.f32 %v1045_v34, %v541_v8 }
  0x2d   : > { %v522_v43 = vadd.f32 %v520_v31, %v518_v35  ;;  %v523_v44 = vadd.f32 %v521_v32, %v519_v36  ;;  %v546_v45 = vmul.f32 %v1044_v33, %v533_v7  ;;  %v547_v46 = vmul.f32 %v1045_v34, %v533_v7 }
  0x2e   : > { %v536_v47 = vadd.f32 %v534_v23, %v514_v38  ;;  %v537_v25 = vadd.f32 %v535_v37, %v515_v39  ;;  %v550_v48 = vmul.f32 %v1042_v20, %v541_v8  ;;  %v551_v49 = vmul.f32 %v1043_v21, %v541_v8  ;;  %v1053_v20 = vld [vmem:[%s1508_s3 + $0x88] sm:$0xff]  ;;  %v1054_v39 = vld [vmem:[%s1507_s2 + $0x90] sm:$0xff] }
  0x2f   : > { %v548_v52 = vadd.f32 %v546_v45, %v522_v43  ;;  %v549_v53 = vadd.f32 %v547_v46, %v523_v44  ;;  %v563_v56 = vrot.slane %v1219_v10, %v1230_v15  ;;  %v571_v57 = vrot.slane %v1222_v11, %v1230_v15  ;;  %v1051_v10 = vld [vmem:[%s1507_s2 + $0x88] sm:$0xff]  ;;  %v1056_v44 = vld [vmem:[%s1508_s3 + $0x90] sm:$0xff]  ;;  %v1057_v45 = vld [vmem:[%s1508_s3 + $0x98] sm:$0xff] }
  0x30   : > { %v544_v58 = vsub.f32 %v536_v47, %v542_v24  ;;  %v545_v59 = vsub.f32 %v537_v25, %v543_v40  ;;  %v593_v60 = vrot.slane %v1339_v41, %v1189_v3  ;;  %v601_v61 = vrot.slane %v1342_v42, %v1189_v3  ;;  %v1055_v24 = vld [vmem:[%s1507_s2 + $0x98] sm:$0xff] }
  0x31   : > { %v552_v62 = vadd.f32 %v550_v48, %v548_v52  ;;  %v553_v63 = vadd.f32 %v551_v49, %v549_v53  ;;  %v564_v0 = vmul.f32 %v1046_v50, %v563_v56  ;;  %v565_v1 = vmul.f32 %v1047_v51, %v563_v56 }
  0x32   : > { %v572_v11 = vmul.f32 %v1048_v54, %v571_v57  ;;  %v573_v6 = vmul.f32 %v1049_v55, %v571_v57  ;;  %v576_v7 = vmul.f32 %v1048_v54, %v563_v56  ;;  %v577_v8 = vmul.f32 %v1049_v55, %v563_v56  ;;  %v1058_v55 = vld [vmem:[%s1507_s2 + $0xa0] sm:$0xff] }
  0x33   : > { %v566_v16 = vadd.f32 %v564_v0, %v544_v58  ;;  %v567_v17 = vadd.f32 %v565_v1, %v545_v59  ;;  %v580_v18 = vmul.f32 %v1046_v50, %v571_v57  ;;  %v581_v3 = vmul.f32 %v1047_v51, %v571_v57  ;;  %v1061_v0 = vld [vmem:[%s1508_s3 + $0xa8] sm:$0xff] }
  0x34   : > { %v578_v21 = vadd.f32 %v576_v7, %v552_v62  ;;  %v579_v26 = vadd.f32 %v577_v8, %v553_v63  ;;  %v594_v27 = vmul.f32 %v1050_v2, %v593_v60  ;;  %v595_v28 = vmul.f32 %v1051_v10, %v593_v60  ;;  %v1060_v63 = vld [vmem:[%s1508_s3 + $0xa0] sm:$0xff] }
  0x35   : > { %v574_v22 = vsub.f32 %v566_v16, %v572_v11  ;;  %v575_v29 = vsub.f32 %v567_v17, %v573_v6  ;;  %v602_v30 = vmul.f32 %v1052_v19, %v601_v61  ;;  %v603_v31 = vmul.f32 %v1053_v20, %v601_v61 }
  0x36   : > { %v582_v32 = vadd.f32 %v580_v18, %v578_v21  ;;  %v583_v33 = vadd.f32 %v581_v3, %v579_v26  ;;  %v606_v34 = vmul.f32 %v1052_v19, %v593_v60  ;;  %v607_v35 = vmul.f32 %v1053_v20, %v593_v60 }
  0x37   : > { %v596_v36 = vadd.f32 %v594_v27, %v574_v22  ;;  %v597_v23 = vadd.f32 %v595_v28, %v575_v29  ;;  %v610_v37 = vmul.f32 %v1050_v2, %v601_v61  ;;  %v611_v38 = vmul.f32 %v1051_v10, %v601_v61  ;;  %v1062_v28 = vld [vmem:[%s1507_s2 + $0xb0] sm:$0xff]  ;;  %v1063_v22 = vld [vmem:[%s1507_s2 + $0xb8] sm:$0xff] }
  0x38   : > { %v608_v40 = vadd.f32 %v606_v34, %v582_v32  ;;  %v609_v43 = vadd.f32 %v607_v35, %v583_v33  ;;  %v623_v46 = vrot.slane %v1339_v41, %v1191_v4  ;;  %v631_v47 = vrot.slane %v1342_v42, %v1191_v4  ;;  %v1059_v4 = vld [vmem:[%s1507_s2 + $0xa8] sm:$0xff]  ;;  %v1065_v32 = vld [vmem:[%s1508_s3 + $0xb8] sm:$0xff] }
  0x39   : > { %v604_v25 = vsub.f32 %v596_v36, %v602_v30  ;;  %v605_v48 = vsub.f32 %v597_v23, %v603_v31  ;;  %v653_v49 = vrot.slane %v1339_v41, %v1193_v5  ;;  %v661_v50 = vrot.slane %v1342_v42, %v1193_v5  ;;  %v1064_v31 = vld [vmem:[%s1508_s3 + $0xb0] sm:$0xff] }
  0x3a   : > { %v612_v51 = vadd.f32 %v610_v37, %v608_v40  ;;  %v613_v52 = vadd.f32 %v611_v38, %v609_v43  ;;  %v624_v53 = vmul.f32 %v1054_v39, %v623_v46  ;;  %v625_v54 = vmul.f32 %v1055_v24, %v623_v46  ;;  %v1066_v43 = vld [vmem:[%s1507_s2 + $0xc0] sm:$0xff] }
  0x3b   : > { %v632_v56 = vmul.f32 %v1056_v44, %v631_v47  ;;  %v633_v57 = vmul.f32 %v1057_v45, %v631_v47  ;;  %v636_v58 = vmul.f32 %v1056_v44, %v623_v46  ;;  %v637_v59 = vmul.f32 %v1057_v45, %v623_v46 }
  0x3c   : > { %v626_v60 = vadd.f32 %v624_v53, %v604_v25  ;;  %v627_v61 = vadd.f32 %v625_v54, %v605_v48  ;;  %v640_v62 = vmul.f32 %v1054_v39, %v631_v47  ;;  %v641_v5 = vmul.f32 %v1055_v24, %v631_v47 }
  0x3d   : > { %v638_v1 = vadd.f32 %v636_v58, %v612_v51  ;;  %v639_v2 = vadd.f32 %v637_v59, %v613_v52  ;;  %v654_v10 = vmul.f32 %v1058_v55, %v653_v49  ;;  %v655_v11 = vmul.f32 %v1059_v4, %v653_v49  ;;  %v1069_v51 = vld [vmem:[%s1508_s3 + $0xc8] sm:$0xff] }
  0x3e   : > { %v634_v6 = vsub.f32 %v626_v60, %v632_v56  ;;  %v635_v7 = vsub.f32 %v627_v61, %v633_v57  ;;  %v662_v8 = vmul.f32 %v1060_v63, %v661_v50  ;;  %v663_v16 = vmul.f32 %v1061_v0, %v661_v50 }
  0x3f   : > { %v642_v17 = vadd.f32 %v640_v62, %v638_v1  ;;  %v643_v18 = vadd.f32 %v641_v5, %v639_v2  ;;  %v666_v3 = vmul.f32 %v1060_v63, %v653_v49  ;;  %v667_v19 = vmul.f32 %v1061_v0, %v653_v49  ;;  %v1070_v2 = vld [vmem:[%s1507_s2 + $0xd0] sm:$0xff] }
  0x40   : > { %v656_v20 = vadd.f32 %v654_v10, %v634_v6  ;;  %v657_v21 = vadd.f32 %v655_v11, %v635_v7  ;;  %v670_v26 = vmul.f32 %v1058_v55, %v661_v50  ;;  %v671_v27 = vmul.f32 %v1059_v4, %v661_v50  ;;  %v1068_v50 = vld [vmem:[%s1508_s3 + $0xc0] sm:$0xff]  ;;  %v1071_v10 = vld [vmem:[%s1507_s2 + $0xd8] sm:$0xff]  ;;  %v1072_v7 = vld [vmem:[%s1508_s3 + $0xd0] sm:$0xff] }
  0x41   : > { %v668_v29 = vadd.f32 %v666_v3, %v642_v17  ;;  %v669_v30 = vadd.f32 %v667_v19, %v643_v18  ;;  %v683_v33 = vrot.slane %v1339_v41, %v1216_v9  ;;  %v691_v34 = vrot.slane %v1342_v42, %v1216_v9  ;;  %v1067_v9 = vld [vmem:[%s1507_s2 + $0xc8] sm:$0xff] }
  0x42   : > { %v664_v35 = vsub.f32 %v656_v20, %v662_v8  ;;  %v665_v36 = vsub.f32 %v657_v21, %v663_v16  ;;  %v713_v23 = vrot.slane %v1339_v41, %v1224_v12  ;;  %v721_v37 = vrot.slane %v1342_v42, %v1224_v12  ;;  %v1073_v8 = vld [vmem:[%s1508_s3 + $0xd8] sm:$0xff] }
  0x43   : > { %v672_v38 = vadd.f32 %v670_v26, %v668_v29  ;;  %v673_v39 = vadd.f32 %v671_v27, %v669_v30  ;;  %v684_v24 = vmul.f32 %v1062_v28, %v683_v33  ;;  %v685_v40 = vmul.f32 %v1063_v22, %v683_v33 }
  0x44   : > { %v692_v44 = vmul.f32 %v1064_v31, %v691_v34  ;;  %v693_v45 = vmul.f32 %v1065_v32, %v691_v34  ;;  %v696_v46 = vmul.f32 %v1064_v31, %v683_v33  ;;  %v697_v47 = vmul.f32 %v1065_v32, %v683_v33 }
  0x45   : > { %v686_v25 = vadd.f32 %v684_v24, %v664_v35  ;;  %v687_v48 = vadd.f32 %v685_v40, %v665_v36  ;;  %v700_v49 = vmul.f32 %v1062_v28, %v691_v34  ;;  %v701_v12 = vmul.f32 %v1063_v22, %v691_v34  ;;  %v1074_v22 = vld [vmem:[%s1507_s2 + $0xe0] sm:$0xff] }
  0x46   : > { %v698_v52 = vadd.f32 %v696_v46, %v672_v38  ;;  %v699_v53 = vadd.f32 %v697_v47, %v673_v39  ;;  %v714_v54 = vmul.f32 %v1066_v43, %v713_v23  ;;  %v715_v55 = vmul.f32 %v1067_v9, %v713_v23  ;;  %v1076_v36 = vld [vmem:[%s1508_s3 + $0xe0] sm:$0xff] }
  0x47   : > { %v694_v4 = vsub.f32 %v686_v25, %v692_v44  ;;  %v695_v56 = vsub.f32 %v687_v48, %v693_v45  ;;  %v722_v57 = vmul.f32 %v1068_v50, %v721_v37  ;;  %v723_v58 = vmul.f32 %v1069_v51, %v721_v37 }
  0x48   : > { %v702_v59 = vadd.f32 %v700_v49, %v698_v52  ;;  %v703_v60 = vadd.f32 %v701_v12, %v699_v53  ;;  %v726_v61 = vmul.f32 %v1068_v50, %v713_v23  ;;  %v727_v62 = vmul.f32 %v1069_v51, %v713_v23  ;;  %v1077_v23 = vld [vmem:[%s1508_s3 + $0xe8] sm:$0xff]  ;;  %v1078_v51 = vld [vmem:[%s1507_s2 + $0xf0] sm:$0xff]  ;;  %v1079_v52 = vld [vmem:[%s1507_s2 + $0xf8] sm:$0xff] }
  0x49   : > { %v716_v5 = vadd.f32 %v714_v54, %v694_v4  ;;  %v717_v63 = vadd.f32 %v715_v55, %v695_v56  ;;  %v730_v0 = vmul.f32 %v1066_v43, %v721_v37  ;;  %v731_v1 = vmul.f32 %v1067_v9, %v721_v37  ;;  %v1080_v55 = vld [vmem:[%s1508_s3 + $0xf0] sm:$0xff]  ;;  %v1081_v4 = vld [vmem:[%s1508_s3 + $0xf8] sm:$0xff] }
  0x4a   : > { %v728_v11 = vadd.f32 %v726_v61, %v702_v59  ;;  %v729_v6 = vadd.f32 %v727_v62, %v703_v60  ;;  %v743_v16 = vrot.slane %v1339_v41, %v1226_v13  ;;  %v751_v17 = vrot.slane %v1342_v42, %v1226_v13  ;;  %v1075_v13 = vld [vmem:[%s1507_s2 + $0xe8] sm:$0xff] }
  0x4b   : > { %v724_v18 = vsub.f32 %v716_v5, %v722_v57  ;;  %v725_v3 = vsub.f32 %v717_v63, %v723_v58  ;;  %v773_v19 = vrot.slane %v1339_v41, %v1228_v14  ;;  %v781_v20 = vrot.slane %v1342_v42, %v1228_v14 }
  0x4c   : > { %v732_v21 = vadd.f32 %v730_v0, %v728_v11  ;;  %v733_v26 = vadd.f32 %v731_v1, %v729_v6  ;;  %v744_v27 = vmul.f32 %v1070_v2, %v743_v16  ;;  %v745_v28 = vmul.f32 %v1071_v10, %v743_v16 }
  0x4d   : > { %v752_v29 = vmul.f32 %v1072_v7, %v751_v17  ;;  %v753_v30 = vmul.f32 %v1073_v8, %v751_v17  ;;  %v756_v31 = vmul.f32 %v1072_v7, %v743_v16  ;;  %v757_v32 = vmul.f32 %v1073_v8, %v743_v16 }
  0x4e   : > { %v746_v33 = vadd.f32 %v744_v27, %v724_v18  ;;  %v747_v34 = vadd.f32 %v745_v28, %v725_v3  ;;  %v760_v35 = vmul.f32 %v1070_v2, %v751_v17  ;;  %v761_v14 = vmul.f32 %v1071_v10, %v751_v17 }
  0x4f   : > { %v758_v37 = vadd.f32 %v756_v31, %v732_v21  ;;  %v759_v38 = vadd.f32 %v757_v32, %v733_v26  ;;  %v774_v39 = vmul.f32 %v1074_v22, %v773_v19  ;;  %v775_v24 = vmul.f32 %v1075_v13, %v773_v19 }
  0x50   : > { %v754_v40 = vsub.f32 %v746_v33, %v752_v29  ;;  %v755_v43 = vsub.f32 %v747_v34, %v753_v30  ;;  %v782_v9 = vmul.f32 %v1076_v36, %v781_v20  ;;  %v783_v44 = vmul.f32 %v1077_v23, %v781_v20 }
  0x51   : > { %v762_v45 = vadd.f32 %v760_v35, %v758_v37  ;;  %v763_v46 = vadd.f32 %v761_v14, %v759_v38  ;;  %v786_v47 = vmul.f32 %v1076_v36, %v773_v19  ;;  %v787_v25 = vmul.f32 %v1077_v23, %v773_v19 }
  0x52   : > { %v776_v48 = vadd.f32 %v774_v39, %v754_v40  ;;  %v777_v49 = vadd.f32 %v775_v24, %v755_v43  ;;  %v790_v12 = vmul.f32 %v1074_v22, %v781_v20  ;;  %v791_v50 = vmul.f32 %v1075_v13, %v781_v20 }
  0x53   : > { %v788_v53 = vadd.f32 %v786_v47, %v762_v45  ;;  %v789_v54 = vadd.f32 %v787_v25, %v763_v46  ;;  %v803_v56 = vrot.slane %v1339_v41, %v1230_v15  ;;  %v811_v57 = vrot.slane %v1342_v42, %v1230_v15 }
  0x54   : > { %v784_v58 = vsub.f32 %v776_v48, %v782_v9  ;;  %v785_v59 = vsub.f32 %v777_v49, %v783_v44 }
  0x55   : > { %v792_v60 = vadd.f32 %v790_v12, %v788_v53  ;;  %v793_v61 = vadd.f32 %v791_v50, %v789_v54  ;;  %v804_v62 = vmul.f32 %v1078_v51, %v803_v56  ;;  %v805_v5 = vmul.f32 %v1079_v52, %v803_v56 }
  0x56   : > { %v812_v63 = vmul.f32 %v1080_v55, %v811_v57  ;;  %v813_v0 = vmul.f32 %v1081_v4, %v811_v57  ;;  %v816_v1 = vmul.f32 %v1080_v55, %v803_v56  ;;  %v817_v2 = vmul.f32 %v1081_v4, %v803_v56 }
  0x57   : > { %v806_v10 = vadd.f32 %v804_v62, %v784_v58  ;;  %v807_v11 = vadd.f32 %v805_v5, %v785_v59  ;;  %v820_v6 = vmul.f32 %v1078_v51, %v811_v57  ;;  %v821_v7 = vmul.f32 %v1079_v52, %v811_v57 }
  0x58   : > { %v818_v15 = vadd.f32 %v816_v1, %v792_v60  ;;  %v819_v41 = vadd.f32 %v817_v2, %v793_v61 }
  0x59   : > { %v814_v42 = vsub.f32 %v806_v10, %v812_v63  ;;  %v815_v8 = vsub.f32 %v807_v11, %v813_v0 }
  0x5a   : > { %v822_v16 = vadd.f32 %v820_v6, %v818_v15  ;;  %v823_v17 = vadd.f32 %v821_v7, %v819_v41 }
  0x5b   : > { %824 = vst [vmem:[%s333_s12] sm:$0xff] %v814_v42  ;;  %825 = vst [vmem:[%s333_s12 + $0x8] sm:$0xff] %v815_v8 }
  0x5c   : > { %826 = vst [vmem:[%s341_s15] sm:$0xff] %v822_v16  ;;  %827 = vst [vmem:[%s341_s15 + $0x8] sm:$0xff] %v823_v17 }
  0x5d PF: > { %s16_s20 = sadd.s32 1, %s1134_s20   ;;  %s1511_s18 = smov %s1130_s19 }
  0x5e   : > { %p13_p5 = scmp.ge.s32.totalorder %s16_s20, 4   ;;  %s1512_s19 = smov %s1514_s21 }
  0x60   :  { %15 = sbr.rel (!%p13_p5) target bundleno = 2 (0x2), region = 117 }

// kernel: reverse.4
= control target key start
LH: loop header
LB: loop body
LE: loop exit
PB: predicated region body
PF: predicated region fallthrough
CT: control target
= control target key end

     0   :  { %s440_s0 = inlined_call_operand.vmem [shape: f32[16,2,20,9], index: 0, kind: input, shape index: {}]   ;;  %s441_s1 = inlined_call_operand.vmem [shape: f32[16,2,20,9], index: 1, kind: output, shape index: {}]  }
   0x1   :  { %v144_v0 = vld [vmem:[%s440_s0 + $0x80] sm:$0xff]  ;;  %v145_v1 = vld [vmem:[%s440_s0 + $0x110] sm:$0xff]  ;;  %v178_v18 = vld [vmem:[%s440_s0 + $0x88] sm:$0xff] }
   0x2   :  { %v147_v2 = vld [vmem:[%s440_s0 + $0x70] sm:$0xff]  ;;  %4 = vst [vmem:[%s441_s1] sm:$0xff] %v144_v0  ;;  %146 = vst [vmem:[%s441_s1 + $0x90] sm:$0xff] %v145_v1  ;;  %v149_v3 = vld [vmem:[%s440_s0 + $0x100] sm:$0xff] }
   0x3   :  { %148 = vst [vmem:[%s441_s1 + $0x10] sm:$0xff] %v147_v2  ;;  %v151_v4 = vld [vmem:[%s440_s0 + $0x60] sm:$0xff]  ;;  %v153_v5 = vld [vmem:[%s440_s0 + $0xf0] sm:$0xff]  ;;  %150 = vst [vmem:[%s441_s1 + $0xa0] sm:$0xff] %v149_v3 }
   0x4   :  { %152 = vst [vmem:[%s441_s1 + $0x20] sm:$0xff] %v151_v4  ;;  %154 = vst [vmem:[%s441_s1 + $0xb0] sm:$0xff] %v153_v5  ;;  %v155_v6 = vld [vmem:[%s440_s0 + $0x50] sm:$0xff]  ;;  %v157_v7 = vld [vmem:[%s440_s0 + $0xe0] sm:$0xff] }
   0x5   :  { %v159_v8 = vld [vmem:[%s440_s0 + $0x40] sm:$0xff]  ;;  %156 = vst [vmem:[%s441_s1 + $0x30] sm:$0xff] %v155_v6  ;;  %158 = vst [vmem:[%s441_s1 + $0xc0] sm:$0xff] %v157_v7  ;;  %v161_v9 = vld [vmem:[%s440_s0 + $0xd0] sm:$0xff] }
   0x6   :  { %160 = vst [vmem:[%s441_s1 + $0x40] sm:$0xff] %v159_v8  ;;  %v163_v10 = vld [vmem:[%s440_s0 + $0x30] sm:$0xff]  ;;  %v165_v11 = vld [vmem:[%s440_s0 + $0xc0] sm:$0xff]  ;;  %162 = vst [vmem:[%s441_s1 + $0xd0] sm:$0xff] %v161_v9 }
   0x7   :  { %164 = vst [vmem:[%s441_s1 + $0x50] sm:$0xff] %v163_v10  ;;  %166 = vst [vmem:[%s441_s1 + $0xe0] sm:$0xff] %v165_v11  ;;  %v167_v12 = vld [vmem:[%s440_s0 + $0x20] sm:$0xff]  ;;  %v169_v13 = vld [vmem:[%s440_s0 + $0xb0] sm:$0xff] }
   0x8   :  { %v171_v14 = vld [vmem:[%s440_s0 + $0x10] sm:$0xff]  ;;  %168 = vst [vmem:[%s441_s1 + $0x60] sm:$0xff] %v167_v12  ;;  %170 = vst [vmem:[%s441_s1 + $0xf0] sm:$0xff] %v169_v13  ;;  %v173_v15 = vld [vmem:[%s440_s0 + $0xa0] sm:$0xff] }
   0x9   :  { %172 = vst [vmem:[%s441_s1 + $0x70] sm:$0xff] %v171_v14  ;;  %v65_v16 = vld [vmem:[%s440_s0] sm:$0xff]  ;;  %v176_v17 = vld [vmem:[%s440_s0 + $0x90] sm:$0xff]  ;;  %174 = vst [vmem:[%s441_s1 + $0x100] sm:$0xff] %v173_v15 }
   0xa   :  { %175 = vst [vmem:[%s441_s1 + $0x80] sm:$0xff] %v65_v16  ;;  %177 = vst [vmem:[%s441_s1 + $0x110] sm:$0xff] %v176_v17  ;;  %v180_v19 = vld [vmem:[%s440_s0 + $0x118] sm:$0xff]  ;;  %v184_v21 = vld [vmem:[%s440_s0 + $0x108] sm:$0xff] }
   0xb   :  { %v182_v20 = vld [vmem:[%s440_s0 + $0x78] sm:$0xff]  ;;  %179 = vst [vmem:[%s441_s1 + $0x8] sm:$0xff] %v178_v18  ;;  %181 = vst [vmem:[%s441_s1 + $0x98] sm:$0xff] %v180_v19  ;;  %v186_v22 = vld [vmem:[%s440_s0 + $0x68] sm:$0xff] }
   0xc   :  { %183 = vst [vmem:[%s441_s1 + $0x18] sm:$0xff] %v182_v20  ;;  %v188_v23 = vld [vmem:[%s440_s0 + $0xf8] sm:$0xff]  ;;  %185 = vst [vmem:[%s441_s1 + $0xa8] sm:$0xff] %v184_v21  ;;  %v192_v25 = vld [vmem:[%s440_s0 + $0xe8] sm:$0xff] }
   0xd   :  { %187 = vst [vmem:[%s441_s1 + $0x28] sm:$0xff] %v186_v22  ;;  %189 = vst [vmem:[%s441_s1 + $0xb8] sm:$0xff] %v188_v23  ;;  %v190_v24 = vld [vmem:[%s440_s0 + $0x58] sm:$0xff]  ;;  %v194_v26 = vld [vmem:[%s440_s0 + $0x48] sm:$0xff] }
   0xe   :  { %191 = vst [vmem:[%s441_s1 + $0x38] sm:$0xff] %v190_v24  ;;  %193 = vst [vmem:[%s441_s1 + $0xc8] sm:$0xff] %v192_v25  ;;  %v196_v27 = vld [vmem:[%s440_s0 + $0xd8] sm:$0xff]  ;;  %v200_v29 = vld [vmem:[%s440_s0 + $0xc8] sm:$0xff] }
   0xf   :  { %195 = vst [vmem:[%s441_s1 + $0x48] sm:$0xff] %v194_v26  ;;  %v198_v28 = vld [vmem:[%s440_s0 + $0x38] sm:$0xff]  ;;  %197 = vst [vmem:[%s441_s1 + $0xd8] sm:$0xff] %v196_v27  ;;  %v202_v30 = vld [vmem:[%s440_s0 + $0x28] sm:$0xff] }
  0x10   :  { %199 = vst [vmem:[%s441_s1 + $0x58] sm:$0xff] %v198_v28  ;;  %201 = vst [vmem:[%s441_s1 + $0xe8] sm:$0xff] %v200_v29  ;;  %v204_v31 = vld [vmem:[%s440_s0 + $0xb8] sm:$0xff]  ;;  %v208_v33 = vld [vmem:[%s440_s0 + $0xa8] sm:$0xff] }
  0x11   :  { %v206_v32 = vld [vmem:[%s440_s0 + $0x18] sm:$0xff]  ;;  %203 = vst [vmem:[%s441_s1 + $0x68] sm:$0xff] %v202_v30  ;;  %205 = vst [vmem:[%s441_s1 + $0xf8] sm:$0xff] %v204_v31  ;;  %v210_v34 = vld [vmem:[%s440_s0 + $0x8] sm:$0xff] }
  0x12   :  { %207 = vst [vmem:[%s441_s1 + $0x78] sm:$0xff] %v206_v32  ;;  %v212_v35 = vld [vmem:[%s440_s0 + $0x98] sm:$0xff]  ;;  %209 = vst [vmem:[%s441_s1 + $0x108] sm:$0xff] %v208_v33 }
  0x13   :  { %211 = vst [vmem:[%s441_s1 + $0x88] sm:$0xff] %v210_v34  ;;  %213 = vst [vmem:[%s441_s1 + $0x118] sm:$0xff] %v212_v35 }

// kernel: fno_wor_forward.5
= control target key start
LH: loop header
LB: loop body
LE: loop exit
PB: predicated region body
PF: predicated region fallthrough
CT: control target
= control target key end

     0   :  { %s967_s15 = smov 0   ;;  %s969_s16 = smov 0   ;;  %s1217_s0 = inlined_call_operand.vmem [shape: f32[16,1024], index: 0, kind: input, shape index: {}]   ;;  %s1218_s1 = inlined_call_operand.vmem [shape: f32[16,16], index: 1, kind: input, shape index: {}]   ;;  %s1219_s2 = inlined_call_operand.vmem [shape: f32[16,1], index: 2, kind: input, shape index: {}]   ;;  %s1220_s3 = inlined_call_operand.vmem [shape: f32[16,1024], index: 3, kind: input, shape index: {}]   ;;  %s1221_s4 = inlined_call_operand.vmem [shape: f32[16,1024], index: 4, kind: output, shape index: {}]  }
   0x1   :  { %s971_s17 = smov 0  }
   0x2 LB: > { %s821_s18 = sadd.s32 4294967295, %s937_s17   ;;  %s984_s19 = sadd.s32 1, %s937_s17   ;;  %s937_s17 = sphi %s971_s17, %s1226_s17   ;;  %s933_s16 = sphi %s969_s16, %s1225_s16   ;;  %s929_s15 = sphi %s967_s15, %s1224_s15  }
   0x3   : > { %s18_s20 = ssub.s32 %s937_s17, %s984_s19  ;;  %s21_s21 = sadd.s32 1, %s933_s16 }
   0x4   : > { %p19_p0 = scmp.eq.s32.totalorder %s18_s20, 0  ;;  %p28_p1 = scmp.ne.s32.totalorder %s933_s16, %s929_s15 }
   0x5   : > { %p29_p2 = scmp.eq.s32.totalorder %s937_s17, 0  ;;  %p126_p3 = scmp.eq.s32.totalorder %s821_s18, 1 }
   0x6   : > { %s995_s22 = scalar_select %p19_p0, %s933_s16, %s21_s21  }
   0x7   : > { %p997_p4 = por %p29_p2, %p28_p1  ;;  %p1001_p5 = por %p126_p3, %p28_p1 }
   0x8   : > { %p824_p6 = scmp.ge.s32.totalorder %s937_s17, 2 }
   0xa   : > { %154 = sbr.rel (%p824_p6) target bundleno = 33 (0x21), region = 24 }
  0x11   : > { %157 = sbr.rel (!%p997_p4) target bundleno = 25 (0x19), region = 28  ;;  %s159_s25 = sand.u32 (%p997_p4), 1, %s933_s16  }
  0x12   : > { %s844_s26 = sshll.u32 (%p997_p4), %s937_s17, 5  ;;  %s825_s27 = sshll.u32 (%p997_p4), %s159_s25, 6 }
  0x13   : > { %s164_s30 = scalar_lea.vmem (%p997_p4), %s1217_s0, %s844_s26  ;;  %s161_s5 = scalar_lea.vmem (%p997_p4), [#allocation2], %s825_s27 }
  0x14   : > { %v177_v0 = vld [vmem:[%s164_s30] sm:$0xff] (%p997_p4)  ;;  %v179_v1 = vld [vmem:[%s164_s30 + $0x8] sm:$0xff] (%p997_p4)  ;;  %v181_v2 = vld [vmem:[%s164_s30 + $0x10] sm:$0xff] (%p997_p4) }
  0x15   : > { %178 = vst [vmem:[%s161_s5] sm:$0xff] (%p997_p4), %v177_v0  ;;  %180 = vst [vmem:[%s161_s5 + $0x8] sm:$0xff] (%p997_p4), %v179_v1  ;;  %v183_v3 = vld [vmem:[%s164_s30 + $0x18] sm:$0xff] (%p997_p4)  ;;  %v185_v4 = vld [vmem:[%s164_s30 + $0x40] sm:$0xff] (%p997_p4) }
  0x16   : > { %182 = vst [vmem:[%s161_s5 + $0x10] sm:$0xff] (%p997_p4), %v181_v2  ;;  %v187_v5 = vld [vmem:[%s164_s30 + $0x48] sm:$0xff] (%p997_p4)  ;;  %184 = vst [vmem:[%s161_s5 + $0x18] sm:$0xff] (%p997_p4), %v183_v3  ;;  %v189_v6 = vld [vmem:[%s164_s30 + $0x50] sm:$0xff] (%p997_p4) }
  0x17   : > { %186 = vst [vmem:[%s161_s5 + $0x20] sm:$0xff] (%p997_p4), %v185_v4  ;;  %188 = vst [vmem:[%s161_s5 + $0x28] sm:$0xff] (%p997_p4), %v187_v5  ;;  %v191_v7 = vld [vmem:[%s164_s30 + $0x58] sm:$0xff] (%p997_p4) }
  0x18   : > { %190 = vst [vmem:[%s161_s5 + $0x30] sm:$0xff] %v189_v6  ;;  %192 = vst [vmem:[%s161_s5 + $0x38] sm:$0xff] %v191_v7 }
  0x19 PF: > { %198 = sbr.rel (!%p997_p4) target bundleno = 33 (0x21), region = 51  ;;  %s200_s6 = sand.u32 (%p997_p4), 1, %s933_s16  }
  0x1a   : > { %s845_s7 = sshll.u32 (%p997_p4), %s937_s17, 5  ;;  %s828_s8 = sshll.u32 (%p997_p4), %s200_s6, 6 }
  0x1b   : > { %s205_s11 = scalar_lea.vmem (%p997_p4), %s1220_s3, %s845_s7  ;;  %s202_s12 = scalar_lea.vmem (%p997_p4), [#allocation3], %s828_s8 }
  0x1c   : > { %v218_v8 = vld [vmem:[%s205_s11] sm:$0xff] (%p997_p4)  ;;  %v220_v9 = vld [vmem:[%s205_s11 + $0x8] sm:$0xff] (%p997_p4)  ;;  %v222_v10 = vld [vmem:[%s205_s11 + $0x10] sm:$0xff] (%p997_p4) }
  0x1d   : > { %219 = vst [vmem:[%s202_s12] sm:$0xff] (%p997_p4), %v218_v8  ;;  %221 = vst [vmem:[%s202_s12 + $0x8] sm:$0xff] (%p997_p4), %v220_v9  ;;  %v224_v11 = vld [vmem:[%s205_s11 + $0x18] sm:$0xff] (%p997_p4)  ;;  %v226_v12 = vld [vmem:[%s205_s11 + $0x40] sm:$0xff] (%p997_p4) }
  0x1e   : > { %223 = vst [vmem:[%s202_s12 + $0x10] sm:$0xff] (%p997_p4), %v222_v10  ;;  %v228_v13 = vld [vmem:[%s205_s11 + $0x48] sm:$0xff] (%p997_p4)  ;;  %225 = vst [vmem:[%s202_s12 + $0x18] sm:$0xff] (%p997_p4), %v224_v11  ;;  %v230_v14 = vld [vmem:[%s205_s11 + $0x50] sm:$0xff] (%p997_p4) }
  0x1f   : > { %227 = vst [vmem:[%s202_s12 + $0x20] sm:$0xff] (%p997_p4), %v226_v12  ;;  %229 = vst [vmem:[%s202_s12 + $0x28] sm:$0xff] (%p997_p4), %v228_v13  ;;  %v232_v15 = vld [vmem:[%s205_s11 + $0x58] sm:$0xff] (%p997_p4) }
  0x20   : > { %231 = vst [vmem:[%s202_s12 + $0x30] sm:$0xff] %v230_v14  ;;  %233 = vst [vmem:[%s202_s12 + $0x38] sm:$0xff] %v232_v15 }
  0x21 PF: > { %p831_p7 = scmp.ge.s32.totalorder %s937_s17, 1  ;;  %p238_p8 = scmp.lt.s32.totalorder %s937_s17, 3 }
  0x23   : > { %p239_p9 = pnand %p831_p7, %p238_p8 }
  0x24   : > { %s245_s13 = sand.u32 (!%p239_p9), 1, %s929_s15   ;;  %v939_v16 = vmov (!%p239_p9), 0.0   ;;  %v293_v17 = vld [vmem:[%s1219_s2] sm:$0xff] (!%p239_p9)  ;;  %v940_v18 = vmov (!%p239_p9), 0   ;;  %v294_v30 = vld [vmem:[%s1219_s2 + $0x8] sm:$0xff] (!%p239_p9)  ;;  %vm305_vm0 = vcmask (!%p239_p9), 130048  }
  0x25   : > { %242 = sbr.rel (%p239_p9) target bundleno = 342 (0x156), region = 74  ;;  %s1023_s14 = sshll.u32 (!%p239_p9), %s245_s13, 6  ;;  %376 = vmatprep.mubr.f32.mxu0 (!%p239_p9), %v939_v16  ;;  %453 = vmatprep.mubr.f32.mxu1 (!%p239_p9), %v939_v16  ;;  %v283_v32 = vld [vmem:[%s1218_s1] sm:$0xff] (!%p239_p9)  ;;  %v284_v33 = vld [vmem:[%s1218_s1 + $0x8] sm:$0xff] (!%p239_p9) }
  0x26   : > { %882 = vset.pattern.permute.xlu0 (!%p239_p9), %v940_v18  ;;  %s247_s23 = scalar_lea.vmem (!%p239_p9), [#allocation2], %s1023_s14  ;;  %s1039_s30 = scalar_lea.vmem (!%p239_p9), [#allocation3], %s1023_s14 }
  0x27   : > { %v286_v19 = vld [vmem:[%s247_s23 + $0x8] sm:$0xff] (!%p239_p9)  ;;  %v288_v21 = vld [vmem:[%s247_s23 + $0x18] sm:$0xff] (!%p239_p9)  ;;  %297 = vperm.xlu0 (!%p239_p9), %882, %v293_v17   ;;  %v285_v24 = vld [vmem:[%s247_s23] sm:$0xff] (!%p239_p9)  ;;  %s1160_s5 = scalar_lea.vmem (!%p239_p9), [#allocation4], %s1023_s14 }
  0x28   : > { %v290_v20 = vld [vmem:[%s247_s23 + $0x28] sm:$0xff] (!%p239_p9)  ;;  %v292_v23 = vld [vmem:[%s247_s23 + $0x38] sm:$0xff] (!%p239_p9)  ;;  %v289_v25 = vld [vmem:[%s247_s23 + $0x20] sm:$0xff] (!%p239_p9) }
  0x29   : > { %v847_v22 = vpack.c.bf16 (!%p239_p9), %v290_v20, %v286_v19  ;;  %v851_v26 = vpack.c.bf16 (!%p239_p9), %v292_v23, %v288_v21  ;;  %v849_v27 = vpack.c.bf16 (!%p239_p9), %v289_v25, %v285_v24  ;;  %v287_v28 = vld [vmem:[%s247_s23 + $0x10] sm:$0xff] (!%p239_p9)  ;;  %v466_v36 = vld [vmem:[%s1039_s30] sm:$0xff] (!%p239_p9)  ;;  %v467_v41 = vld [vmem:[%s1039_s30 + $0x8] sm:$0xff] (!%p239_p9) }
  0x2a   : > { %v291_v29 = vld [vmem:[%s247_s23 + $0x30] sm:$0xff] (!%p239_p9)  ;;  %v469_v45 = vld [vmem:[%s1039_s30 + $0x18] sm:$0xff] (!%p239_p9)  ;;  %v470_v6 = vld [vmem:[%s1039_s30 + $0x20] sm:$0xff] (!%p239_p9) }
  0x2b   : > { %848 = vmatprep.subr.bf16.mxu0 (!%p239_p9), %v847_v22  ;;  %v853_v31 = vpack.c.bf16 (!%p239_p9), %v291_v29, %v287_v28  ;;  %852 = vmatprep.subr.bf16.mxu1 (!%p239_p9), %v851_v26  ;;  %v468_v39 = vld [vmem:[%s1039_s30 + $0x10] sm:$0xff] (!%p239_p9)  ;;  %v471_v12 = vld [vmem:[%s1039_s30 + $0x28] sm:$0xff] (!%p239_p9)  ;;  %v473_v24 = vld [vmem:[%s1039_s30 + $0x38] sm:$0xff] (!%p239_p9) }
  0x2c   : > { %850 = vmatpush1.bf16.msra.mxu0 %v849_v27  ;;  %302 = vperm.xlu0 %882, %v294_v30   ;;  %v472_v11 = vld [vmem:[%s1039_s30 + $0x30] sm:$0xff]  ;;  %s846_s6 = sshll.u32 (%p1001_p5), %s821_s18, 5 }
  0x2d   : > { %854 = vmatpush1.bf16.msra.mxu1 %v853_v31  ;;  %s715_s9 = scalar_lea.vmem (%p1001_p5), %s1221_s4, %s846_s6 }
  0x2f   : > { %835 = vmatmul.mubr.msk.f32.vlgmr.msra.gmra.mrb[0].mxu0 %vm305_vm0, %v283_v32 }
  0x30   : > { %837 = vmatmul.mubr.msk.f32.vlgmr.msra.gmra.mrb[0].mxu1 %vm305_vm0, %v283_v32  ;;  %382 = vmatprep.mubr.f32.mxu0 %v939_v16  ;;  %v941_v32 = vmov -1.0  }
  0x31   : > { %459 = vmatprep.mubr.f32.mxu1 %v939_v16 }
  0x33   : > { %836 = vmatmul.mubr.msk.f32.gmra.mrb[2].mxu0 %vm305_vm0, %v284_v33 }
  0x34   : > { %838 = vmatmul.mubr.msk.f32.gmra.mrb[2].mxu1 %vm305_vm0, %v284_v33 }
  0xa6   : > { %v298_v34 = vpop.permute.xlu0 %297 }
  0xab   : > { %v303_v63 = vpop.permute.xlu0 %302 }
 0x102   : > { %v378_v35 = vpop.f32.mrb[0].mxu0 }
 0x103   : > { %v379_v37 = vadd.f32 %v378_v35, %v298_v34  ;;  %v455_v38 = vpop.f32.mrb[0].mxu1  ;;  %v380_v40 = vpop.f32.mrb[1].mxu0 }
 0x104   : > { %v456_v42 = vadd.f32 %v455_v38, %v298_v34  ;;  %v381_v43 = vadd.f32 %v380_v40, %v298_v34  ;;  %v457_v44 = vpop.f32.mrb[1].mxu1 }
 0x105   : > { %v474_v46 = vadd.f32 %v466_v36, %v379_v37  ;;  %v458_v47 = vadd.f32 %v457_v44, %v298_v34 }
 0x106   : > { %v476_v48 = vadd.f32 %v468_v39, %v456_v42  ;;  %v475_v49 = vadd.f32 %v467_v41, %v381_v43  ;;  %v384_v50 = vpop.f32.mrb[2].mxu0 }
 0x107   : > { %v490_v51 = vmul.f32 0.70710677, %v474_v46  ;;  %v477_v52 = vadd.f32 %v469_v45, %v458_v47  ;;  %v461_v53 = vpop.f32.mrb[2].mxu1  ;;  %v386_v54 = vpop.f32.mrb[3].mxu0  ;;  %v385_v3 = vadd.f32 %v384_v50, %v303_v63  ;;  %v1056_v15 = vmul.f32 0.5, %v474_v46 }
 0x108   : > { %v492_v55 = vmul.f32 0.70710677, %v476_v48  ;;  %v1045_v56 = vmul.f32 0.70710677, %v475_v49  ;;  %v463_v60 = vpop.f32.mrb[3].mxu1  ;;  %v462_v13 = vadd.f32 %v461_v53, %v303_v63  ;;  %v387_v14 = vadd.f32 %v386_v54, %v303_v63 }
 0x109   : > { %v514_v57 = vand.u32 2147483647, %v490_v51  ;;  %v1047_v58 = vmul.f32 0.70710677, %v477_v52  ;;  %v1052_v10 = vadd.f32 %v470_v6, %v385_v3  ;;  %v464_v21 = vadd.f32 %v463_v60, %v303_v63 }
 0x10a   : > { %v516_v59 = vand.u32 2147483647, %v492_v55  ;;  %v515_v0 = vand.u32 2147483647, %v1045_v56  ;;  %v1061_v19 = vadd.f32 %v472_v11, %v462_v13  ;;  %v1063_v20 = vadd.f32 %v471_v12, %v387_v14 }
 0x10b   : > { %v522_v61 = vmul.f32 0.3275911, %v514_v57  ;;  %v517_v2 = vand.u32 2147483647, %v1047_v58  ;;  %v626_v16 = vsub.f32 0.0, %v514_v57  ;;  %vm498_vm1 = vcmp.ge.f32.partialorder %v490_v51, 0.0 }
 0x10c   : > { %v524_v62 = vmul.f32 0.3275911, %v516_v59  ;;  %v523_v5 = vmul.f32 0.3275911, %v515_v0  ;;  %v1059_v17 = vmul.f32 0.70710677, %v1052_v10  ;;  %v1083_v36 = vadd.f32 %v473_v24, %v464_v21 }
 0x10d   : > { %v530_v1 = vadd.f32 1.0, %v522_v61  ;;  %v525_v7 = vmul.f32 0.3275911, %v517_v2  ;;  %v628_v18 = vsub.f32 0.0, %v516_v59  ;;  %v627_v22 = vsub.f32 0.0, %v515_v0 }
 0x10e   : > { %v532_v4 = vadd.f32 1.0, %v524_v62  ;;  %v531_v8 = vadd.f32 1.0, %v523_v5  ;;  %v518_v23 = vand.u32 2147483647, %v1059_v17  ;;  %v1067_v25 = vmul.f32 0.5, %v476_v48 }
 0x10f   : > { %883 = vrcp.f32 %v530_v1  ;;  %v533_v9 = vadd.f32 1.0, %v525_v7  ;;  %v1069_v26 = vmul.f32 0.5, %v475_v49  ;;  %v1071_v27 = vmul.f32 0.5, %v477_v52 }
 0x110   : > { %885 = vrcp.f32 %v532_v4  ;;  %v1074_v28 = vmul.f32 0.70710677, %v1061_v19  ;;  %v634_v29 = vmul.f32 %v626_v16, %v514_v57  ;;  %vm500_vm2 = vcmp.ge.f32.partialorder %v492_v55, 0.0 }
 0x111   : > { %887 = vrcp.f32 %v531_v8  ;;  %v526_v30 = vmul.f32 0.3275911, %v518_v23  ;;  %v1077_v31 = vmul.f32 0.70710677, %v1063_v20  ;;  %v1080_v33 = vsel %vm498_vm1, 1.0, %v941_v32 }
 0x112   : > { %889 = vrcp.f32 %v533_v9  ;;  %v636_v34 = vmul.f32 %v628_v18, %v516_v59  ;;  %v520_v35 = vand.u32 2147483647, %v1074_v28  ;;  %vm499_vm3 = vcmp.ge.f32.partialorder %v1045_v56, 0.0 }
 0x113   : > { %v635_v38 = vmul.f32 %v627_v22, %v515_v0  ;;  %v629_v39 = vsub.f32 0.0, %v517_v2  ;;  %v534_v40 = vadd.f32 1.0, %v526_v30  ;;  %v1092_v43 = vsel %vm500_vm2, 1.0, %v941_v32 }
 0x114   : > { %v630_v44 = vsub.f32 0.0, %v518_v23  ;;  %v528_v45 = vmul.f32 0.3275911, %v520_v35  ;;  %v642_v46 = vmul.f32 1.442695, %v634_v29  ;;  %v1097_v51 = vsel %vm499_vm3, 1.0, %v941_v32 }
 0x115   : > { %891 = vrcp.f32 %v534_v40  ;;  %v519_v48 = vand.u32 2147483647, %v1077_v31  ;;  %v646_v50 = vmul.f32 1.442695, %v636_v34  ;;  %v644_v55 = vmul.f32 1.442695, %v635_v38 }
 0x116   : > { %v536_v52 = vadd.f32 1.0, %v528_v45  ;;  %v637_v56 = vmul.f32 %v629_v39, %v517_v2  ;;  %v638_v61 = vmul.f32 %v630_v44, %v518_v23  ;;  %v632_v0 = vsub.f32 0.0, %v520_v35 }
 0x117   : > { %v527_v57 = vmul.f32 0.3275911, %v519_v48  ;;  %v1107_v3 = vmul.f32 0.70710677, %v1083_v36  ;;  %vm501_vm4 = vcmp.ge.f32.partialorder %v1047_v58, 0.0  ;;  %v631_v29 = vsub.f32 0.0, %v519_v48 }
 0x118   : > { %893 = vrcp.f32 %v536_v52  ;;  %v648_v7 = vmul.f32 1.442695, %v637_v56  ;;  %v650_v13 = vmul.f32 1.442695, %v638_v61  ;;  %v640_v14 = vmul.f32 %v632_v0, %v520_v35 }
 0x119   : > { %v1085_v37 = vpop.eup %883  ;;  %v535_v1 = vadd.f32 1.0, %v527_v57  ;;  %895 = vpow2.f32 %v642_v46  ;;  %v1115_v16 = vand.u32 2147483647, %v1107_v3  ;;  %vm502_vm5 = vcmp.ge.f32.partialorder %v1059_v17, 0.0 }
 0x11a   : > { %v1088_v41 = vpop.eup %885  ;;  %v554_v42 = vmul.f32 1.0614054, %v1085_v37  ;;  %vm504_vm6 = vcmp.ge.f32.partialorder %v1074_v28, 0.0  ;;  %vm503_vm7 = vcmp.ge.f32.partialorder %v1077_v31, 0.0  ;;  %v487_v31 = vmul.f32 0.5, %v1063_v20 }
 0x11b   : > { %v556_v47 = vmul.f32 1.0614054, %v1088_v41  ;;  %v1099_v53 = vpop.eup %887  ;;  %897 = vrcp.f32 %v535_v1  ;;  %v529_v30 = vmul.f32 0.3275911, %v1115_v16  ;;  %v509_v1 = vsel %vm501_vm4, 1.0, %v941_v32 }
 0x11c   : > { %v562_v49 = vadd.f32 -1.4531521, %v554_v42  ;;  %v555_v60 = vmul.f32 1.0614054, %v1099_v53  ;;  %v1103_v62 = vpop.eup %889  ;;  %899 = vpow2.f32 %v646_v50  ;;  %v654_v42 = vmul.f32 1.442695, %v640_v14 }
 0x11d   : > { %v564_v54 = vadd.f32 -1.4531521, %v556_v47  ;;  %v557_v2 = vmul.f32 1.0614054, %v1103_v62  ;;  %901 = vpow2.f32 %v644_v55  ;;  %v537_v44 = vadd.f32 1.0, %v529_v30 }
 0x11e   : > { %v570_v59 = vmul.f32 %v1085_v37, %v562_v49  ;;  %v563_v5 = vadd.f32 -1.4531521, %v555_v60  ;;  %903 = vpow2.f32 %v648_v7  ;;  %v639_v55 = vmul.f32 %v631_v29, %v519_v48 }
 0x11f   : > { %v572_v63 = vmul.f32 %v1088_v41, %v564_v54  ;;  %v565_v11 = vadd.f32 -1.4531521, %v557_v2  ;;  %v1118_v23 = vpop.eup %891  ;;  %905 = vpow2.f32 %v650_v13  ;;  %v633_v29 = vsub.f32 0.0, %v1115_v16 }
 0x120   : > { %v578_v4 = vadd.f32 1.4214138, %v570_v59  ;;  %v571_v9 = vmul.f32 %v1099_v53, %v563_v5  ;;  %v558_v39 = vmul.f32 1.0614054, %v1118_v23  ;;  %907 = vrcp.f32 %v537_v44 }
 0x121   : > { %v580_v6 = vadd.f32 1.4214138, %v572_v63  ;;  %v573_v22 = vmul.f32 %v1103_v62, %v565_v11  ;;  %909 = vpow2.f32 %v654_v42  ;;  %v652_v11 = vmul.f32 1.442695, %v639_v55 }
 0x122   : > { %v586_v8 = vmul.f32 %v1085_v37, %v578_v4  ;;  %v579_v21 = vadd.f32 1.4214138, %v571_v9  ;;  %v1125_v45 = vpop.eup %893  ;;  %v566_v50 = vadd.f32 -1.4531521, %v558_v39  ;;  %vm505_vm8 = vcmp.ge.f32.partialorder %v1107_v3, 0.0 }
 0x123   : > { %v588_v12 = vmul.f32 %v1088_v41, %v580_v6  ;;  %v581_v35 = vadd.f32 1.4214138, %v573_v22  ;;  %v560_v54 = vmul.f32 1.0614054, %v1125_v45  ;;  %v896_v56 = vpop.eup %895  ;;  %911 = vpow2.f32 %v652_v11 }
 0x124   : > { %v594_v18 = vadd.f32 -0.28449672, %v586_v8  ;;  %v587_v38 = vmul.f32 %v1099_v53, %v579_v21  ;;  %v574_v61 = vmul.f32 %v1118_v23, %v566_v50 }
 0x125   : > { %v596_v24 = vadd.f32 -0.28449672, %v588_v12  ;;  %v589_v49 = vmul.f32 %v1103_v62, %v581_v35  ;;  %v1132_v63 = vpop.eup %897  ;;  %v568_v4 = vadd.f32 -1.4531521, %v560_v54  ;;  %v641_v54 = vmul.f32 %v633_v29, %v1115_v16 }
 0x126   : > { %v602_v34 = vmul.f32 %v1085_v37, %v594_v18  ;;  %v595_v47 = vadd.f32 -0.28449672, %v587_v38  ;;  %v900_v48 = vpop.eup %899  ;;  %v582_v6 = vadd.f32 1.4214138, %v574_v61  ;;  %v559_v9 = vmul.f32 1.0614054, %v1132_v63 }
 0x127   : > { %v604_v40 = vmul.f32 %v1088_v41, %v596_v24  ;;  %v597_v60 = vadd.f32 -0.28449672, %v589_v49  ;;  %v576_v8 = vmul.f32 %v1125_v45, %v568_v4  ;;  %v902_v12 = vpop.eup %901 }
 0x128   : > { %v610_v46 = vadd.f32 0.2548296, %v602_v34  ;;  %v603_v59 = vmul.f32 %v1099_v53, %v595_v47  ;;  %v590_v14 = vmul.f32 %v1118_v23, %v582_v6  ;;  %v904_v18 = vpop.eup %903  ;;  %v567_v24 = vadd.f32 -1.4531521, %v559_v9 }
 0x129   : > { %v612_v52 = vadd.f32 0.2548296, %v604_v40  ;;  %v584_v22 = vadd.f32 1.4214138, %v576_v8  ;;  %v906_v39 = vpop.eup %905 }
 0x12a   : > { %v618_v57 = vmul.f32 %v1085_v37, %v610_v46  ;;  %v611_v2 = vadd.f32 0.2548296, %v603_v59  ;;  %v605_v37 = vmul.f32 %v1103_v62, %v597_v60  ;;  %v598_v35 = vadd.f32 -0.28449672, %v590_v14  ;;  %v1150_v50 = vpop.eup %907 }
 0x12b   : > { %v620_v0 = vmul.f32 %v1088_v41, %v612_v52  ;;  %v575_v42 = vmul.f32 %v1132_v63, %v567_v24  ;;  %v910_v59 = vpop.eup %909  ;;  %v561_v4 = vmul.f32 1.0614054, %v1150_v50 }
 0x12c   : > { %v658_v5 = vmul.f32 %v896_v56, %v618_v57  ;;  %v619_v13 = vmul.f32 %v1099_v53, %v611_v2  ;;  %v613_v58 = vadd.f32 0.2548296, %v605_v37  ;;  %v592_v53 = vmul.f32 %v1125_v45, %v584_v22 }
 0x12d   : > { %v660_v7 = vmul.f32 %v900_v48, %v620_v0  ;;  %v606_v49 = vmul.f32 %v1118_v23, %v598_v35  ;;  %v512_v22 = vsel %vm504_vm6, 1.0, %v941_v32 }
 0x12e   : > { %v666_v41 = vsub.f32 1.0, %v658_v5  ;;  %v659_v34 = vmul.f32 %v902_v12, %v619_v13  ;;  %v621_v38 = vmul.f32 %v1103_v62, %v613_v58  ;;  %v600_v52 = vadd.f32 -0.28449672, %v592_v53  ;;  %v912_v12 = vpop.eup %911 }
 0x12f   : > { %v668_v21 = vsub.f32 1.0, %v660_v7  ;;  %v583_v62 = vadd.f32 1.4214138, %v575_v42  ;;  %v614_v57 = vadd.f32 0.2548296, %v606_v49 }
 0x130   : > { %v674_v30 = vmul.f32 %v666_v41, %v1080_v33  ;;  %v667_v46 = vsub.f32 1.0, %v659_v34  ;;  %v661_v47 = vmul.f32 %v904_v18, %v621_v38  ;;  %v608_v61 = vmul.f32 %v1125_v45, %v600_v52 }
 0x131   : > { %v676_v40 = vmul.f32 %v668_v21, %v1092_v43  ;;  %v591_v0 = vmul.f32 %v1132_v63, %v583_v62  ;;  %v569_v5 = vadd.f32 -1.4531521, %v561_v4  ;;  %v656_v7 = vmul.f32 1.442695, %v641_v54 }
 0x132   : > { %v682_v44 = vadd.f32 1.0, %v674_v30  ;;  %v675_v55 = vmul.f32 %v667_v46, %v1097_v51  ;;  %v669_v56 = vsub.f32 1.0, %v661_v47  ;;  %v622_v51 = vmul.f32 %v1118_v23, %v614_v57 }
 0x133   : > { %v684_v33 = vadd.f32 1.0, %v676_v40  ;;  %v599_v48 = vadd.f32 -0.28449672, %v591_v0  ;;  %v510_v23 = vsel %vm502_vm5, 1.0, %v941_v32  ;;  %913 = vpow2.f32 %v656_v7 }
 0x134   : > { %v690_v43 = vmul.f32 %v682_v44, %v1056_v15  ;;  %v683_v15 = vadd.f32 1.0, %v675_v55  ;;  %v677_v16 = vmul.f32 %v669_v56, %v509_v1  ;;  %v662_v6 = vmul.f32 %v906_v39, %v622_v51 }
 0x135   : > { %v692_v60 = vmul.f32 %v684_v33, %v1067_v25  ;;  %v616_v25 = vadd.f32 0.2548296, %v608_v61  ;;  %v607_v9 = vmul.f32 %v1132_v63, %v599_v48  ;;  %v577_v1 = vmul.f32 %v1150_v50, %v569_v5 }
 0x136   : > { %698 = vst [vmem:[%s1160_s5] sm:$0xff] %v690_v43  ;;  %v691_v2 = vmul.f32 %v683_v15, %v1069_v26  ;;  %v685_v37 = vadd.f32 1.0, %v677_v16  ;;  %v670_v11 = vsub.f32 1.0, %v662_v6  ;;  %v488_v34 = vmul.f32 0.5, %v1061_v19 }
 0x137   : > { %700 = vst [vmem:[%s1160_s5 + $0x10] sm:$0xff] %v692_v60  ;;  %v624_v8 = vmul.f32 %v1125_v45, %v616_v25  ;;  %v615_v41 = vadd.f32 0.2548296, %v607_v9  ;;  %v585_v13 = vadd.f32 1.4214138, %v577_v1  ;;  %v513_v33 = vsel %vm505_vm8, 1.0, %v941_v32 }
 0x138   : > { %699 = vst [vmem:[%s1160_s5 + $0x8] sm:$0xff] %v691_v2  ;;  %v693_v17 = vmul.f32 %v685_v37, %v1071_v27  ;;  %v678_v58 = vmul.f32 %v670_v11, %v510_v23  ;;  %v486_v27 = vmul.f32 0.5, %v1052_v10  ;;  %v511_v10 = vsel %vm503_vm7, 1.0, %v941_v32 }
 0x139   : > { %v664_v26 = vmul.f32 %v910_v59, %v624_v8  ;;  %v623_v14 = vmul.f32 %v1132_v63, %v615_v41  ;;  %v593_v18 = vmul.f32 %v1150_v50, %v585_v13  ;;  %v489_v62 = vmul.f32 0.5, %v1083_v36 }
 0x13a   : > { %701 = vst [vmem:[%s1160_s5 + $0x18] sm:$0xff] %v693_v17  ;;  %v686_v21 = vadd.f32 1.0, %v678_v58 }
 0x13b   : > { %v672_v45 = vsub.f32 1.0, %v664_v26  ;;  %v663_v28 = vmul.f32 %v912_v12, %v623_v14  ;;  %v601_v29 = vadd.f32 -0.28449672, %v593_v18 }
 0x13c   : > { %v694_v30 = vmul.f32 %v686_v21, %v486_v27 }
 0x13d   : > { %v680_v24 = vmul.f32 %v672_v45, %v512_v22  ;;  %v671_v35 = vsub.f32 1.0, %v663_v28  ;;  %v609_v63 = vmul.f32 %v1150_v50, %v601_v29  ;;  %v914_v46 = vpop.eup %913  ;;  %v728_v20 = vld [vmem:[%s1160_s5] sm:$0xff] (%p1001_p5) }
 0x13e   : > { %702 = vst [vmem:[%s1160_s5 + $0x20] sm:$0xff] %v694_v30  ;;  %v732_v36 = vld [vmem:[%s1160_s5 + $0x10] sm:$0xff] (%p1001_p5)  ;;  %729 = vst [vmem:[%s715_s9] sm:$0xff] (%p1001_p5), %v728_v20 }
 0x13f   : > { %v688_v38 = vadd.f32 1.0, %v680_v24  ;;  %v679_v40 = vmul.f32 %v671_v35, %v511_v10  ;;  %v617_v53 = vadd.f32 0.2548296, %v609_v63  ;;  %v730_v32 = vld [vmem:[%s1160_s5 + $0x8] sm:$0xff] (%p1001_p5)  ;;  %733 = vst [vmem:[%s715_s9 + $0x10] sm:$0xff] (%p1001_p5), %v732_v36 }
 0x140   : > { %731 = vst [vmem:[%s715_s9 + $0x8] sm:$0xff] (%p1001_p5), %v730_v32 }
 0x141   : > { %v696_v39 = vmul.f32 %v688_v38, %v488_v34  ;;  %v687_v42 = vadd.f32 1.0, %v679_v40  ;;  %v625_v44 = vmul.f32 %v1150_v50, %v617_v53  ;;  %v734_v3 = vld [vmem:[%s1160_s5 + $0x18] sm:$0xff] (%p1001_p5) }
 0x142   : > { %735 = vst [vmem:[%s715_s9 + $0x18] sm:$0xff] (%p1001_p5), %v734_v3 }
 0x143   : > { %704 = vst [vmem:[%s1160_s5 + $0x30] sm:$0xff] %v696_v39  ;;  %v695_v19 = vmul.f32 %v687_v42, %v487_v31  ;;  %v665_v47 = vmul.f32 %v914_v46, %v625_v44 }
 0x145   : > { %703 = vst [vmem:[%s1160_s5 + $0x28] sm:$0xff] %v695_v19  ;;  %v673_v49 = vsub.f32 1.0, %v665_v47  ;;  %v736_v50 = vld [vmem:[%s1160_s5 + $0x20] sm:$0xff] (%p1001_p5) }
 0x146   : > { %737 = vst [vmem:[%s715_s9 + $0x40] sm:$0xff] (%p1001_p5), %v736_v50 }
 0x147   : > { %v681_v52 = vmul.f32 %v673_v49, %v513_v33  ;;  %712 = sbr.rel (!%p1001_p5) target bundleno = 342 (0x156), region = 86 }
 0x149   : > { %v689_v54 = vadd.f32 1.0, %v681_v52 }
 0x14a   : > { %v740_v56 = vld [vmem:[%s1160_s5 + $0x30] sm:$0xff] (%p1001_p5) }
 0x14b   : > { %v697_v43 = vmul.f32 %v689_v54, %v489_v62  ;;  %741 = vst [vmem:[%s715_s9 + $0x50] sm:$0xff] (%p1001_p5), %v740_v56 }
 0x14c   : > { %v738_v55 = vld [vmem:[%s1160_s5 + $0x28] sm:$0xff] (%p1001_p5) }
 0x14d   : > { %705 = vst [vmem:[%s1160_s5 + $0x38] sm:$0xff] %v697_v43  ;;  %739 = vst [vmem:[%s715_s9 + $0x48] sm:$0xff] (%p1001_p5), %v738_v55 }
 0x154   : > { %v742_v57 = vld [vmem:[%s1160_s5 + $0x38] sm:$0xff] }
 0x155   : > { %743 = vst [vmem:[%s715_s9 + $0x58] sm:$0xff] %v742_v57 }
 0x156 PF: > { %p11_p10 = scmp.ge.s32.totalorder %s984_s19, 4   ;;  %s1224_s15 = smov %s933_s16 }
 0x157   : > { %s1225_s16 = smov %s995_s22  ;;  %s1226_s17 = smov %s984_s19 }
 0x158   :  { %13 = sbr.rel (!%p11_p10) target bundleno = 2 (0x2), region = 148 }

// kernel: fno_wor_forward.7
= control target key start
LH: loop header
LB: loop body
LE: loop exit
PB: predicated region body
PF: predicated region fallthrough
CT: control target
= control target key end

     0   :  { %s5987_s0 = inlined_call_operand.vmem [shape: f32[16,1024], index: 0, kind: input, shape index: {}]   ;;  %s5988_s1 = inlined_call_operand.vmem [shape: f32[16,1024], index: 1, kind: input, shape index: {}]   ;;  %s5989_s2 = inlined_call_operand.vmem [shape: f32[16,16], index: 2, kind: input, shape index: {}]   ;;  %s5990_s3 = inlined_call_operand.vmem [shape: f32[16,1], index: 3, kind: input, shape index: {}]   ;;  %s5991_s4 = inlined_call_operand.vmem [shape: f32[128,16], index: 4, kind: input, shape index: {}]   ;;  %s5992_s5 = inlined_call_operand.vmem [shape: f32[128,1], index: 5, kind: input, shape index: {}]   ;;  %s5993_s6 = inlined_call_operand.vmem [shape: f32[1,128], index: 6, kind: input, shape index: {}]   ;;  %s5994_s7 = inlined_call_operand.<no memory space> [shape: f32[1,1], index: 7, kind: input, shape index: {}]   ;;  %s5995_s8 = inlined_call_operand.vmem [shape: f32[1,1024], index: 8, kind: output, shape index: {}]  }
   0x1   :  { %v13_v0 = vstv %s5994_s7 }
   0x2   :  { %14 = vst [vmem:[#allocation2] sm:$0x1] %v13_v0 }
   0x3   :  { %s3563_s29 = smov 0   ;;  %s3565_s30 = smov 0  }
   0x4   :  { %s3567_s9 = smov 0  }
   0x5 LB: > { %s3067_s7 = sadd.s32 4294967295, %s3509_s9   ;;  %s3580_s10 = sadd.s32 1, %s3509_s9   ;;  %s3509_s9 = sphi %s3567_s9, %s6208_s9   ;;  %s3505_s30 = sphi %s3565_s30, %s6207_s30   ;;  %s3501_s29 = sphi %s3563_s29, %s6206_s29  }
   0x6   : > { %s24_s11 = ssub.s32 %s3509_s9, %s3580_s10  ;;  %s27_s12 = sadd.s32 1, %s3505_s30 }
   0x7   : > { %p25_p0 = scmp.eq.s32.totalorder %s24_s11, 0  ;;  %p34_p1 = scmp.ne.s32.totalorder %s3505_s30, %s3501_s29 }
   0x8   : > { %p35_p2 = scmp.eq.s32.totalorder %s3509_s9, 0  ;;  %p3070_p4 = scmp.ge.s32.totalorder %s3509_s9, 2 }
   0x9   : > { %s3589_s13 = scalar_select %p25_p0, %s3505_s30, %s27_s12  }
   0xa   : > { %p3591_p3 = por %p35_p2, %p34_p1  ;;  %256 = sbr.rel (%p3070_p4) target bundleno = 33 (0x21), region = 40 }
  0x11   : > { %259 = sbr.rel (!%p3591_p3) target bundleno = 25 (0x19), region = 44  ;;  %s261_s15 = sand.u32 (%p3591_p3), 1, %s3505_s30  }
  0x12   : > { %s3119_s16 = sshll.u32 (%p3591_p3), %s3509_s9, 5  ;;  %s3071_s17 = sshll.u32 (%p3591_p3), %s261_s15, 6 }
  0x13   : > { %s266_s20 = scalar_lea.vmem (%p3591_p3), %s5987_s0, %s3119_s16  ;;  %s263_s21 = scalar_lea.vmem (%p3591_p3), [#allocation3], %s3071_s17 }
  0x14   : > { %v279_v1 = vld [vmem:[%s266_s20] sm:$0xff] (%p3591_p3)  ;;  %v281_v2 = vld [vmem:[%s266_s20 + $0x8] sm:$0xff] (%p3591_p3)  ;;  %v283_v3 = vld [vmem:[%s266_s20 + $0x10] sm:$0xff] (%p3591_p3) }
  0x15   : > { %280 = vst [vmem:[%s263_s21] sm:$0xff] (%p3591_p3), %v279_v1  ;;  %282 = vst [vmem:[%s263_s21 + $0x8] sm:$0xff] (%p3591_p3), %v281_v2  ;;  %v285_v4 = vld [vmem:[%s266_s20 + $0x18] sm:$0xff] (%p3591_p3)  ;;  %v287_v5 = vld [vmem:[%s266_s20 + $0x40] sm:$0xff] (%p3591_p3) }
  0x16   : > { %284 = vst [vmem:[%s263_s21 + $0x10] sm:$0xff] (%p3591_p3), %v283_v3  ;;  %v289_v6 = vld [vmem:[%s266_s20 + $0x48] sm:$0xff] (%p3591_p3)  ;;  %286 = vst [vmem:[%s263_s21 + $0x18] sm:$0xff] (%p3591_p3), %v285_v4  ;;  %v291_v7 = vld [vmem:[%s266_s20 + $0x50] sm:$0xff] (%p3591_p3) }
  0x17   : > { %288 = vst [vmem:[%s263_s21 + $0x20] sm:$0xff] (%p3591_p3), %v287_v5  ;;  %290 = vst [vmem:[%s263_s21 + $0x28] sm:$0xff] (%p3591_p3), %v289_v6  ;;  %v293_v8 = vld [vmem:[%s266_s20 + $0x58] sm:$0xff] (%p3591_p3) }
  0x18   : > { %292 = vst [vmem:[%s263_s21 + $0x30] sm:$0xff] %v291_v7  ;;  %294 = vst [vmem:[%s263_s21 + $0x38] sm:$0xff] %v293_v8 }
  0x19 PF: > { %300 = sbr.rel (!%p3591_p3) target bundleno = 33 (0x21), region = 67  ;;  %s302_s22 = sand.u32 (%p3591_p3), 1, %s3505_s30  }
  0x1a   : > { %s3120_s23 = sshll.u32 (%p3591_p3), %s3509_s9, 5  ;;  %s3074_s24 = sshll.u32 (%p3591_p3), %s302_s22, 6 }
  0x1b   : > { %s307_s27 = scalar_lea.vmem (%p3591_p3), %s5988_s1, %s3120_s23  ;;  %s304_s28 = scalar_lea.vmem (%p3591_p3), [#allocation4], %s3074_s24 }
  0x1c   : > { %v320_v9 = vld [vmem:[%s307_s27] sm:$0xff] (%p3591_p3)  ;;  %v322_v10 = vld [vmem:[%s307_s27 + $0x8] sm:$0xff] (%p3591_p3)  ;;  %v324_v11 = vld [vmem:[%s307_s27 + $0x10] sm:$0xff] (%p3591_p3) }
  0x1d   : > { %321 = vst [vmem:[%s304_s28] sm:$0xff] (%p3591_p3), %v320_v9  ;;  %323 = vst [vmem:[%s304_s28 + $0x8] sm:$0xff] (%p3591_p3), %v322_v10  ;;  %v326_v12 = vld [vmem:[%s307_s27 + $0x18] sm:$0xff] (%p3591_p3)  ;;  %v328_v13 = vld [vmem:[%s307_s27 + $0x40] sm:$0xff] (%p3591_p3) }
  0x1e   : > { %325 = vst [vmem:[%s304_s28 + $0x10] sm:$0xff] (%p3591_p3), %v324_v11  ;;  %v330_v14 = vld [vmem:[%s307_s27 + $0x48] sm:$0xff] (%p3591_p3)  ;;  %327 = vst [vmem:[%s304_s28 + $0x18] sm:$0xff] (%p3591_p3), %v326_v12  ;;  %v332_v15 = vld [vmem:[%s307_s27 + $0x50] sm:$0xff] (%p3591_p3) }
  0x1f   : > { %329 = vst [vmem:[%s304_s28 + $0x20] sm:$0xff] (%p3591_p3), %v328_v13  ;;  %331 = vst [vmem:[%s304_s28 + $0x28] sm:$0xff] (%p3591_p3), %v330_v14  ;;  %v334_v16 = vld [vmem:[%s307_s27 + $0x58] sm:$0xff] (%p3591_p3) }
  0x20   : > { %333 = vst [vmem:[%s304_s28 + $0x30] sm:$0xff] %v332_v15  ;;  %335 = vst [vmem:[%s304_s28 + $0x38] sm:$0xff] %v334_v16 }
  0x21 PF: > { %p3077_p5 = scmp.ge.s32.totalorder %s3509_s9, 1  ;;  %p340_p6 = scmp.lt.s32.totalorder %s3509_s9, 3 }
  0x23   : > { %p341_p7 = pnand %p3077_p5, %p340_p6 }
  0x25   : > { %344 = sbr.rel (%p341_p7) target bundleno = 1181 (0x49d), region = 90 }
  0x2c   : > { %s347_s11 = sand.u32 1, %s3501_s29   ;;  %v3511_v17 = vmov 0.0   ;;  %v407_v18 = vld [vmem:[%s5990_s3] sm:$0xff]  ;;  %v3512_v19 = vmov 0   ;;  %v408_v31 = vld [vmem:[%s5990_s3 + $0x8] sm:$0xff]  ;;  %vm419_vm0 = vcmask 130048  }
  0x2d   : > { %s3613_s12 = sshll.u32 %s347_s11, 6  ;;  %490 = vmatprep.mubr.f32.mxu0 %v3511_v17  ;;  %567 = vmatprep.mubr.f32.mxu1 %v3511_v17  ;;  %v397_v33 = vld [vmem:[%s5989_s2] sm:$0xff]  ;;  %v614_v34 = vld [vmem:[%s5992_s5 + $0x10] sm:$0xff]  ;;  %v398_v35 = vld [vmem:[%s5989_s2 + $0x8] sm:$0xff]  ;;  %s3080_s19 = sshll.u32 %s3067_s7, 2 }
  0x2e   : > { %3229 = vset.pattern.permute.xlu0 %v3512_v19  ;;  %3230 = vset.pattern.permute.xlu1 %v3512_v19  ;;  %s349_s16 = scalar_lea.vmem [#allocation3], %s3613_s12  ;;  %v616_v36 = vld [vmem:[%s5992_s5 + $0x20] sm:$0xff]  ;;  %v618_v37 = vld [vmem:[%s5992_s5 + $0x30] sm:$0xff]  ;;  %v613_v44 = vld [vmem:[%s5992_s5 + $0x8] sm:$0xff]  ;;  %s356_s20 = scalar_lea.vmem [#allocation4], %s3613_s12 }
  0x2f   : > { %v400_v20 = vld [vmem:[%s349_s16 + $0x8] sm:$0xff]  ;;  %v402_v22 = vld [vmem:[%s349_s16 + $0x18] sm:$0xff]  ;;  %411 = vperm.xlu0 %3229, %v407_v18   ;;  %v399_v25 = vld [vmem:[%s349_s16] sm:$0xff]  ;;  %p393_p8 = scmp.lt.s32.totalorder %s3080_s19, 7 }
  0x30   : > { %v404_v21 = vld [vmem:[%s349_s16 + $0x28] sm:$0xff]  ;;  %v406_v24 = vld [vmem:[%s349_s16 + $0x38] sm:$0xff]  ;;  %v403_v26 = vld [vmem:[%s349_s16 + $0x20] sm:$0xff] }
  0x31   : > { %v3121_v23 = vpack.c.bf16 %v404_v21, %v400_v20  ;;  %v3125_v27 = vpack.c.bf16 %v406_v24, %v402_v22  ;;  %v3123_v28 = vpack.c.bf16 %v403_v26, %v399_v25  ;;  %v401_v29 = vld [vmem:[%s349_s16 + $0x10] sm:$0xff]  ;;  %v620_v38 = vld [vmem:[%s5992_s5 + $0x40] sm:$0xff]  ;;  %v617_v46 = vld [vmem:[%s5992_s5 + $0x28] sm:$0xff]  ;;  %s6210_s19 = smov (!%p393_p8, %s3080_s19), 7 }
  0x32   : > { %v405_v30 = vld [vmem:[%s349_s16 + $0x30] sm:$0xff]  ;;  %v624_v40 = vld [vmem:[%s5992_s5 + $0x60] sm:$0xff]  ;;  %v621_v48 = vld [vmem:[%s5992_s5 + $0x48] sm:$0xff]  ;;  %s395_s21 = scalar_lea.vmem %s5995_s8, %s6210_s19 }
  0x33   : > { %3122 = vmatprep.subr.bf16.mxu0 %v3121_v23  ;;  %v3127_v32 = vpack.c.bf16 %v405_v30, %v401_v29  ;;  %3126 = vmatprep.subr.bf16.mxu1 %v3125_v27  ;;  %v622_v39 = vld [vmem:[%s5992_s5 + $0x50] sm:$0xff]  ;;  %v2807_v42 = vld [vmem:[#allocation2] sm:$0x1]  ;;  %v615_v45 = vld [vmem:[%s5992_s5 + $0x18] sm:$0xff] }
  0x34   : > { %3124 = vmatpush1.bf16.msra.mxu0 %v3123_v28  ;;  %416 = vperm.xlu0 %3229, %v408_v31   ;;  %v626_v41 = vld [vmem:[%s5992_s5 + $0x70] sm:$0xff]  ;;  %v612_v43 = vld [vmem:[%s5992_s5] sm:$0xff]  ;;  %v619_v47 = vld [vmem:[%s5992_s5 + $0x38] sm:$0xff] }
  0x35   : > { %3128 = vmatpush1.bf16.msra.mxu1 %v3127_v32  ;;  %630 = vperm.xlu1 %3230, %v612_v43   ;;  %v623_v49 = vld [vmem:[%s5992_s5 + $0x58] sm:$0xff]  ;;  %v625_v50 = vld [vmem:[%s5992_s5 + $0x68] sm:$0xff]  ;;  %v596_v27 = vld [vmem:[%s5991_s4] sm:$0xff] }
  0x36   : > { %v627_v51 = vld [vmem:[%s5992_s5 + $0x78] sm:$0xff]  ;;  %v580_v54 = vld [vmem:[%s356_s20] sm:$0xff]  ;;  %v581_v59 = vld [vmem:[%s356_s20 + $0x8] sm:$0xff] }
  0x37   : > { %3081 = vmatmul.mubr.msk.f32.vlgmr.msra.gmra.mrb[0].mxu0 %vm419_vm0, %v397_v33  ;;  %v582_v57 = vld [vmem:[%s356_s20 + $0x10] sm:$0xff]  ;;  %v583_v63 = vld [vmem:[%s356_s20 + $0x18] sm:$0xff]  ;;  %v584_v6 = vld [vmem:[%s356_s20 + $0x20] sm:$0xff] }
  0x38   : > { %3083 = vmatmul.mubr.msk.f32.vlgmr.msra.gmra.mrb[0].mxu1 %vm419_vm0, %v397_v33  ;;  %496 = vmatprep.mubr.f32.mxu0 %v3511_v17  ;;  %v586_v10 = vld [vmem:[%s356_s20 + $0x30] sm:$0xff]  ;;  %v585_v12 = vld [vmem:[%s356_s20 + $0x28] sm:$0xff]  ;;  %v587_v16 = vld [vmem:[%s356_s20 + $0x38] sm:$0xff] }
  0x39   : > { %573 = vmatprep.mubr.f32.mxu1 %v3511_v17  ;;  %640 = vperm.xlu0 %3229, %v614_v34   ;;  %v597_v28 = vld [vmem:[%s5991_s4 + $0x8] sm:$0xff]  ;;  %v598_v29 = vld [vmem:[%s5991_s4 + $0x10] sm:$0xff]  ;;  %v599_v30 = vld [vmem:[%s5991_s4 + $0x18] sm:$0xff] }
  0x3a   : > { %635 = vperm.xlu1 %3230, %v613_v44   ;;  %v600_v31 = vld [vmem:[%s5991_s4 + $0x20] sm:$0xff]  ;;  %v601_v32 = vld [vmem:[%s5991_s4 + $0x28] sm:$0xff]  ;;  %v602_v33 = vld [vmem:[%s5991_s4 + $0x30] sm:$0xff] }
  0x3b   : > { %3082 = vmatmul.mubr.msk.f32.gmra.mrb[2].mxu0 %vm419_vm0, %v398_v35  ;;  %v603_v34 = vld [vmem:[%s5991_s4 + $0x38] sm:$0xff] }
  0x3c   : > { %3084 = vmatmul.mubr.msk.f32.gmra.mrb[2].mxu1 %vm419_vm0, %v398_v35  ;;  %820 = vmatprep.mubr.f32.mxu0 %v3511_v17  ;;  %v604_v35 = vld [vmem:[%s5991_s4 + $0x40] sm:$0xff] }
  0x3d   : > { %650 = vperm.xlu0 %3229, %v616_v36   ;;  %981 = vmatprep.mubr.f32.mxu1 %v3511_v17  ;;  %v605_v36 = vld [vmem:[%s5991_s4 + $0x48] sm:$0xff] }
  0x3e   : > { %645 = vperm.xlu1 %3230, %v615_v45  }
  0x41   : > { %660 = vperm.xlu0 %3229, %v618_v37   ;;  %v606_v37 = vld [vmem:[%s5991_s4 + $0x50] sm:$0xff] }
  0x42   : > { %655 = vperm.xlu1 %3230, %v617_v46  }
  0x45   : > { %670 = vperm.xlu0 %3229, %v620_v38   ;;  %v607_v38 = vld [vmem:[%s5991_s4 + $0x58] sm:$0xff] }
  0x46   : > { %665 = vperm.xlu1 %3230, %v619_v47  }
  0x49   : > { %680 = vperm.xlu0 %3229, %v622_v39   ;;  %v608_v39 = vld [vmem:[%s5991_s4 + $0x60] sm:$0xff] }
  0x4a   : > { %675 = vperm.xlu1 %3230, %v621_v48  }
  0x4d   : > { %690 = vperm.xlu0 %3229, %v624_v40   ;;  %v609_v40 = vld [vmem:[%s5991_s4 + $0x68] sm:$0xff] }
  0x4e   : > { %685 = vperm.xlu1 %3230, %v623_v49  }
  0x51   : > { %700 = vperm.xlu0 %3229, %v626_v41   ;;  %v610_v41 = vld [vmem:[%s5991_s4 + $0x70] sm:$0xff] }
  0x52   : > { %695 = vperm.xlu1 %3230, %v625_v50  }
  0x55   : > { %2810 = vperm.xlu0 %3229, %v2807_v42   ;;  %v611_v42 = vld [vmem:[%s5991_s4 + $0x78] sm:$0xff] }
  0x56   : > { %705 = vperm.xlu1 %3230, %v627_v51  }
  0xae   : > { %v412_v52 = vpop.permute.xlu0 %411 }
  0xb3   : > { %v417_v2 = vpop.permute.xlu0 %416 }
  0xb4   : > { %v631_v43 = vpop.permute.xlu1 %630 }
 0x10a   : > { %v492_v53 = vpop.f32.mrb[0].mxu0 }
 0x10b   : > { %v493_v55 = vadd.f32 %v492_v53, %v412_v52  ;;  %v569_v56 = vpop.f32.mrb[0].mxu1  ;;  %v494_v58 = vpop.f32.mrb[1].mxu0 }
 0x10c   : > { %v570_v60 = vadd.f32 %v569_v56, %v412_v52  ;;  %v495_v61 = vadd.f32 %v494_v58, %v412_v52  ;;  %v571_v62 = vpop.f32.mrb[1].mxu1 }
 0x10d   : > { %v588_v0 = vadd.f32 %v580_v54, %v493_v55  ;;  %v572_v1 = vadd.f32 %v571_v62, %v412_v52 }
 0x10e   : > { %v590_v3 = vadd.f32 %v582_v57, %v570_v60  ;;  %v589_v4 = vadd.f32 %v581_v59, %v495_v61  ;;  %v498_v5 = vpop.f32.mrb[2].mxu0 }
 0x10f   : > { %v591_v7 = vadd.f32 %v583_v63, %v572_v1  ;;  %v499_v8 = vadd.f32 %v498_v5, %v417_v2  ;;  %v575_v9 = vpop.f32.mrb[2].mxu1  ;;  %v500_v11 = vpop.f32.mrb[3].mxu0 }
 0x110   : > { %v576_v13 = vadd.f32 %v575_v9, %v417_v2  ;;  %v501_v14 = vadd.f32 %v500_v11, %v417_v2  ;;  %v577_v15 = vpop.f32.mrb[3].mxu1 }
 0x111   : > { %v592_v18 = vadd.f32 %v584_v6, %v499_v8  ;;  %v578_v19 = vadd.f32 %v577_v15, %v417_v2  ;;  %v636_v6 = vpop.permute.xlu1 %635 }
 0x112   : > { %v594_v20 = vadd.f32 %v586_v10, %v576_v13  ;;  %v593_v21 = vadd.f32 %v585_v12, %v501_v14 }
 0x113   : > { %v3131_v22 = vpack.c.bf16 %v592_v18, %v588_v0  ;;  %v595_v23 = vadd.f32 %v587_v16, %v578_v19 }
 0x114   : > { %v3135_v24 = vpack.c.bf16 %v594_v20, %v590_v3  ;;  %v3129_v25 = vpack.c.bf16 %v593_v21, %v589_v4 }
 0x115   : > { %v3133_v26 = vpack.c.bf16 %v595_v23, %v591_v7 }
 0x116   : > { %3130 = vmatprep.subr.bf16.mxu0 %v3129_v25 }
 0x117   : > { %3134 = vmatprep.subr.bf16.mxu1 %v3133_v26  ;;  %3132 = vmatpush1.bf16.msra.mxu0 %v3131_v22 }
 0x118   : > { %3136 = vmatpush1.bf16.msra.mxu1 %v3135_v24 }
 0x11a   : > { %3085 = vmatmul.mubr.msk.f32.vlgmr.msra.gmra.mrb[4].mxu0 %vm419_vm0, %v596_v27 }
 0x11b   : > { %3101 = vmatmul.mubr.msk.f32.vlgmr.msra.gmra.mrb[4].mxu1 %vm419_vm0, %v596_v27  ;;  %826 = vmatprep.mubr.f32.mxu0 %v3511_v17 }
 0x11c   : > { %987 = vmatprep.mubr.f32.mxu1 %v3511_v17 }
 0x11e   : > { %3086 = vmatmul.mubr.msk.f32.gmra.mrb[6].mxu0 %vm419_vm0, %v597_v28 }
 0x11f   : > { %3102 = vmatmul.mubr.msk.f32.gmra.mrb[6].mxu1 %vm419_vm0, %v597_v28  ;;  %832 = vmatprep.mubr.f32.mxu0 %v3511_v17 }
 0x120   : > { %993 = vmatprep.mubr.f32.mxu1 %v3511_v17 }
 0x122   : > { %3087 = vmatmul.mubr.msk.f32.gmra.mrb[8].mxu0 %vm419_vm0, %v598_v29 }
 0x123   : > { %3103 = vmatmul.mubr.msk.f32.gmra.mrb[8].mxu1 %vm419_vm0, %v598_v29  ;;  %838 = vmatprep.mubr.f32.mxu0 %v3511_v17 }
 0x124   : > { %999 = vmatprep.mubr.f32.mxu1 %v3511_v17 }
 0x126   : > { %3088 = vmatmul.mubr.msk.f32.gmra.mrb[10].mxu0 %vm419_vm0, %v599_v30 }
 0x127   : > { %3104 = vmatmul.mubr.msk.f32.gmra.mrb[10].mxu1 %vm419_vm0, %v599_v30  ;;  %844 = vmatprep.mubr.f32.mxu0 %v3511_v17 }
 0x128   : > { %1005 = vmatprep.mubr.f32.mxu1 %v3511_v17 }
 0x12a   : > { %3089 = vmatmul.mubr.msk.f32.gmra.mrb[12].mxu0 %vm419_vm0, %v600_v31 }
 0x12b   : > { %3105 = vmatmul.mubr.msk.f32.gmra.mrb[12].mxu1 %vm419_vm0, %v600_v31  ;;  %850 = vmatprep.mubr.f32.mxu0 %v3511_v17 }
 0x12c   : > { %1011 = vmatprep.mubr.f32.mxu1 %v3511_v17 }
 0x12e   : > { %3090 = vmatmul.mubr.msk.f32.gmra.mrb[14].mxu0 %vm419_vm0, %v601_v32 }
 0x12f   : > { %3106 = vmatmul.mubr.msk.f32.gmra.mrb[14].mxu1 %vm419_vm0, %v601_v32  ;;  %856 = vmatprep.mubr.f32.mxu0 %v3511_v17 }
 0x130   : > { %1017 = vmatprep.mubr.f32.mxu1 %v3511_v17 }
 0x132   : > { %3091 = vmatmul.mubr.msk.f32.gmra.mrb[16].mxu0 %vm419_vm0, %v602_v33 }
 0x133   : > { %3107 = vmatmul.mubr.msk.f32.gmra.mrb[16].mxu1 %vm419_vm0, %v602_v33  ;;  %862 = vmatprep.mubr.f32.mxu0 %v3511_v17 }
 0x134   : > { %1023 = vmatprep.mubr.f32.mxu1 %v3511_v17 }
 0x136   : > { %3092 = vmatmul.mubr.msk.f32.gmra.mrb[18].mxu0 %vm419_vm0, %v603_v34 }
 0x137   : > { %3108 = vmatmul.mubr.msk.f32.gmra.mrb[18].mxu1 %vm419_vm0, %v603_v34  ;;  %868 = vmatprep.mubr.f32.mxu0 %v3511_v17 }
 0x138   : > { %1029 = vmatprep.mubr.f32.mxu1 %v3511_v17 }
 0x13a   : > { %3093 = vmatmul.mubr.msk.f32.gmra.mrb[20].mxu0 %vm419_vm0, %v604_v35 }
 0x13b   : > { %3109 = vmatmul.mubr.msk.f32.gmra.mrb[20].mxu1 %vm419_vm0, %v604_v35  ;;  %874 = vmatprep.mubr.f32.mxu0 %v3511_v17 }
 0x13c   : > { %1035 = vmatprep.mubr.f32.mxu1 %v3511_v17 }
 0x13e   : > { %3094 = vmatmul.mubr.msk.f32.gmra.mrb[22].mxu0 %vm419_vm0, %v605_v36 }
 0x13f   : > { %3110 = vmatmul.mubr.msk.f32.gmra.mrb[22].mxu1 %vm419_vm0, %v605_v36  ;;  %880 = vmatprep.mubr.f32.mxu0 %v3511_v17 }
 0x140   : > { %1041 = vmatprep.mubr.f32.mxu1 %v3511_v17 }
 0x142   : > { %3095 = vmatmul.mubr.msk.f32.gmra.mrb[24].mxu0 %vm419_vm0, %v606_v37 }
 0x143   : > { %3111 = vmatmul.mubr.msk.f32.gmra.mrb[24].mxu1 %vm419_vm0, %v606_v37  ;;  %886 = vmatprep.mubr.f32.mxu0 %v3511_v17 }
 0x144   : > { %1047 = vmatprep.mubr.f32.mxu1 %v3511_v17 }
 0x146   : > { %3096 = vmatmul.mubr.msk.f32.gmra.mrb[26].mxu0 %vm419_vm0, %v607_v38 }
 0x147   : > { %3112 = vmatmul.mubr.msk.f32.gmra.mrb[26].mxu1 %vm419_vm0, %v607_v38  ;;  %892 = vmatprep.mubr.f32.mxu0 %v3511_v17 }
 0x148   : > { %1053 = vmatprep.mubr.f32.mxu1 %v3511_v17 }
 0x14a   : > { %3097 = vmatmul.mubr.msk.f32.gmra.mrb[28].mxu0 %vm419_vm0, %v608_v39 }
 0x14b   : > { %3113 = vmatmul.mubr.msk.f32.gmra.mrb[28].mxu1 %vm419_vm0, %v608_v39  ;;  %898 = vmatprep.mubr.f32.mxu0 %v3511_v17 }
 0x14c   : > { %1059 = vmatprep.mubr.f32.mxu1 %v3511_v17 }
 0x14e   : > { %3098 = vmatmul.mubr.msk.f32.gmra.mrb[30].mxu0 %vm419_vm0, %v609_v40 }
 0x14f   : > { %3114 = vmatmul.mubr.msk.f32.gmra.mrb[30].mxu1 %vm419_vm0, %v609_v40  ;;  %904 = vmatprep.mubr.f32.mxu0 %v3511_v17 }
 0x150   : > { %1065 = vmatprep.mubr.f32.mxu1 %v3511_v17 }
 0x152   : > { %3099 = vmatmul.mubr.msk.f32.gmra.mrb[32].mxu0 %vm419_vm0, %v610_v41 }
 0x153   : > { %3115 = vmatmul.mubr.msk.f32.gmra.mrb[32].mxu1 %vm419_vm0, %v610_v41  ;;  %910 = vmatprep.mubr.f32.mxu0 %v3511_v17 }
 0x154   : > { %1071 = vmatprep.mubr.f32.mxu1 %v3511_v17 }
 0x156   : > { %3100 = vmatmul.mubr.msk.f32.gmra.mrb[34].mxu0 %vm419_vm0, %v611_v42 }
 0x157   : > { %3116 = vmatmul.mubr.msk.f32.gmra.mrb[34].mxu1 %vm419_vm0, %v611_v42  ;;  %2881 = vmatprep.mubr.f32.mxu0 %v3511_v17 }
 0x158   : > { %2952 = vmatprep.mubr.f32.mxu1 %v3511_v17 }
 0x1ed   : > { %v822_v44 = vpop.f32.mrb[4].mxu0 }
 0x1ee   : > { %v3799_v45 = vadd.f32 %v822_v44, %v631_v43  ;;  %v983_v46 = vpop.f32.mrb[4].mxu1  ;;  %v824_v47 = vpop.f32.mrb[5].mxu0 }
 0x1ef   : > { %v3801_v48 = vadd.f32 %v983_v46, %v631_v43  ;;  %v3803_v49 = vadd.f32 %v824_v47, %v631_v43  ;;  %v985_v50 = vpop.f32.mrb[5].mxu1 }
 0x1f0   : > { %v3806_v51 = vmul.f32 0.70710677, %v3799_v45  ;;  %v3808_v52 = vadd.f32 %v985_v50, %v631_v43 }
 0x1f1   : > { %v3811_v53 = vmul.f32 0.70710677, %v3801_v48  ;;  %v3814_v17 = vmul.f32 0.70710677, %v3803_v49  ;;  %v828_v57 = vpop.f32.mrb[6].mxu0 }
 0x1f2   : > { %v3817_v54 = vand.u32 2147483647, %v3806_v51  ;;  %v3820_v55 = vmul.f32 0.70710677, %v3808_v52  ;;  %v989_v59 = vpop.f32.mrb[6].mxu1  ;;  %v830_v0 = vpop.f32.mrb[7].mxu0  ;;  %v3844_v11 = vadd.f32 %v828_v57, %v636_v6 }
 0x1f3   : > { %v3823_v56 = vand.u32 2147483647, %v3811_v53  ;;  %v3828_v61 = vand.u32 2147483647, %v3814_v17  ;;  %v991_v1 = vpop.f32.mrb[7].mxu1  ;;  %v3851_v15 = vadd.f32 %v989_v59, %v636_v6  ;;  %v3853_v16 = vadd.f32 %v830_v0, %v636_v6 }
 0x1f4   : > { %v1398_v58 = vmul.f32 0.3275911, %v3817_v54  ;;  %v3831_v63 = vand.u32 2147483647, %v3820_v55  ;;  %v3858_v19 = vmul.f32 0.70710677, %v3844_v11 }
 0x1f5   : > { %v1400_v60 = vmul.f32 0.3275911, %v3823_v56  ;;  %v1399_v3 = vmul.f32 0.3275911, %v3828_v61  ;;  %v3834_v4 = vpop.f32.mrb[8].mxu0  ;;  %v2230_v33 = vsub.f32 0.0, %v3817_v54 }
 0x1f6   : > { %v1462_v62 = vadd.f32 1.0, %v1398_v58  ;;  %v3836_v5 = vpop.f32.mrb[8].mxu1  ;;  %v3838_v7 = vpop.f32.mrb[9].mxu0  ;;  %v1401_v14 = vmul.f32 0.3275911, %v3831_v63  ;;  %v2232_v34 = vsub.f32 0.0, %v3823_v56 }
 0x1f7   : > { %v1464_v2 = vadd.f32 1.0, %v1400_v60  ;;  %v1463_v8 = vadd.f32 1.0, %v1399_v3  ;;  %v3840_v9 = vpop.f32.mrb[9].mxu1  ;;  %v3861_v20 = vmul.f32 0.70710677, %v3851_v15  ;;  %v2294_v57 = vmul.f32 %v2230_v33, %v3817_v54 }
 0x1f8   : > { %3231 = vrcp.f32 %v1462_v62  ;;  %v1338_v22 = vand.u32 2147483647, %v3858_v19  ;;  %v3867_v23 = vmul.f32 0.70710677, %v3853_v16  ;;  %v1465_v25 = vadd.f32 1.0, %v1401_v14 }
 0x1f9   : > { %3233 = vrcp.f32 %v1464_v2  ;;  %v3842_v10 = vpop.f32.mrb[10].mxu0  ;;  %v1340_v26 = vand.u32 2147483647, %v3861_v20  ;;  %v3901_v60 = vadd.f32 %v991_v1, %v636_v6  ;;  %v2296_v2 = vmul.f32 %v2232_v34, %v3823_v56  ;;  %v3914_v6 = vpop.permute.xlu0 %640 }
 0x1fa   : > { %v3846_v12 = vpop.f32.mrb[10].mxu1  ;;  %v3848_v13 = vpop.f32.mrb[11].mxu0  ;;  %3235 = vrcp.f32 %v1463_v8  ;;  %v1402_v29 = vmul.f32 0.3275911, %v1338_v22  ;;  %v3877_v31 = vand.u32 2147483647, %v3867_v23 }
 0x1fb   : > { %v3855_v18 = vpop.f32.mrb[11].mxu1  ;;  %v1404_v30 = vmul.f32 0.3275911, %v1340_v26  ;;  %3237 = vrcp.f32 %v1465_v25  ;;  %v3912_v1 = vmul.f32 0.70710677, %v3901_v60  ;;  %v2236_v56 = vsub.f32 0.0, %v1340_v26 }
 0x1fc   : > { %v1466_v35 = vadd.f32 1.0, %v1402_v29  ;;  %v1403_v41 = vmul.f32 0.3275911, %v3877_v31  ;;  %v2234_v29 = vsub.f32 0.0, %v1338_v22  ;;  %vm1206_vm1 = vcmp.ge.f32.partialorder %v3806_v51, 0.0 }
 0x1fd   : > { %v3863_v21 = vpop.f32.mrb[12].mxu0  ;;  %v1468_v40 = vadd.f32 1.0, %v1404_v30  ;;  %v2358_v30 = vmul.f32 1.442695, %v2294_v57  ;;  %vm1208_vm2 = vcmp.ge.f32.partialorder %v3811_v53, 0.0  ;;  %vm1210_vm3 = vcmp.ge.f32.partialorder %v3858_v19, 0.0 }
 0x1fe   : > { %v3869_v24 = vpop.f32.mrb[12].mxu1  ;;  %v3872_v27 = vpop.f32.mrb[13].mxu0  ;;  %3239 = vrcp.f32 %v1466_v35  ;;  %v1467_v59 = vadd.f32 1.0, %v1403_v41  ;;  %v2362_v35 = vmul.f32 1.442695, %v2296_v2  ;;  %v1082_v53 = vmul.f32 0.5, %v3844_v11 }
 0x1ff   : > { %v3874_v28 = vpop.f32.mrb[13].mxu1  ;;  %3241 = vrcp.f32 %v1468_v40  ;;  %vm1212_vm4 = vcmp.ge.f32.partialorder %v3861_v20, 0.0  ;;  %vm1207_vm5 = vcmp.ge.f32.partialorder %v3814_v17, 0.0  ;;  %v2235_v11 = vsub.f32 0.0, %v3877_v31 }
 0x200   : > { %3243 = vrcp.f32 %v1467_v59  ;;  %v3927_v59 = vand.u32 2147483647, %v3912_v1  ;;  %vm1209_vm6 = vcmp.ge.f32.partialorder %v3820_v55, 0.0  ;;  %vm1211_vm7 = vcmp.ge.f32.partialorder %v3867_v23, 0.0 }
 0x201   : > { %v3883_v36 = vpop.f32.mrb[14].mxu0  ;;  %3245 = vpow2.f32 %v2358_v30  ;;  %vm1213_vm8 = vcmp.ge.f32.partialorder %v3912_v1, 0.0 }
 0x202   : > { %v3879_v32 = vpop.eup %3231  ;;  %6029 = vst [vmem:[#allocation5_spill] sm:$0xff] %v3883_v36  ;;  %v3885_v37 = vpop.f32.mrb[14].mxu1  ;;  %3247 = vpow2.f32 %v2362_v35  ;;  %v3961_v36 = vmul.f32 0.5, %v3801_v48  ;;  %v2237_v17 = vsub.f32 0.0, %v3927_v59 }
 0x203   : > { %6030 = vst [vmem:[#allocation6_spill] sm:$0xff] %v3885_v37  ;;  %v3887_v38 = vpop.eup %3233  ;;  %v1654_v39 = vmul.f32 1.0614054, %v3879_v32  ;;  %v3891_v42 = vpop.f32.mrb[15].mxu0 }
 0x204   : > { %6031 = vst [vmem:[#allocation7_spill] sm:$0xff] %v3891_v42  ;;  %v1656_v43 = vmul.f32 1.0614054, %v3887_v38  ;;  %v3894_v44 = vpop.f32.mrb[15].mxu1  ;;  %v3898_v50 = vpop.eup %3235  ;;  %v2233_v42 = vsub.f32 0.0, %v3831_v63 }
 0x205   : > { %6032 = vst [vmem:[#allocation8_spill] sm:$0xff] %v3894_v44  ;;  %v1718_v46 = vadd.f32 -1.4531521, %v1654_v39  ;;  %v3896_v47 = vpop.f32.mrb[16].mxu0  ;;  %v1655_v25 = vmul.f32 1.0614054, %v3898_v50  ;;  %v3920_v39 = vadd.f32 %v3834_v4, %v3914_v6  ;;  %v3922_v40 = vpop.eup %3237 }
 0x206   : > { %6033 = vst [vmem:[#allocation9_spill] sm:$0xff] %v3896_v47  ;;  %v1720_v58 = vadd.f32 -1.4531521, %v1656_v43  ;;  %v3903_v62 = vpop.f32.mrb[16].mxu1  ;;  %v3907_v3 = vpop.f32.mrb[17].mxu0  ;;  %v2231_v47 = vsub.f32 0.0, %v3828_v61  ;;  %v2297_v48 = vmul.f32 %v2233_v42, %v3831_v63 }
 0x207   : > { %6034 = vst [vmem:[#allocation10_spill] sm:$0xff] %v3903_v62  ;;  %v1782_v0 = vmul.f32 %v3879_v32, %v1718_v46  ;;  %6035 = vst [vmem:[#allocation11_spill] sm:$0xff] %v3907_v3  ;;  %v1719_v43 = vadd.f32 -1.4531521, %v1655_v25  ;;  %v2298_v46 = vmul.f32 %v2234_v29, %v1338_v22  ;;  %v1657_v22 = vmul.f32 1.0614054, %v3922_v40 }
 0x208   : > { %v1784_v8 = vmul.f32 %v3887_v38, %v1720_v58  ;;  %v3924_v57 = vpop.eup %3239  ;;  %v3939_v30 = vmul.f32 0.70710677, %v3920_v39 }
 0x209   : > { %v1846_v14 = vadd.f32 1.4214138, %v1782_v0  ;;  %v3929_v0 = vpop.eup %3241  ;;  %v1658_v4 = vmul.f32 1.0614054, %v3924_v57  ;;  %v1721_v44 = vadd.f32 -1.4531521, %v1657_v22 }
 0x20a   : > { %v1848_v54 = vadd.f32 1.4214138, %v1784_v8  ;;  %v2300_v8 = vmul.f32 %v2236_v56, %v1340_v26  ;;  %v1660_v29 = vmul.f32 1.0614054, %v3929_v0  ;;  %v1405_v26 = vmul.f32 0.3275911, %v3927_v59  ;;  %v3947_v62 = vpop.eup %3243 }
 0x20b   : > { %v1910_v33 = vmul.f32 %v3879_v32, %v1846_v14  ;;  %v3933_v14 = vpop.f32.mrb[17].mxu1  ;;  %v3944_v56 = vmul.f32 0.5, %v3799_v45  ;;  %v3246_v37 = vpop.eup %3245  ;;  %vm1214_vm9 = vcmp.ge.f32.partialorder %v3939_v30, 0.0 }
 0x20c   : > { %v1912_v34 = vmul.f32 %v3887_v38, %v1848_v54  ;;  %6036 = vst [vmem:[#allocation12_spill] sm:$0xff] %v3933_v14  ;;  %v1724_v3 = vadd.f32 -1.4531521, %v1660_v29  ;;  %v2370_v14 = vmul.f32 1.442695, %v2300_v8 }
 0x20d   : > { %v1974_v41 = vadd.f32 -0.28449672, %v1910_v33  ;;  %v1783_v33 = vmul.f32 %v3898_v50, %v1719_v43  ;;  %v3952_v43 = vand.u32 2147483647, %v3939_v30 }
 0x20e   : > { %v1976_v58 = vadd.f32 -0.28449672, %v1912_v34  ;;  %v1722_v34 = vadd.f32 -1.4531521, %v1658_v4 }
 0x20f   : > { %v2038_v2 = vmul.f32 %v3879_v32, %v1974_v41  ;;  %v2366_v41 = vmul.f32 1.442695, %v2298_v46  ;;  %v1847_v4 = vadd.f32 1.4214138, %v1783_v33  ;;  %v1406_v8 = vmul.f32 0.3275911, %v3952_v43  ;;  %v3248_v33 = vpop.eup %3247 }
 0x210   : > { %v2040_v25 = vmul.f32 %v3887_v38, %v1976_v58  ;;  %v1786_v58 = vmul.f32 %v3924_v57, %v1722_v34  ;;  %v1469_v34 = vadd.f32 1.0, %v1405_v26 }
 0x211   : > { %v2102_v54 = vadd.f32 0.2548296, %v2038_v2  ;;  %v1788_v2 = vmul.f32 %v3929_v0, %v1724_v3  ;;  %3249 = vpow2.f32 %v2366_v41  ;;  %v1659_v3 = vmul.f32 1.0614054, %v3947_v62 }
 0x212   : > { %v2104_v35 = vadd.f32 0.2548296, %v2040_v25  ;;  %v1850_v25 = vadd.f32 1.4214138, %v1786_v58  ;;  %3251 = vpow2.f32 %v2370_v14  ;;  %v1911_v14 = vmul.f32 %v3898_v50, %v1847_v4 }
 0x213   : > { %v2166_v46 = vmul.f32 %v3879_v32, %v2102_v54  ;;  %v1852_v29 = vadd.f32 1.4214138, %v1788_v2  ;;  %v1785_v32 = vmul.f32 %v3922_v40, %v1721_v44  ;;  %3253 = vrcp.f32 %v1469_v34 }
 0x214   : > { %v2168_v45 = vmul.f32 %v3887_v38, %v2104_v35  ;;  %v1914_v22 = vmul.f32 %v3924_v57, %v1850_v25  ;;  %v1470_v38 = vadd.f32 1.0, %v1406_v8  ;;  %v2295_v35 = vmul.f32 %v2231_v47, %v3828_v61 }
 0x215   : > { %v1916_v54 = vmul.f32 %v3929_v0, %v1852_v29  ;;  %v2486_v41 = vmul.f32 %v3246_v37, %v2166_v46  ;;  %v1723_v25 = vadd.f32 -1.4531521, %v1659_v3  ;;  %v1849_v29 = vadd.f32 1.4214138, %v1785_v32  ;;  %v3976_v37 = vpop.f32.mrb[18].mxu0 }
 0x216   : > { %v1978_v26 = vadd.f32 -0.28449672, %v1914_v22  ;;  %v2488_v58 = vmul.f32 %v3248_v33, %v2168_v45  ;;  %3255 = vrcp.f32 %v1470_v38  ;;  %v3974_v61 = vadd.f32 %v3836_v5, %v3914_v6  ;;  %v3978_v45 = vpop.f32.mrb[18].mxu1 }
 0x217   : > { %v1980_v2 = vadd.f32 -0.28449672, %v1916_v54  ;;  %v2550_v47 = vsub.f32 1.0, %v2486_v41  ;;  %v2360_v46 = vmul.f32 1.442695, %v2295_v35  ;;  %v5997_v34 = vmov -1.0  }
 0x218   : > { %v2042_v44 = vmul.f32 %v3924_v57, %v1978_v26  ;;  %v1270_v63 = vsel %vm1206_vm1, 1.0, %v5997_v34  ;;  %v2552_v42 = vsub.f32 1.0, %v2488_v58  ;;  %v1975_v22 = vadd.f32 -0.28449672, %v1911_v14 }
 0x219   : > { %v2044_v8 = vmul.f32 %v3929_v0, %v1980_v2  ;;  %v1272_v5 = vsel %vm1208_vm2, 1.0, %v5997_v34  ;;  %v2364_v54 = vmul.f32 1.442695, %v2297_v48  ;;  %v1787_v33 = vmul.f32 %v3947_v62, %v1723_v25 }
 0x21a   : > { %v2106_v4 = vadd.f32 0.2548296, %v2042_v44  ;;  %v1913_v41 = vmul.f32 %v3922_v40, %v1849_v29  ;;  %v3992_v35 = vmul.f32 0.70710677, %v3974_v61  ;;  %v2614_v58 = vmul.f32 %v2550_v47, %v1270_v63 }
 0x21b   : > { %v2108_v3 = vadd.f32 0.2548296, %v2044_v8  ;;  %v3250_v32 = vpop.eup %3249  ;;  %3257 = vpow2.f32 %v2360_v46  ;;  %v2616_v2 = vmul.f32 %v2552_v42, %v1272_v5  ;;  %v1274_v19 = vsel %vm1210_vm3, 1.0, %v5997_v34 }
 0x21c   : > { %v2170_v38 = vmul.f32 %v3924_v57, %v2106_v4  ;;  %v3252_v26 = vpop.eup %3251  ;;  %v2039_v57 = vmul.f32 %v3898_v50, %v1975_v22  ;;  %v1084_v44 = vmul.f32 0.5, %v3851_v15  ;;  %v1851_v25 = vadd.f32 1.4214138, %v1787_v33 }
 0x21d   : > { %v2172_v51 = vmul.f32 %v3929_v0, %v2108_v3  ;;  %v4000_v29 = vpop.eup %3253  ;;  %v1977_v8 = vadd.f32 -0.28449672, %v1913_v41  ;;  %v4004_v46 = vand.u32 2147483647, %v3992_v35  ;;  %v2678_v4 = vadd.f32 1.0, %v2614_v58 }
 0x21e   : > { %v2490_v14 = vmul.f32 %v3250_v32, %v2170_v38  ;;  %v1276_v63 = vsel %vm1212_vm4, 1.0, %v5997_v34  ;;  %v4009_v42 = vadd.f32 %v3838_v7, %v3914_v6  ;;  %v2680_v15 = vadd.f32 1.0, %v2616_v2  ;;  %v4014_v38 = vpop.f32.mrb[19].mxu0 }
 0x21f   : > { %v2492_v48 = vmul.f32 %v3252_v26, %v2172_v51  ;;  %v2103_v3 = vadd.f32 0.2548296, %v2039_v57  ;;  %v1408_v5 = vmul.f32 0.3275911, %v4004_v46  ;;  %3259 = vpow2.f32 %v2364_v54 }
 0x220   : > { %v2554_v0 = vsub.f32 1.0, %v2490_v14  ;;  %v4011_v22 = vpop.eup %3255  ;;  %v1915_v41 = vmul.f32 %v3947_v62, %v1851_v25  ;;  %v1661_v51 = vmul.f32 1.0614054, %v4000_v29  ;;  %v2041_v26 = vmul.f32 %v3922_v40, %v1977_v8 }
 0x221   : > { %v2556_v47 = vsub.f32 1.0, %v2492_v48  ;;  %v2299_v7 = vmul.f32 %v2235_v11, %v3877_v31  ;;  %v1472_v14 = vadd.f32 1.0, %v1408_v5  ;;  %v4020_v48 = vpop.f32.mrb[19].mxu1  ;;  %v4023_v2 = vmul.f32 %v2678_v4, %v3944_v56 }
 0x222   : > { %v2618_v20 = vmul.f32 %v2554_v0, %v1274_v19  ;;  %v1662_v54 = vmul.f32 1.0614054, %v4011_v22  ;;  %v4029_v19 = vmul.f32 0.70710677, %v4009_v42  ;;  %v4032_v0 = vmul.f32 %v2680_v15, %v3961_v36  ;;  %v4111_v56 = vpop.f32.mrb[20].mxu1 }
 0x223   : > { %v2620_v32 = vmul.f32 %v2556_v47, %v1276_v63  ;;  %6037 = vst [vmem:[#allocation13_spill] sm:$0xff] %v4023_v2  ;;  %v2167_v25 = vmul.f32 %v3898_v50, %v2103_v3  ;;  %3261 = vrcp.f32 %v1472_v14  ;;  %v1725_v47 = vadd.f32 -1.4531521, %v1661_v51  ;;  %6042 = vst [vmem:[#allocation18_spill] sm:$0xff] %v4111_v56 }
 0x224   : > { %v2682_v33 = vadd.f32 1.0, %v2618_v20  ;;  %6039 = vst [vmem:[#allocation15_spill] sm:$0xff] %v4032_v0  ;;  %v4041_v11 = vmul.f32 0.5, %v3803_v49  ;;  %v4044_v4 = vmul.f32 0.5, %v3808_v52  ;;  %v2368_v50 = vmul.f32 1.442695, %v2299_v7 }
 0x225   : > { %v2684_v58 = vadd.f32 1.0, %v2620_v32  ;;  %v3258_v31 = vpop.eup %3257  ;;  %v2105_v20 = vadd.f32 0.2548296, %v2041_v26  ;;  %v1726_v63 = vadd.f32 -1.4531521, %v1662_v54  ;;  %v4055_v15 = vadd.f32 %v3840_v9, %v3914_v6 }
 0x226   : > { %v4025_v57 = vmul.f32 %v2682_v33, %v1082_v53  ;;  %v1979_v53 = vadd.f32 -0.28449672, %v1915_v41  ;;  %v4051_v55 = vand.u32 2147483647, %v4029_v19  ;;  %v1271_v49 = vsel %vm1207_vm5, 1.0, %v5997_v34 }
 0x227   : > { %v4035_v8 = vmul.f32 %v2684_v58, %v1084_v44  ;;  %v4048_v44 = vpop.permute.xlu1 %645  ;;  %v2487_v52 = vmul.f32 %v3258_v31, %v2167_v25  ;;  %v4061_v3 = vsel %vm1209_vm6, 1.0, %v5997_v34  ;;  %v1789_v33 = vmul.f32 %v4000_v29, %v1725_v47 }
 0x228   : > { %6038 = vst [vmem:[#allocation14_spill] sm:$0xff] %v4025_v57  ;;  %v4065_v32 = vadd.f32 %v3842_v10, %v4048_v44  ;;  %v2043_v5 = vmul.f32 %v3947_v62, %v1979_v53  ;;  %v1407_v9 = vmul.f32 0.3275911, %v4051_v55  ;;  %v4072_v6 = vmul.f32 0.5, %v3853_v16  ;;  %v4096_v53 = vpop.f32.mrb[20].mxu0 }
 0x229   : > { %6040 = vst [vmem:[#allocation16_spill] sm:$0xff] %v4035_v8  ;;  %3263 = vpow2.f32 %v2368_v50  ;;  %v4076_v41 = vmul.f32 0.70710677, %v4055_v15  ;;  %v3260_v51 = vpop.eup %3259  ;;  %v2169_v10 = vmul.f32 %v3922_v40, %v2105_v20  ;;  %v1790_v23 = vmul.f32 %v4011_v22, %v1726_v63  ;;  %6041 = vst [vmem:[#allocation17_spill] sm:$0xff] %v4096_v53 }
 0x22a   : > { %v1471_v26 = vadd.f32 1.0, %v1407_v9  ;;  %v4081_v58 = vmul.f32 0.70710677, %v4065_v32  ;;  %v2551_v7 = vsub.f32 1.0, %v2487_v52  ;;  %v4084_v14 = vsel %vm1211_vm7, 1.0, %v5997_v34 }
 0x22b   : > { %v4087_v16 = vand.u32 2147483647, %v4076_v41  ;;  %v4091_v54 = vadd.f32 %v3846_v12, %v4048_v44  ;;  %v2107_v25 = vadd.f32 0.2548296, %v2043_v5  ;;  %v4094_v40 = vmul.f32 0.5, %v3901_v60 }
 0x22c   : > { %v1853_v31 = vadd.f32 1.4214138, %v1789_v33  ;;  %v2301_v50 = vmul.f32 %v2237_v17, %v3927_v59  ;;  %3265 = vrcp.f32 %v1471_v26  ;;  %v2489_v63 = vmul.f32 %v3260_v51, %v2169_v10 }
 0x22d   : > { %v4098_v47 = vpop.eup %3261  ;;  %v1409_v20 = vmul.f32 0.3275911, %v4087_v16  ;;  %v1854_v52 = vadd.f32 1.4214138, %v1790_v23  ;;  %v4105_v5 = vand.u32 2147483647, %v4081_v58  ;;  %v2615_v60 = vmul.f32 %v2551_v7, %v1271_v49 }
 0x22e   : > { %v1664_v12 = vmul.f32 1.0614054, %v4098_v47  ;;  %v2238_v33 = vsub.f32 0.0, %v3952_v43  ;;  %v4109_v36 = vmul.f32 0.70710677, %v4091_v54  ;;  %v2171_v59 = vmul.f32 %v3947_v62, %v2107_v25 }
 0x22f   : > { %v1473_v9 = vadd.f32 1.0, %v1409_v20  ;;  %v1917_v17 = vmul.f32 %v4000_v29, %v1853_v31  ;;  %v1410_v10 = vmul.f32 0.3275911, %v4105_v5  ;;  %v4119_v23 = vsel %vm1213_vm8, 1.0, %v5997_v34 }
 0x230   : > { %v1728_v51 = vadd.f32 -1.4531521, %v1664_v12  ;;  %v2372_v49 = vmul.f32 1.442695, %v2301_v50  ;;  %v4122_v26 = vmul.f32 0.5, %v3920_v39  ;;  %v1918_v20 = vmul.f32 %v4011_v22, %v1854_v52 }
 0x231   : > { %v4125_v7 = vand.u32 2147483647, %v4109_v36  ;;  %3267 = vrcp.f32 %v1473_v9  ;;  %v1474_v25 = vadd.f32 1.0, %v1410_v10  ;;  %v2679_v12 = vadd.f32 1.0, %v2615_v60 }
 0x232   : > { %v1792_v62 = vmul.f32 %v4098_v47, %v1728_v51  ;;  %v2553_v0 = vsub.f32 1.0, %v2489_v63  ;;  %v2302_v1 = vmul.f32 %v2238_v33, %v3952_v43  ;;  %v1981_v8 = vadd.f32 -0.28449672, %v1917_v17 }
 0x233   : > { %v3264_v31 = vpop.eup %3263  ;;  %v1412_v34 = vmul.f32 0.3275911, %v4125_v7  ;;  %3269 = vrcp.f32 %v1474_v25  ;;  %v2240_v2 = vsub.f32 0.0, %v4004_v46  ;;  %v4134_v52 = vadd.f32 %v3848_v13, %v4048_v44  ;;  %v4148_v13 = vpop.f32.mrb[21].mxu0 }
 0x234   : > { %v2491_v50 = vmul.f32 %v3264_v31, %v2171_v59  ;;  %v1856_v39 = vadd.f32 1.4214138, %v1792_v62  ;;  %v4138_v9 = vadd.f32 %v3855_v18, %v4048_v44  ;;  %3271 = vpow2.f32 %v2372_v49  ;;  %6043 = vst [vmem:[#allocation19_spill] sm:$0xff] %v4148_v13  ;;  %v4181_v62 = vpop.permute.xlu0 %650 }
 0x235   : > { %v1476_v57 = vadd.f32 1.0, %v1412_v34  ;;  %v1982_v43 = vadd.f32 -0.28449672, %v1918_v20  ;;  %v4142_v63 = vmul.f32 0.5, %v3974_v61  ;;  %v2617_v33 = vmul.f32 %v2553_v0, %v4061_v3 }
 0x236   : > { %v4144_v60 = vpop.eup %3265  ;;  %v2374_v34 = vmul.f32 1.442695, %v2302_v1  ;;  %vm1216_vm10 = vcmp.ge.f32.partialorder %v3992_v35, 0.0  ;;  %v2555_v59 = vsub.f32 1.0, %v2491_v50  ;;  %v2045_v18 = vmul.f32 %v4000_v29, %v1981_v8 }
 0x237   : > { %3273 = vrcp.f32 %v1476_v57  ;;  %v1920_v44 = vmul.f32 %v4098_v47, %v1856_v39  ;;  %v4153_v30 = vmul.f32 0.70710677, %v4134_v52  ;;  %v4156_v61 = vmul.f32 %v2679_v12, %v4041_v11 }
 0x238   : > { %v6045_v17 = vmov -1.0   ;;  %v2304_v0 = vmul.f32 %v2240_v2, %v4004_v46  ;;  %v4163_v57 = vmul.f32 0.70710677, %v4138_v9  ;;  %v2046_v3 = vmul.f32 %v4011_v22, %v1982_v43 }
 0x239   : > { %6044 = vst [vmem:[#allocation20_spill] sm:$0xff] %v4156_v61  ;;  %v4159_v51 = vsel %vm1214_vm9, 1.0, %v6045_v17  ;;  %v1663_v8 = vmul.f32 1.0614054, %v4144_v60  ;;  %v2242_v10 = vsub.f32 0.0, %v4105_v5  ;;  %v2681_v20 = vadd.f32 1.0, %v2617_v33 }
 0x23a   : > { %v4169_v49 = vand.u32 2147483647, %v4153_v30  ;;  %3275 = vpow2.f32 %v2374_v34  ;;  %v4174_v11 = vsel %vm1216_vm10, 1.0, %v6045_v17  ;;  %v4177_v46 = vand.u32 2147483647, %v4163_v57 }
 0x23b   : > { %v4179_v2 = vpop.eup %3267  ;;  %v2619_v25 = vmul.f32 %v2555_v59, %v4084_v14  ;;  %v2109_v31 = vadd.f32 0.2548296, %v2045_v18  ;;  %v1984_v12 = vadd.f32 -0.28449672, %v1920_v44  ;;  %v2378_v50 = vmul.f32 1.442695, %v2304_v0 }
 0x23c   : > { %v1411_v1 = vmul.f32 0.3275911, %v4169_v49  ;;  %v4186_v39 = vmul.f32 0.5, %v4009_v42  ;;  %v2244_v35 = vsub.f32 0.0, %v4125_v7  ;;  %v4191_v43 = vadd.f32 %v3863_v21, %v4181_v62  ;;  %v4197_v18 = vpop.f32.mrb[21].mxu1 }
 0x23d   : > { %v4193_v33 = vpop.eup %3269  ;;  %v2110_v34 = vadd.f32 0.2548296, %v2046_v3  ;;  %vm1215_vm11 = vcmp.ge.f32.partialorder %v4029_v19, 0.0  ;;  %v1727_v14 = vadd.f32 -1.4531521, %v1663_v8  ;;  %v2306_v59 = vmul.f32 %v2242_v10, %v4105_v5  ;;  %6046 = vst [vmem:[#allocation21_spill] sm:$0xff] %v4197_v18 }
 0x23e   : > { %v4200_v44 = vmul.f32 %v2681_v20, %v4044_v4  ;;  %v1665_v42 = vmul.f32 1.0614054, %v4179_v2  ;;  %v1666_v0 = vmul.f32 1.0614054, %v4193_v33  ;;  %v1413_v21 = vmul.f32 0.3275911, %v4177_v46  ;;  %v3272_v61 = vpop.eup %3271 }
 0x23f   : > { %v2683_v13 = vadd.f32 1.0, %v2619_v25  ;;  %v2173_v3 = vmul.f32 %v4000_v29, %v2109_v31  ;;  %v2048_v56 = vmul.f32 %v4098_v47, %v1984_v12  ;;  %v1475_v8 = vadd.f32 1.0, %v1411_v1 }
 0x240   : > { %6047 = vst [vmem:[#allocation22_spill] sm:$0xff] %v4200_v44  ;;  %3277 = vpow2.f32 %v2378_v50  ;;  %v1730_v5 = vadd.f32 -1.4531521, %v1666_v0  ;;  %v2308_v4 = vmul.f32 %v2244_v35, %v4125_v7  ;;  %v4211_v10 = vmul.f32 0.70710677, %v4191_v43 }
 0x241   : > { %v4207_v53 = vpop.eup %3273  ;;  %v2174_v20 = vmul.f32 %v4011_v22, %v2110_v34  ;;  %v1791_v44 = vmul.f32 %v4144_v60, %v1727_v14  ;;  %v2382_v18 = vmul.f32 1.442695, %v2306_v59  ;;  %v4219_v29 = vsel %vm1215_vm11, 1.0, %v6045_v17 }
 0x242   : > { %v1668_v25 = vmul.f32 1.0614054, %v4207_v53  ;;  %v1729_v31 = vadd.f32 -1.4531521, %v1665_v42  ;;  %v1794_v12 = vmul.f32 %v4193_v33, %v1730_v5  ;;  %v1477_v1 = vadd.f32 1.0, %v1413_v21 }
 0x243   : > { %v2112_v7 = vadd.f32 0.2548296, %v2048_v56  ;;  %3279 = vrcp.f32 %v1475_v8  ;;  %v4224_v22 = vadd.f32 %v3869_v24, %v4181_v62  ;;  %v4226_v34 = vmul.f32 %v3272_v61, %v2173_v3 }
 0x244   : > { %v1732_v50 = vadd.f32 -1.4531521, %v1668_v25  ;;  %v3276_v35 = vpop.eup %3275  ;;  %v1858_v14 = vadd.f32 1.4214138, %v1794_v12  ;;  %v2386_v59 = vmul.f32 1.442695, %v2308_v4  ;;  %3281 = vpow2.f32 %v2382_v18 }
 0x245   : > { %v4229_v19 = vand.u32 2147483647, %v4211_v10  ;;  %v2494_v0 = vmul.f32 %v3276_v35, %v2174_v20  ;;  %v1855_v42 = vadd.f32 1.4214138, %v1791_v44  ;;  %v1793_v56 = vmul.f32 %v4179_v2, %v1729_v31  ;;  %v4241_v25 = vpop.f32.mrb[22].mxu0 }
 0x246   : > { %v1796_v21 = vmul.f32 %v4207_v53, %v1732_v50  ;;  %v1922_v8 = vmul.f32 %v4193_v33, %v1858_v14  ;;  %3283 = vrcp.f32 %v1477_v1  ;;  %v2176_v61 = vmul.f32 %v4098_v47, %v2112_v7 }
 0x247   : > { %v1414_v24 = vmul.f32 0.3275911, %v4229_v19  ;;  %v2239_v3 = vsub.f32 0.0, %v4051_v55  ;;  %v4238_v4 = vmul.f32 0.70710677, %v4224_v22  ;;  %v2241_v44 = vsub.f32 0.0, %v4087_v16 }
 0x248   : > { %v1860_v5 = vadd.f32 1.4214138, %v1796_v21  ;;  %v1986_v18 = vadd.f32 -0.28449672, %v1922_v8  ;;  %3285 = vpow2.f32 %v2386_v59  ;;  %v4244_v31 = vmul.f32 %v2683_v13, %v4072_v6 }
 0x249   : > { %v1478_v20 = vadd.f32 1.0, %v1414_v24  ;;  %v2558_v12 = vsub.f32 1.0, %v2494_v0  ;;  %v1919_v1 = vmul.f32 %v4144_v60, %v1855_v42  ;;  %v4249_v50 = vmul.f32 0.5, %v4055_v15  ;;  %v4259_v15 = vpop.f32.mrb[22].mxu1 }
 0x24a   : > { %6048 = vst [vmem:[#allocation23_spill] sm:$0xff] %v4244_v31  ;;  %v1924_v47 = vmul.f32 %v4207_v53, %v1860_v5  ;;  %v3278_v7 = vpop.eup %3277  ;;  %v1857_v35 = vadd.f32 1.4214138, %v1793_v56  ;;  %v2050_v14 = vmul.f32 %v4193_v33, %v1986_v18  ;;  %v4253_v59 = vand.u32 2147483647, %v4238_v4  ;;  %6049 = vst [vmem:[#allocation24_spill] sm:$0xff] %v4259_v15 }
 0x24b   : > { %v2557_v21 = vsub.f32 1.0, %v4226_v34  ;;  %v2496_v8 = vmul.f32 %v3278_v7, %v2176_v61  ;;  %v2303_v6 = vmul.f32 %v2239_v3, %v4051_v55  ;;  %v2305_v0 = vmul.f32 %v2241_v44, %v4087_v16 }
 0x24c   : > { %v1988_v13 = vadd.f32 -0.28449672, %v1924_v47  ;;  %vm1218_vm12 = vcmp.ge.f32.partialorder %v4081_v58, 0.0  ;;  %v2114_v42 = vadd.f32 0.2548296, %v2050_v14  ;;  %3287 = vrcp.f32 %v1478_v20 }
 0x24d   : > { %v4261_v56 = vpop.eup %3279  ;;  %v2622_v24 = vmul.f32 %v2558_v12, %v4159_v51  ;;  %v1983_v5 = vadd.f32 -0.28449672, %v1919_v1  ;;  %v1090_v18 = vmul.f32 0.5, %v4065_v32  ;;  %v1921_v55 = vmul.f32 %v4179_v2, %v1857_v35 }
 0x24e   : > { %v2052_v34 = vmul.f32 %v4207_v53, %v1988_v13  ;;  %v2178_v61 = vmul.f32 %v4193_v33, %v2114_v42  ;;  %v1092_v16 = vmul.f32 0.5, %v4091_v54  ;;  %v1416_v3 = vmul.f32 0.3275911, %v4253_v59  ;;  %v3282_v44 = vpop.eup %3281 }
 0x24f   : > { %v2560_v20 = vsub.f32 1.0, %v2496_v8  ;;  %v2376_v47 = vmul.f32 1.442695, %v2303_v6  ;;  %v1282_v51 = vsel %vm1218_vm12, 1.0, %v6045_v17  ;;  %v2380_v32 = vmul.f32 1.442695, %v2305_v0 }
 0x250   : > { %v2116_v12 = vadd.f32 0.2548296, %v2052_v34  ;;  %v4273_v1 = vpop.eup %3283  ;;  %v2498_v7 = vmul.f32 %v3282_v44, %v2178_v61  ;;  %v1667_v35 = vmul.f32 1.0614054, %v4261_v56  ;;  %v1480_v14 = vadd.f32 1.0, %v1416_v3  ;;  %v4285_v61 = vpop.f32.mrb[23].mxu0 }
 0x251   : > { %v2686_v33 = vadd.f32 1.0, %v2622_v24  ;;  %v2047_v54 = vmul.f32 %v4144_v60, %v1983_v5  ;;  %vm1220_vm13 = vcmp.ge.f32.partialorder %v4109_v36, 0.0  ;;  %v1985_v13 = vadd.f32 -0.28449672, %v1921_v55  ;;  %6050 = vst [vmem:[#allocation25_spill] sm:$0xff] %v4285_v61 }
 0x252   : > { %v2180_v8 = vmul.f32 %v4207_v53, %v2116_v12  ;;  %v3286_v6 = vpop.eup %3285  ;;  %v2562_v42 = vsub.f32 1.0, %v2498_v7  ;;  %3289 = vrcp.f32 %v1480_v14  ;;  %v4281_v58 = vadd.f32 %v3872_v27, %v4181_v62 }
 0x253   : > { %v2624_v0 = vmul.f32 %v2560_v20, %v4174_v11  ;;  %3291 = vpow2.f32 %v2376_v47  ;;  %v1669_v24 = vmul.f32 1.0614054, %v4273_v1  ;;  %v2621_v5 = vmul.f32 %v2557_v21, %v4119_v23 }
 0x254   : > { %v2500_v34 = vmul.f32 %v3286_v6, %v2180_v8  ;;  %v2626_v3 = vmul.f32 %v2562_v42, %v1282_v51  ;;  %v1731_v53 = vadd.f32 -1.4531521, %v1667_v35  ;;  %v4289_v55 = vmul.f32 0.70710677, %v4281_v58  ;;  %v4320_v6 = vpop.f32.mrb[23].mxu1 }
 0x255   : > { %vm1217_vm14 = vcmp.ge.f32.partialorder %v4076_v41, 0.0  ;;  %3293 = vpow2.f32 %v2380_v32  ;;  %v1284_v27 = vsel %vm1220_vm13, 1.0, %v6045_v17  ;;  %v4298_v20 = vmul.f32 %v2686_v33, %v4122_v26  ;;  %6053 = vst [vmem:[#allocation28_spill] sm:$0xff] %v4320_v6 }
 0x256   : > { %v2564_v11 = vsub.f32 1.0, %v2500_v34  ;;  %v4295_v44 = vpop.eup %3287  ;;  %v2111_v47 = vadd.f32 0.2548296, %v2047_v54  ;;  %v2049_v23 = vmul.f32 %v4179_v2, %v1985_v13  ;;  %v2690_v21 = vadd.f32 1.0, %v2626_v3  ;;  %v4335_v3 = vpop.permute.xlu1 %655 }
 0x257   : > { %6051 = vst [vmem:[#allocation26_spill] sm:$0xff] %v4298_v20  ;;  %v2688_v51 = vadd.f32 1.0, %v2624_v0  ;;  %v2243_v7 = vsub.f32 0.0, %v4169_v49  ;;  %v1733_v35 = vadd.f32 -1.4531521, %v1669_v24  ;;  %v1795_v36 = vmul.f32 %v4261_v56, %v1731_v53 }
 0x258   : > { %v2628_v12 = vmul.f32 %v2564_v11, %v1284_v27  ;;  %v4302_v32 = vmul.f32 %v2690_v21, %v1090_v18  ;;  %v4306_v14 = vand.u32 2147483647, %v4289_v55  ;;  %v4310_v26 = vadd.f32 %v3874_v28, %v4181_v62  ;;  %v6056_v21 = vld [vmem:[#allocation5_spill] sm:$0xff] }
 0x259   : > { %v4312_v33 = vadd.f32 1.0, %v2621_v5  ;;  %v4317_v54 = vsel %vm1217_vm14, 1.0, %v6045_v17  ;;  %v1670_v18 = vmul.f32 1.0614054, %v4295_v44  ;;  %v2175_v13 = vmul.f32 %v4144_v60, %v2111_v47 }
 0x25a   : > { %6052 = vst [vmem:[#allocation27_spill] sm:$0xff] %v4302_v32  ;;  %v2692_v8 = vadd.f32 1.0, %v2628_v12  ;;  %v2113_v42 = vadd.f32 0.2548296, %v2049_v23  ;;  %v1415_v28 = vmul.f32 0.3275911, %v4306_v14  ;;  %v4327_v62 = vmul.f32 %v2688_v51, %v4142_v63 }
 0x25b   : > { %v1797_v41 = vmul.f32 %v4273_v1, %v1733_v35  ;;  %v2245_v24 = vsub.f32 0.0, %v4177_v46  ;;  %v1859_v60 = vadd.f32 1.4214138, %v1795_v36  ;;  %v2307_v53 = vmul.f32 %v2243_v7, %v4169_v49 }
 0x25c   : > { %6054 = vst [vmem:[#allocation29_spill] sm:$0xff] %v4327_v62  ;;  %v4329_v34 = vmul.f32 %v2692_v8, %v1092_v16  ;;  %v4333_v5 = vpop.eup %3289  ;;  %v1479_v27 = vadd.f32 1.0, %v1415_v28  ;;  %v4339_v11 = vmul.f32 0.70710677, %v4310_v26  ;;  %v4344_v16 = vmul.f32 0.5, %v4134_v52 }
 0x25d   : > { %v3292_v47 = vpop.eup %3291  ;;  %v1734_v23 = vadd.f32 -1.4531521, %v1670_v18  ;;  %v4348_v51 = vadd.f32 %v6056_v21, %v4335_v3  ;;  %v2177_v35 = vmul.f32 %v4179_v2, %v2113_v42  ;;  %vm1219_vm15 = vcmp.ge.f32.partialorder %v4153_v30, 0.0 }
 0x25e   : > { %6055 = vst [vmem:[#allocation30_spill] sm:$0xff] %v4329_v34  ;;  %v2495_v12 = vmul.f32 %v3292_v47, %v2175_v13  ;;  %v4353_v49 = vmul.f32 0.5, %v4138_v9  ;;  %vm1221_vm0 = vcmp.ge.f32.partialorder %v4163_v57, 0.0  ;;  %v1861_v36 = vadd.f32 1.4214138, %v1797_v41 }
 0x25f   : > { %v3294_v7 = vpop.eup %3293  ;;  %v2309_v52 = vmul.f32 %v2245_v24, %v4177_v46  ;;  %v1672_v8 = vmul.f32 1.0614054, %v4333_v5  ;;  %v1923_v18 = vmul.f32 %v4261_v56, %v1859_v60  ;;  %v2384_v28 = vmul.f32 1.442695, %v2307_v53  ;;  %v6057_v60 = vld [vmem:[#allocation6_spill] sm:$0xff] }
 0x260   : > { %3295 = vrcp.f32 %v1479_v27  ;;  %v4360_v13 = vand.u32 2147483647, %v4339_v11  ;;  %vm1222_vm1 = vcmp.ge.f32.partialorder %v4211_v10, 0.0  ;;  %v1798_v9 = vmul.f32 %v4295_v44, %v1734_v23  ;;  %v4373_v27 = vpop.f32.mrb[24].mxu0 }
 0x261   : > { %v2246_v2 = vsub.f32 0.0, %v4229_v19  ;;  %v4366_v42 = vmul.f32 0.70710677, %v4348_v51  ;;  %v2559_v41 = vsub.f32 1.0, %v2495_v12  ;;  %v2497_v46 = vmul.f32 %v3294_v7, %v2177_v35  ;;  %6058 = vst [vmem:[#allocation5_spill] sm:$0xff] %v4373_v27 }
 0x262   : > { %v1417_v24 = vmul.f32 0.3275911, %v4360_v13  ;;  %v4371_v53 = vadd.f32 %v6057_v60, %v4335_v3  ;;  %v4378_v47 = vsel %vm1219_vm15, 1.0, %v6045_v17  ;;  %v1925_v23 = vmul.f32 %v4273_v1, %v1861_v36 }
 0x263   : > { %v4382_v21 = vmul.f32 0.5, %v4191_v43  ;;  %v1736_v12 = vadd.f32 -1.4531521, %v1672_v8  ;;  %v1987_v35 = vadd.f32 -0.28449672, %v1923_v18  ;;  %3297 = vpow2.f32 %v2384_v28  ;;  %v4398_v8 = vpop.f32.mrb[24].mxu1 }
 0x264   : > { %v4387_v7 = vsel %vm1221_vm0, 1.0, %v6045_v17  ;;  %v2388_v60 = vmul.f32 1.442695, %v2309_v52  ;;  %v4392_v30 = vsel %vm1222_vm1, 1.0, %v6045_v17  ;;  %v1862_v63 = vadd.f32 1.4214138, %v1798_v9 }
 0x265   : > { %v2310_v36 = vmul.f32 %v2246_v2, %v4229_v19  ;;  %v4396_v43 = vand.u32 2147483647, %v4366_v42  ;;  %6059 = vst [vmem:[#allocation6_spill] sm:$0xff] %v4398_v8  ;;  %v2623_v18 = vmul.f32 %v2559_v41, %v4219_v29  ;;  %v2561_v28 = vsub.f32 1.0, %v2497_v46 }
 0x266   : > { %v1481_v57 = vadd.f32 1.0, %v1417_v24  ;;  %v4402_v0 = vmul.f32 0.70710677, %v4371_v53  ;;  %v1989_v52 = vadd.f32 -0.28449672, %v1925_v23  ;;  %v1800_v10 = vmul.f32 %v4333_v5, %v1736_v12  ;;  %v6060_v24 = vld [vmem:[#allocation7_spill] sm:$0xff] }
 0x267   : > { %v2248_v62 = vsub.f32 0.0, %v4253_v59  ;;  %v1418_v9 = vmul.f32 0.3275911, %v4396_v43  ;;  %v2051_v19 = vmul.f32 %v4261_v56, %v1987_v35  ;;  %3299 = vpow2.f32 %v2388_v60 }
 0x268   : > { %vm1224_vm2 = vcmp.ge.f32.partialorder %v4238_v4, 0.0  ;;  %v4410_v2 = vand.u32 2147483647, %v4402_v0  ;;  %v1926_v29 = vmul.f32 %v4295_v44, %v1862_v63  ;;  %v2390_v41 = vmul.f32 1.442695, %v2310_v36  ;;  %v6063_v4 = vld [vmem:[#allocation8_spill] sm:$0xff] }
 0x269   : > { %v1482_v46 = vadd.f32 1.0, %v1418_v9  ;;  %v4415_v23 = vadd.f32 %v6060_v24, %v4335_v3  ;;  %v2687_v34 = vadd.f32 1.0, %v2623_v18  ;;  %v2625_v20 = vmul.f32 %v2561_v28, %v4317_v54 }
 0x26a   : > { %v4417_v12 = vpop.eup %3295  ;;  %3301 = vrcp.f32 %v1481_v57  ;;  %v1420_v35 = vmul.f32 0.3275911, %v4410_v2  ;;  %v2053_v60 = vmul.f32 %v4273_v1, %v1989_v52  ;;  %v1864_v32 = vadd.f32 1.4214138, %v1800_v10 }
 0x26b   : > { %v2312_v31 = vmul.f32 %v2248_v62, %v4253_v59  ;;  %3303 = vrcp.f32 %v1482_v46  ;;  %v2115_v63 = vadd.f32 0.2548296, %v2051_v19  ;;  %v4424_v36 = vmul.f32 0.5, %v4224_v22  ;;  %v4446_v19 = vpop.f32.mrb[25].mxu0 }
 0x26c   : > { %v4429_v9 = vsel %vm1224_vm2, 1.0, %v6045_v17  ;;  %v1484_v18 = vadd.f32 1.0, %v1420_v35  ;;  %v4433_v54 = vmul.f32 %v4312_v33, %v4094_v40  ;;  %v1990_v28 = vadd.f32 -0.28449672, %v1926_v29  ;;  %6064 = vst [vmem:[#allocation8_spill] sm:$0xff] %v4446_v19 }
 0x26d   : > { %v1671_v57 = vmul.f32 1.0614054, %v4417_v12  ;;  %v4437_v59 = vmul.f32 0.70710677, %v4415_v23  ;;  %v3298_v62 = vpop.eup %3297  ;;  %v4440_v22 = vmul.f32 %v2687_v34, %v4186_v39  ;;  %v2689_v52 = vadd.f32 1.0, %v2625_v20  ;;  %v4455_v34 = vpop.permute.xlu0 %660 }
 0x26e   : > { %6061 = vst [vmem:[#allocation7_spill] sm:$0xff] %v4433_v54  ;;  %3305 = vpow2.f32 %v2390_v41  ;;  %v4444_v10 = vadd.f32 %v6063_v4, %v4335_v3  ;;  %v2117_v40 = vadd.f32 0.2548296, %v2053_v60  ;;  %v1928_v33 = vmul.f32 %v4333_v5, %v1864_v32  ;;  %v6066_v60 = vld [vmem:[#allocation9_spill] sm:$0xff] }
 0x26f   : > { %6062 = vst [vmem:[#allocation31_spill] sm:$0xff] %v4440_v22  ;;  %v2394_v29 = vmul.f32 1.442695, %v2312_v31  ;;  %3307 = vrcp.f32 %v1484_v18  ;;  %v2179_v46 = vmul.f32 %v4261_v56, %v2115_v63  ;;  %vm1223_vm3 = vcmp.ge.f32.partialorder %v4289_v55, 0.0 }
 0x270   : > { %v2247_v39 = vsub.f32 0.0, %v4306_v14  ;;  %v4453_v20 = vand.u32 2147483647, %v4437_v59  ;;  %v2054_v3 = vmul.f32 %v4295_v44, %v1990_v28  ;;  %v4459_v41 = vmul.f32 0.5, %v4281_v58 }
 0x271   : > { %v1735_v24 = vadd.f32 -1.4531521, %v1671_v57  ;;  %v2250_v31 = vsub.f32 0.0, %v4396_v43  ;;  %v3300_v32 = vpop.eup %3299  ;;  %v4463_v56 = vmul.f32 %v2689_v52, %v4249_v50  ;;  %v4467_v35 = vmul.f32 0.70710677, %v4444_v10 }
 0x272   : > { %v1419_v55 = vmul.f32 0.3275911, %v4453_v20  ;;  %v4471_v63 = vadd.f32 %v6066_v60, %v4455_v34  ;;  %v2181_v18 = vmul.f32 %v4273_v1, %v2117_v40  ;;  %v1992_v58 = vadd.f32 -0.28449672, %v1928_v33  ;;  %v4486_v60 = vpop.f32.mrb[25].mxu1 }
 0x273   : > { %6065 = vst [vmem:[#allocation32_spill] sm:$0xff] %v4463_v56  ;;  %v4475_v28 = vsel %vm1223_vm3, 1.0, %v6045_v17  ;;  %v4478_v57 = vmul.f32 0.5, %v4310_v26  ;;  %v2499_v52 = vmul.f32 %v3298_v62, %v2179_v46  ;;  %v2311_v4 = vmul.f32 %v2247_v39, %v4306_v14  ;;  %6067 = vst [vmem:[#allocation9_spill] sm:$0xff] %v4486_v60 }
 0x274   : > { %v4480_v50 = vpop.eup %3301  ;;  %v1483_v56 = vadd.f32 1.0, %v1419_v55  ;;  %v4484_v22 = vand.u32 2147483647, %v4467_v35  ;;  %v2118_v1 = vadd.f32 0.2548296, %v2054_v3  ;;  %v1799_v40 = vmul.f32 %v4417_v12, %v1735_v24 }
 0x275   : > { %v4488_v54 = vpop.eup %3303  ;;  %v2314_v33 = vmul.f32 %v2250_v31, %v4396_v43  ;;  %v2252_v26 = vsub.f32 0.0, %v4410_v2  ;;  %3309 = vpow2.f32 %v2394_v29  ;;  %v4496_v46 = vmul.f32 0.70710677, %v4471_v63 }
 0x276   : > { %v1674_v62 = vmul.f32 1.0614054, %v4488_v54  ;;  %v1421_v14 = vmul.f32 0.3275911, %v4484_v22  ;;  %v2501_v39 = vmul.f32 %v3300_v32, %v2181_v18  ;;  %v2056_v55 = vmul.f32 %v4333_v5, %v1992_v58 }
 0x277   : > { %v1673_v60 = vmul.f32 1.0614054, %v4480_v50  ;;  %3311 = vrcp.f32 %v1483_v56  ;;  %v2563_v24 = vsub.f32 1.0, %v2499_v52  ;;  %v2392_v19 = vmul.f32 1.442695, %v2311_v4 }
 0x278   : > { %v3306_v3 = vpop.eup %3305  ;;  %vm1225_vm4 = vcmp.ge.f32.partialorder %v4339_v11, 0.0  ;;  %v1738_v43 = vadd.f32 -1.4531521, %v1674_v62  ;;  %v2182_v31 = vmul.f32 %v4295_v44, %v2118_v1  ;;  %v1863_v8 = vadd.f32 1.4214138, %v1799_v40  ;;  %v6068_v62 = vld [vmem:[#allocation10_spill] sm:$0xff] }
 0x279   : > { %v4501_v29 = vpop.eup %3307  ;;  %v2398_v27 = vmul.f32 1.442695, %v2314_v33  ;;  %v2316_v6 = vmul.f32 %v2252_v26, %v4410_v2  ;;  %v1485_v58 = vadd.f32 1.0, %v1421_v14  ;;  %v4508_v56 = vand.u32 2147483647, %v4496_v46 }
 0x27a   : > { %v1802_v32 = vmul.f32 %v4488_v54, %v1738_v43  ;;  %v1676_v18 = vmul.f32 1.0614054, %v4501_v29  ;;  %v2565_v52 = vsub.f32 1.0, %v2501_v39  ;;  %v2120_v4 = vadd.f32 0.2548296, %v2056_v55  ;;  %v4517_v43 = vpop.f32.mrb[26].mxu0 }
 0x27b   : > { %v1737_v61 = vadd.f32 -1.4531521, %v1673_v60  ;;  %v4512_v15 = vadd.f32 %v6068_v62, %v4455_v34  ;;  %v2627_v44 = vmul.f32 %v2563_v24, %v4378_v47  ;;  %v1422_v2 = vmul.f32 0.3275911, %v4508_v56 }
 0x27c   : > { %v1866_v1 = vadd.f32 1.4214138, %v1802_v32  ;;  %v1740_v40 = vadd.f32 -1.4531521, %v1676_v18  ;;  %v2502_v33 = vmul.f32 %v3306_v3, %v2182_v31  ;;  %v1927_v26 = vmul.f32 %v4417_v12, %v1863_v8 }
 0x27d   : > { %3313 = vpow2.f32 %v2398_v27  ;;  %v2402_v14 = vmul.f32 1.442695, %v2316_v6  ;;  %v1486_v55 = vadd.f32 1.0, %v1422_v2  ;;  %v2629_v62 = vmul.f32 %v2565_v52, %v4387_v7 }
 0x27e   : > { %v1930_v39 = vmul.f32 %v4488_v54, %v1866_v1  ;;  %v1804_v60 = vmul.f32 %v4501_v29, %v1740_v40  ;;  %3315 = vrcp.f32 %v1485_v58  ;;  %v2184_v47 = vmul.f32 %v4333_v5, %v2120_v4  ;;  %v4543_v4 = vpop.f32.mrb[26].mxu1 }
 0x27f   : > { %v1801_v24 = vmul.f32 %v4480_v50, %v1737_v61  ;;  %v4525_v3 = vmul.f32 0.70710677, %v4512_v15  ;;  %v3310_v8 = vpop.eup %3309  ;;  %v4530_v6 = vsel %vm1225_vm4, 1.0, %v6045_v17  ;;  %3317 = vrcp.f32 %v1486_v55  ;;  %v6069_v55 = vld [vmem:[#allocation11_spill] sm:$0xff] }
 0x280   : > { %v1994_v27 = vadd.f32 -0.28449672, %v1930_v39  ;;  %v1868_v31 = vadd.f32 1.4214138, %v1804_v60  ;;  %v2566_v18 = vsub.f32 1.0, %v2502_v33  ;;  %v2249_v7 = vsub.f32 0.0, %v4360_v13 }
 0x281   : > { %v4532_v32 = vpop.eup %3311  ;;  %v4536_v5 = vmul.f32 0.5, %v4348_v51  ;;  %3319 = vpow2.f32 %v2402_v14  ;;  %v1991_v61 = vadd.f32 -0.28449672, %v1927_v26  ;;  %v4541_v11 = vand.u32 2147483647, %v4525_v3 }
 0x282   : > { %v2058_v58 = vmul.f32 %v4488_v54, %v1994_v27  ;;  %v1932_v52 = vmul.f32 %v4501_v29, %v1868_v31  ;;  %v2691_v1 = vadd.f32 1.0, %v2627_v44  ;;  %v4545_v40 = vadd.f32 1.0, %v2629_v62 }
 0x283   : > { %v2504_v2 = vmul.f32 %v3310_v8, %v2184_v47  ;;  %v1865_v33 = vadd.f32 1.4214138, %v1801_v24  ;;  %3321 = vpow2.f32 %v2392_v19  ;;  %v1675_v14 = vmul.f32 1.0614054, %v4532_v32 }
 0x284   : > { %v2122_v39 = vadd.f32 0.2548296, %v2058_v58  ;;  %v1996_v51 = vadd.f32 -0.28449672, %v1932_v52  ;;  %v2313_v26 = vmul.f32 %v2249_v7, %v4360_v13  ;;  %vm1226_vm5 = vcmp.ge.f32.partialorder %v4366_v42, 0.0 }
 0x285   : > { %v1424_v60 = vmul.f32 0.3275911, %v4541_v11  ;;  %v4553_v27 = vadd.f32 %v6069_v55, %v4455_v34  ;;  %v2630_v44 = vmul.f32 %v2566_v18, %v4392_v30  ;;  %v2055_v62 = vmul.f32 %v4417_v12, %v1991_v61 }
 0x286   : > { %v2186_v19 = vmul.f32 %v4488_v54, %v2122_v39  ;;  %v2060_v47 = vmul.f32 %v4501_v29, %v1996_v51  ;;  %v4560_v8 = vmul.f32 %v2691_v1, %v4344_v16  ;;  %v2568_v13 = vsub.f32 1.0, %v2504_v2 }
 0x287   : > { %v3314_v24 = vpop.eup %3313  ;;  %vm1228_vm6 = vcmp.ge.f32.partialorder %v4402_v0, 0.0  ;;  %v1488_v31 = vadd.f32 1.0, %v1424_v60  ;;  %v1929_v58 = vmul.f32 %v4480_v50, %v1865_v33  ;;  %v1739_v18 = vadd.f32 -1.4531521, %v1675_v14  ;;  %v6071_v0 = vld [vmem:[#allocation12_spill] sm:$0xff] }
 0x288   : > { %6070 = vst [vmem:[#allocation10_spill] sm:$0xff] %v4560_v8  ;;  %v4563_v7 = vpop.eup %3315  ;;  %v2506_v52 = vmul.f32 %v3314_v24, %v2186_v19  ;;  %v2124_v30 = vadd.f32 0.2548296, %v2060_v47  ;;  %v2396_v61 = vmul.f32 1.442695, %v2313_v26  ;;  %v1290_v54 = vsel %vm1226_vm5, 1.0, %v6045_v17 }
 0x289   : > { %v1100_v39 = vmul.f32 0.5, %v4371_v53  ;;  %v4571_v16 = vmul.f32 0.70710677, %v4553_v27  ;;  %v4573_v1 = vpop.eup %3317  ;;  %v2694_v2 = vadd.f32 1.0, %v2630_v44  ;;  %v2119_v51 = vadd.f32 0.2548296, %v2055_v62 }
 0x28a   : > { %v2570_v60 = vsub.f32 1.0, %v2506_v52  ;;  %v2188_v33 = vmul.f32 %v4501_v29, %v2124_v30  ;;  %v2632_v14 = vmul.f32 %v2568_v13, %v4429_v9  ;;  %v1292_v42 = vsel %vm1228_vm6, 1.0, %v6045_v17  ;;  %v4582_v44 = vpop.f32.mrb[27].mxu0 }
 0x28b   : > { %v3320_v55 = vpop.eup %3319  ;;  %v1677_v26 = vmul.f32 1.0614054, %v4563_v7  ;;  %3323 = vrcp.f32 %v1488_v31  ;;  %v1993_v53 = vadd.f32 -0.28449672, %v1929_v58  ;;  %v1803_v24 = vmul.f32 %v4532_v32, %v1739_v18 }
 0x28c   : > { %v2634_v19 = vmul.f32 %v2570_v60, %v1290_v54  ;;  %v2508_v47 = vmul.f32 %v3320_v55, %v2188_v33  ;;  %v4585_v62 = vmul.f32 0.5, %v4415_v23  ;;  %v1678_v29 = vmul.f32 1.0614054, %v4573_v1  ;;  %v4599_v54 = vpop.f32.mrb[27].mxu1 }
 0x28d   : > { %v4589_v9 = vand.u32 2147483647, %v4571_v16  ;;  %v4593_v13 = vadd.f32 %v6071_v0, %v4455_v34  ;;  %v3322_v31 = vpop.eup %3321  ;;  %v4596_v58 = vmul.f32 %v2694_v2, %v4382_v21  ;;  %v2183_v52 = vmul.f32 %v4417_v12, %v2119_v51  ;;  %6073 = vst [vmem:[#allocation12_spill] sm:$0xff] %v4599_v54  ;;  %v4607_v2 = vpop.permute.xlu1 %665 }
 0x28e   : > { %v2698_v30 = vadd.f32 1.0, %v2634_v19  ;;  %v2572_v18 = vsub.f32 1.0, %v2508_v47  ;;  %v2696_v23 = vadd.f32 1.0, %v2632_v14  ;;  %vm1227_vm7 = vcmp.ge.f32.partialorder %v4437_v59, 0.0 }
 0x28f   : > { %6072 = vst [vmem:[#allocation11_spill] sm:$0xff] %v4596_v58  ;;  %v2251_v60 = vsub.f32 0.0, %v4453_v20  ;;  %v1741_v33 = vadd.f32 -1.4531521, %v1677_v26  ;;  %v2057_v55 = vmul.f32 %v4480_v50, %v1993_v53  ;;  %v1867_v21 = vadd.f32 1.4214138, %v1803_v24 }
 0x290   : > { %v4605_v34 = vmul.f32 %v2698_v30, %v4536_v5  ;;  %v2636_v0 = vmul.f32 %v2572_v18, %v1292_v42  ;;  %3325 = vpow2.f32 %v2396_v61  ;;  %v1742_v12 = vadd.f32 -1.4531521, %v1678_v29 }
 0x291   : > { %v1423_v51 = vmul.f32 0.3275911, %v4589_v9  ;;  %v4611_v14 = vmul.f32 0.70710677, %v4593_v13  ;;  %v2503_v19 = vmul.f32 %v3322_v31, %v2183_v52  ;;  %v4617_v5 = vadd.f32 %v3976_v37, %v4607_v2 }
 0x292   : > { %6074 = vst [vmem:[#allocation33_spill] sm:$0xff] %v4605_v34  ;;  %v2700_v47 = vadd.f32 1.0, %v2636_v0  ;;  %v4622_v42 = vsel %vm1227_vm7, 1.0, %v6045_v17  ;;  %v4625_v61 = vmul.f32 0.5, %v4444_v10  ;;  %v1805_v53 = vmul.f32 %v4563_v7, %v1741_v33 }
 0x293   : > { %v4629_v24 = vmul.f32 0.5, %v4471_v63  ;;  %v4632_v29 = vmul.f32 %v2696_v23, %v4424_v36  ;;  %v2121_v31 = vadd.f32 0.2548296, %v2057_v55  ;;  %v2315_v37 = vmul.f32 %v2251_v60, %v4453_v20 }
 0x294   : > { %v4634_v52 = vmul.f32 %v2700_v47, %v1100_v39  ;;  %v1931_v59 = vmul.f32 %v4532_v32, %v1867_v21  ;;  %v1806_v10 = vmul.f32 %v4573_v1, %v1742_v12  ;;  %v1487_v18 = vadd.f32 1.0, %v1423_v51 }
 0x295   : > { %6075 = vst [vmem:[#allocation34_spill] sm:$0xff] %v4632_v29  ;;  %v4637_v30 = vpop.eup %3323  ;;  %v4642_v33 = vand.u32 2147483647, %v4611_v14  ;;  %v2567_v63 = vsub.f32 1.0, %v2503_v19  ;;  %v2253_v23 = vsub.f32 0.0, %v4484_v22  ;;  %vm1229_vm8 = vcmp.ge.f32.partialorder %v4467_v35, 0.0 }
 0x296   : > { %6076 = vst [vmem:[#allocation35_spill] sm:$0xff] %v4634_v52  ;;  %v4648_v39 = vmul.f32 0.70710677, %v4617_v5  ;;  %v1869_v20 = vadd.f32 1.4214138, %v1805_v53  ;;  %v2254_v60 = vsub.f32 0.0, %v4508_v56  ;;  %v2185_v0 = vmul.f32 %v4480_v50, %v2121_v31 }
 0x297   : > { %v1425_v55 = vmul.f32 0.3275911, %v4642_v33  ;;  %v2400_v21 = vmul.f32 1.442695, %v2315_v37  ;;  %v1680_v12 = vmul.f32 1.0614054, %v4637_v30  ;;  %3327 = vrcp.f32 %v1487_v18 }
 0x298   : > { %v4656_v51 = vand.u32 2147483647, %v4648_v39  ;;  %v1995_v19 = vadd.f32 -0.28449672, %v1931_v59  ;;  %v1870_v47 = vadd.f32 1.4214138, %v1806_v10  ;;  %v2631_v26 = vmul.f32 %v2567_v63, %v4475_v28 }
 0x299   : > { %v1489_v36 = vadd.f32 1.0, %v1425_v55  ;;  %v2317_v53 = vmul.f32 %v2253_v23, %v4484_v22  ;;  %vm1230_vm9 = vcmp.ge.f32.partialorder %v4496_v46, 0.0  ;;  %v4662_v52 = vpop.f32.mrb[28].mxu0  ;;  %v1933_v31 = vmul.f32 %v4563_v7, %v1869_v20  ;;  %v4672_v63 = vpop.f32.mrb[28].mxu1 }
 0x29a   : > { %v1426_v29 = vmul.f32 0.3275911, %v4656_v51  ;;  %6077 = vst [vmem:[#allocation36_spill] sm:$0xff] %v4662_v52  ;;  %v3326_v50 = vpop.eup %3325  ;;  %v2318_v37 = vmul.f32 %v2254_v60, %v4508_v56  ;;  %v2256_v59 = vsub.f32 0.0, %v4541_v11  ;;  %v4670_v28 = vsel %vm1229_vm8, 1.0, %v6045_v17  ;;  %6078 = vst [vmem:[#allocation37_spill] sm:$0xff] %v4672_v63 }
 0x29b   : > { %3329 = vrcp.f32 %v1489_v36  ;;  %v2505_v10 = vmul.f32 %v3326_v50, %v2185_v0  ;;  %v1744_v22 = vadd.f32 -1.4531521, %v1680_v12  ;;  %v2059_v23 = vmul.f32 %v4532_v32, %v1995_v19 }
 0x29c   : > { %v1490_v18 = vadd.f32 1.0, %v1426_v29  ;;  %3331 = vpow2.f32 %v2400_v21  ;;  %v1934_v20 = vmul.f32 %v4573_v1, %v1870_v47  ;;  %v4678_v56 = vadd.f32 %v3978_v45, %v4607_v2 }
 0x29d   : > { %v2695_v36 = vadd.f32 1.0, %v2631_v26  ;;  %v2404_v60 = vmul.f32 1.442695, %v2317_v53  ;;  %v4683_v35 = vsel %vm1230_vm9, 1.0, %v6045_v17  ;;  %v4687_v29 = vadd.f32 %v4014_v38, %v4607_v2 }
 0x29e   : > { %v1997_v55 = vadd.f32 -0.28449672, %v1933_v31  ;;  %v2406_v0 = vmul.f32 1.442695, %v2318_v37  ;;  %v2320_v21 = vmul.f32 %v2256_v59, %v4541_v11  ;;  %3333 = vrcp.f32 %v1490_v18  ;;  %v4711_v31 = vpop.f32.mrb[29].mxu0 }
 0x29f   : > { %v2569_v12 = vsub.f32 1.0, %v2505_v10  ;;  %vm1232_vm10 = vcmp.ge.f32.partialorder %v4525_v3, 0.0  ;;  %v1808_v45 = vmul.f32 %v4637_v30, %v1744_v22  ;;  %v4693_v26 = vmul.f32 0.70710677, %v4678_v56  ;;  %6080 = vst [vmem:[#allocation39_spill] sm:$0xff] %v4711_v31 }
 0x2a0   : > { %v4697_v46 = vmul.f32 %v4545_v40, %v4353_v49  ;;  %v2123_v19 = vadd.f32 0.2548296, %v2059_v23  ;;  %v1998_v38 = vadd.f32 -0.28449672, %v1934_v20  ;;  %v4700_v47 = vmul.f32 0.70710677, %v4687_v29 }
 0x2a1   : > { %3335 = vpow2.f32 %v2404_v60  ;;  %v4703_v11 = vmul.f32 0.5, %v4512_v15  ;;  %v4706_v53 = vmul.f32 0.5, %v4553_v27  ;;  %v4709_v50 = vand.u32 2147483647, %v4693_v26  ;;  %v4713_v37 = vpop.eup %3327 }
 0x2a2   : > { %6079 = vst [vmem:[#allocation38_spill] sm:$0xff] %v4697_v46  ;;  %v4716_v49 = vmul.f32 %v2695_v36, %v4459_v41  ;;  %v2061_v40 = vmul.f32 %v4563_v7, %v1997_v55  ;;  %3337 = vpow2.f32 %v2406_v0  ;;  %v2410_v59 = vmul.f32 1.442695, %v2320_v21 }
 0x2a3   : > { %v2633_v15 = vmul.f32 %v2569_v12, %v4530_v6  ;;  %v4723_v27 = vsel %vm1232_vm10, 1.0, %v6045_v17  ;;  %v1872_v10 = vadd.f32 1.4214138, %v1808_v45  ;;  %v1428_v22 = vmul.f32 0.3275911, %v4709_v50 }
 0x2a4   : > { %6081 = vst [vmem:[#allocation40_spill] sm:$0xff] %v4716_v49  ;;  %v2187_v23 = vmul.f32 %v4532_v32, %v2123_v19  ;;  %v2062_v41 = vmul.f32 %v4573_v1, %v1998_v38  ;;  %v2258_v20 = vsub.f32 0.0, %v4656_v51  ;;  %v4732_v36 = vand.u32 2147483647, %v4700_v47 }
 0x2a5   : > { %v4726_v18 = vpop.eup %3329  ;;  %vm1231_vm11 = vcmp.ge.f32.partialorder %v4571_v16, 0.0  ;;  %v1679_v3 = vmul.f32 1.0614054, %v4713_v37  ;;  %v2255_v6 = vsub.f32 0.0, %v4589_v9  ;;  %v1492_v60 = vadd.f32 1.0, %v1428_v22  ;;  %v4752_v22 = vpop.f32.mrb[29].mxu1 }
 0x2a6   : > { %v3332_v55 = vpop.eup %3331  ;;  %v2125_v0 = vadd.f32 0.2548296, %v2061_v40  ;;  %3339 = vpow2.f32 %v2410_v59  ;;  %v1427_v21 = vmul.f32 0.3275911, %v4732_v36  ;;  %v4740_v32 = vadd.f32 %v4020_v48, %v4607_v2  ;;  %6082 = vst [vmem:[#allocation41_spill] sm:$0xff] %v4752_v22 }
 0x2a7   : > { %v2697_v12 = vadd.f32 1.0, %v2633_v15  ;;  %v1936_v45 = vmul.f32 %v4637_v30, %v1872_v10  ;;  %v1681_v19 = vmul.f32 1.0614054, %v4726_v18  ;;  %3341 = vrcp.f32 %v1492_v60 }
 0x2a8   : > { %v4744_v38 = vpop.eup %3333  ;;  %v2507_v58 = vmul.f32 %v3332_v55, %v2187_v23  ;;  %v2126_v34 = vadd.f32 0.2548296, %v2062_v41  ;;  %v4749_v40 = vsel %vm1231_vm11, 1.0, %v6045_v17  ;;  %v2322_v59 = vmul.f32 %v2258_v20, %v4656_v51  ;;  %v4764_v51 = vpop.permute.xlu0 %670 }
 0x2a9   : > { %v1743_v48 = vadd.f32 -1.4531521, %v1679_v3  ;;  %v2319_v2 = vmul.f32 %v2255_v6, %v4589_v9  ;;  %v4756_v15 = vmul.f32 0.5, %v4593_v13  ;;  %v1682_v10 = vmul.f32 1.0614054, %v4744_v38 }
 0x2aa   : > { %v2189_v23 = vmul.f32 %v4563_v7, %v2125_v0  ;;  %vm1233_vm12 = vcmp.ge.f32.partialorder %v4611_v14, 0.0  ;;  %v1491_v41 = vadd.f32 1.0, %v1427_v21  ;;  %v4762_v16 = vmul.f32 0.70710677, %v4740_v32  ;;  %v6084_v0 = vld [vmem:[#allocation17_spill] sm:$0xff] }
 0x2ab   : > { %v3336_v60 = vpop.eup %3335  ;;  %v4767_v20 = vmul.f32 %v2697_v12, %v4478_v57  ;;  %v2000_v9 = vadd.f32 -0.28449672, %v1936_v45  ;;  %v1745_v3 = vadd.f32 -1.4531521, %v1681_v19  ;;  %v1746_v13 = vadd.f32 -1.4531521, %v1682_v10 }
 0x2ac   : > { %v3338_v6 = vpop.eup %3337  ;;  %v2571_v55 = vsub.f32 1.0, %v2507_v58  ;;  %v2190_v49 = vmul.f32 %v4573_v1, %v2126_v34  ;;  %v2414_v7 = vmul.f32 1.442695, %v2322_v59  ;;  %v4772_v21 = vadd.f32 %v6084_v0, %v4764_v51 }
 0x2ad   : > { %6083 = vst [vmem:[#allocation42_spill] sm:$0xff] %v4767_v20  ;;  %v1807_v46 = vmul.f32 %v4713_v37, %v1743_v48  ;;  %v2408_v8 = vmul.f32 1.442695, %v2319_v2  ;;  %v1810_v22 = vmul.f32 %v4744_v38, %v1746_v13  ;;  %v2260_v57 = vsub.f32 0.0, %v4709_v50 }
 0x2ae   : > { %v2509_v12 = vmul.f32 %v3336_v60, %v2189_v23  ;;  %v4780_v45 = vsel %vm1233_vm12, 1.0, %v6045_v17  ;;  %3343 = vrcp.f32 %v1491_v41  ;;  %v4783_v1 = vand.u32 2147483647, %v4762_v16 }
 0x2af   : > { %v2064_v58 = vmul.f32 %v4637_v30, %v2000_v9  ;;  %v1809_v34 = vmul.f32 %v4726_v18, %v1745_v3  ;;  %v1874_v19 = vadd.f32 1.4214138, %v1810_v22  ;;  %v4788_v59 = vmul.f32 0.70710677, %v4772_v21 }
 0x2b0   : > { %v3340_v48 = vpop.eup %3339  ;;  %v2635_v2 = vmul.f32 %v2571_v55, %v4622_v42  ;;  %v2510_v10 = vmul.f32 %v3338_v6, %v2190_v49  ;;  %v2257_v14 = vsub.f32 0.0, %v4642_v33  ;;  %3345 = vpow2.f32 %v2414_v7  ;;  %v6085_v49 = vld [vmem:[#allocation18_spill] sm:$0xff]  ;;  %v4806_v55 = vpop.f32.mrb[30].mxu0 }
 0x2b1   : > { %v4792_v23 = vpop.eup %3341  ;;  %v1871_v41 = vadd.f32 1.4214138, %v1807_v46  ;;  %v1938_v60 = vmul.f32 %v4744_v38, %v1874_v19  ;;  %v2324_v9 = vmul.f32 %v2260_v57, %v4709_v50  ;;  %v4797_v3 = vand.u32 2147483647, %v4788_v59  ;;  %6086 = vst [vmem:[#allocation17_spill] sm:$0xff] %v4806_v55 }
 0x2b2   : > { %v2573_v22 = vsub.f32 1.0, %v2509_v12  ;;  %vm1234_vm13 = vcmp.ge.f32.partialorder %v4648_v39, 0.0  ;;  %v1684_v13 = vmul.f32 1.0614054, %v4792_v23  ;;  %v1429_v42 = vmul.f32 0.3275911, %v4783_v1 }
 0x2b3   : > { %v4804_v6 = vadd.f32 %v6085_v49, %v4764_v51  ;;  %v2128_v46 = vadd.f32 0.2548296, %v2064_v58  ;;  %3347 = vpow2.f32 %v2408_v8  ;;  %v1873_v7 = vadd.f32 1.4214138, %v1809_v34 }
 0x2b4   : > { %v2002_v50 = vadd.f32 -0.28449672, %v1938_v60  ;;  %v2699_v0 = vadd.f32 1.0, %v2635_v2  ;;  %v2321_v57 = vmul.f32 %v2257_v14, %v4642_v33  ;;  %v1748_v12 = vadd.f32 -1.4531521, %v1684_v13  ;;  %v6087_v60 = vld [vmem:[#allocation19_spill] sm:$0xff] }
 0x2b5   : > { %v1430_v19 = vmul.f32 0.3275911, %v4797_v3  ;;  %v2574_v20 = vsub.f32 1.0, %v2510_v10  ;;  %v1935_v31 = vmul.f32 %v4713_v37, %v1871_v41  ;;  %v2418_v52 = vmul.f32 1.442695, %v2324_v9  ;;  %v4828_v13 = vpop.f32.mrb[30].mxu1 }
 0x2b6   : > { %v2066_v63 = vmul.f32 %v4744_v38, %v2002_v50  ;;  %v1812_v49 = vmul.f32 %v4792_v23, %v1748_v12  ;;  %v1493_v54 = vadd.f32 1.0, %v1429_v42  ;;  %v4814_v8 = vmul.f32 0.70710677, %v4804_v6 }
 0x2b7   : > { %v1494_v55 = vadd.f32 1.0, %v1430_v19  ;;  %v2637_v58 = vmul.f32 %v2573_v22, %v4670_v28  ;;  %v2192_v33 = vmul.f32 %v4637_v30, %v2128_v46  ;;  %v1937_v34 = vmul.f32 %v4726_v18, %v1873_v7 }
 0x2b8   : > { %v2130_v2 = vadd.f32 0.2548296, %v2066_v63  ;;  %v4819_v10 = vpop.eup %3343  ;;  %v1876_v14 = vadd.f32 1.4214138, %v1812_v49  ;;  %v4822_v41 = vand.u32 2147483647, %v4814_v8  ;;  %v4826_v9 = vadd.f32 %v6087_v60, %v4764_v51 }
 0x2b9   : > { %3349 = vrcp.f32 %v1494_v55  ;;  %v1999_v42 = vadd.f32 -0.28449672, %v1935_v31  ;;  %v2412_v28 = vmul.f32 1.442695, %v2321_v57  ;;  %v2638_v63 = vmul.f32 %v2574_v20, %v4683_v35 }
 0x2ba   : > { %v2194_v30 = vmul.f32 %v4744_v38, %v2130_v2  ;;  %3351 = vpow2.f32 %v2418_v52  ;;  %v3346_v22 = vpop.eup %3345  ;;  %v1940_v46 = vmul.f32 %v4792_v23, %v1876_v14  ;;  %v1432_v55 = vmul.f32 0.3275911, %v4822_v41 }
 0x2bb   : > { %3353 = vrcp.f32 %v1493_v54  ;;  %v2512_v7 = vmul.f32 %v3340_v48, %v2192_v33  ;;  %v2001_v50 = vadd.f32 -0.28449672, %v1937_v34  ;;  %v1683_v19 = vmul.f32 1.0614054, %v4819_v10 }
 0x2bc   : > { %v2514_v12 = vmul.f32 %v3346_v22, %v2194_v30  ;;  %v1106_v49 = vmul.f32 0.5, %v4617_v5  ;;  %v2004_v31 = vadd.f32 -0.28449672, %v1940_v46  ;;  %v1496_v57 = vadd.f32 1.0, %v1432_v55 }
 0x2bd   : > { %v4837_v38 = vmul.f32 0.70710677, %v4826_v9  ;;  %v3348_v52 = vpop.eup %3347  ;;  %v2701_v2 = vadd.f32 1.0, %v2637_v58  ;;  %v2063_v35 = vmul.f32 %v4713_v37, %v1999_v42  ;;  %v1298_v54 = vsel %vm1234_vm13, 1.0, %v6045_v17 }
 0x2be   : > { %v2578_v20 = vsub.f32 1.0, %v2514_v12  ;;  %v4844_v48 = vmul.f32 %v2699_v0, %v4585_v62  ;;  %v2702_v33 = vadd.f32 1.0, %v2638_v63  ;;  %v2068_v5 = vmul.f32 %v4792_v23, %v2004_v31  ;;  %v4856_v63 = vpop.f32.mrb[31].mxu0 }
 0x2bf   : > { %3355 = vrcp.f32 %v1496_v57  ;;  %v2576_v34 = vsub.f32 1.0, %v2512_v7  ;;  %v2065_v14 = vmul.f32 %v4726_v18, %v2001_v50  ;;  %v2259_v58 = vsub.f32 0.0, %v4732_v36  ;;  %6090 = vst [vmem:[#allocation43_spill] sm:$0xff] %v4856_v63  ;;  %v6092_v50 = vld [vmem:[#allocation21_spill] sm:$0xff] }
 0x2c0   : > { %6088 = vst [vmem:[#allocation18_spill] sm:$0xff] %v4844_v48  ;;  %v2642_v60 = vmul.f32 %v2578_v20, %v1298_v54  ;;  %3357 = vpow2.f32 %v2412_v28  ;;  %v2132_v42 = vadd.f32 0.2548296, %v2068_v5  ;;  %v1747_v30 = vadd.f32 -1.4531521, %v1683_v19 }
 0x2c1   : > { %v4850_v39 = vand.u32 2147483647, %v4837_v38  ;;  %v4853_v22 = vmul.f32 %v2701_v2, %v4625_v61  ;;  %v2127_v62 = vadd.f32 0.2548296, %v2063_v35  ;;  %vm1236_vm14 = vcmp.ge.f32.partialorder %v4693_v26, 0.0 }
 0x2c2   : > { %v2706_v0 = vadd.f32 1.0, %v2642_v60  ;;  %v4861_v55 = vmul.f32 %v2702_v33, %v4629_v24  ;;  %v2196_v28 = vmul.f32 %v4792_v23, %v2132_v42  ;;  %v4867_v12 = vadd.f32 %v6092_v50, %v4764_v51 }
 0x2c3   : > { %6089 = vst [vmem:[#allocation19_spill] sm:$0xff] %v4853_v22  ;;  %v4858_v46 = vpop.eup %3349  ;;  %v1431_v7 = vmul.f32 0.3275911, %v4850_v39  ;;  %v2640_v19 = vmul.f32 %v2576_v34, %v4723_v27  ;;  %v2129_v31 = vadd.f32 0.2548296, %v2065_v14  ;;  %v2323_v2 = vmul.f32 %v2259_v58, %v4732_v36  ;;  %v4895_v58 = vpop.f32.mrb[31].mxu1 }
 0x2c4   : > { %6091 = vst [vmem:[#allocation44_spill] sm:$0xff] %v4861_v55  ;;  %v3352_v61 = vpop.eup %3351  ;;  %v4870_v57 = vmul.f32 %v2706_v0, %v1106_v49  ;;  %v1108_v24 = vmul.f32 0.5, %v4678_v56  ;;  %v4877_v23 = vmul.f32 0.5, %v4687_v29  ;;  %v1811_v20 = vmul.f32 %v4819_v10, %v1747_v30  ;;  %v4891_v29 = vpop.permute.xlu1 %675  ;;  %6094 = vst [vmem:[#allocation45_spill] sm:$0xff] %v4895_v58 }
 0x2c5   : > { %v4873_v35 = vpop.eup %3353  ;;  %v2516_v54 = vmul.f32 %v3352_v61, %v2196_v28  ;;  %v2191_v51 = vmul.f32 %v4713_v37, %v2127_v62  ;;  %v1686_v49 = vmul.f32 1.0614054, %v4858_v46  ;;  %v1495_v33 = vadd.f32 1.0, %v1431_v7 }
 0x2c6   : > { %6093 = vst [vmem:[#allocation21_spill] sm:$0xff] %v4870_v57  ;;  %v1300_v36 = vsel %vm1236_vm14, 1.0, %v6045_v17  ;;  %vm1235_vm15 = vcmp.ge.f32.partialorder %v4700_v47, 0.0  ;;  %v4889_v56 = vmul.f32 0.70710677, %v4867_v12  ;;  %v2704_v34 = vadd.f32 1.0, %v2640_v19 }
 0x2c7   : > { %v2580_v5 = vsub.f32 1.0, %v2516_v54  ;;  %v2193_v37 = vmul.f32 %v4726_v18, %v2129_v31  ;;  %v2416_v14 = vmul.f32 1.442695, %v2323_v2  ;;  %v1685_v60 = vmul.f32 1.0614054, %v4873_v35 }
 0x2c8   : > { %v1875_v30 = vadd.f32 1.4214138, %v1811_v20  ;;  %v4900_v62 = vand.u32 2147483647, %v4889_v56  ;;  %v4904_v0 = vadd.f32 %v4241_v25, %v4891_v29  ;;  %v2511_v28 = vmul.f32 %v3348_v52, %v2191_v51 }
 0x2c9   : > { %v4897_v42 = vpop.eup %3355  ;;  %v2644_v26 = vmul.f32 %v2580_v5, %v1300_v36  ;;  %v2261_v7 = vsub.f32 0.0, %v4783_v1  ;;  %v1750_v18 = vadd.f32 -1.4531521, %v1686_v49  ;;  %3359 = vrcp.f32 %v1495_v33 }
 0x2ca   : > { %v3358_v50 = vpop.eup %3357  ;;  %vm1237_vm0 = vcmp.ge.f32.partialorder %v4762_v16, 0.0  ;;  %v1688_v19 = vmul.f32 1.0614054, %v4897_v42  ;;  %v1433_v31 = vmul.f32 0.3275911, %v4900_v62  ;;  %v4911_v2 = vmul.f32 %v2704_v34, %v4703_v11  ;;  %v4934_v34 = vpop.f32.mrb[32].mxu0 }
 0x2cb   : > { %v2708_v61 = vadd.f32 1.0, %v2644_v26  ;;  %v4916_v25 = vsel %vm1235_vm15, 1.0, %v6045_v17  ;;  %v4919_v52 = vmul.f32 0.5, %v4740_v32  ;;  %v1749_v54 = vadd.f32 -1.4531521, %v1685_v60  ;;  %6097 = vst [vmem:[#allocation48_spill] sm:$0xff] %v4934_v34 }
 0x2cc   : > { %6095 = vst [vmem:[#allocation46_spill] sm:$0xff] %v4911_v2  ;;  %v2513_v20 = vmul.f32 %v3358_v50, %v2193_v37  ;;  %v1939_v16 = vmul.f32 %v4819_v10, %v1875_v30  ;;  %v4925_v49 = vmul.f32 0.70710677, %v4904_v0  ;;  %v2575_v33 = vsub.f32 1.0, %v2511_v28 }
 0x2cd   : > { %v4921_v51 = vmul.f32 %v2708_v61, %v1108_v24  ;;  %v4928_v11 = vsel %vm1237_vm0, 1.0, %v6045_v17  ;;  %v2325_v47 = vmul.f32 %v2261_v7, %v4783_v1  ;;  %v1814_v36 = vmul.f32 %v4858_v46, %v1750_v18 }
 0x2ce   : > { %3361 = vpow2.f32 %v2416_v14  ;;  %v1752_v5 = vadd.f32 -1.4531521, %v1688_v19  ;;  %v1497_v24 = vadd.f32 1.0, %v1433_v31  ;;  %v1813_v37 = vmul.f32 %v4873_v35, %v1749_v54  ;;  %v6098_v14 = vld [vmem:[#allocation24_spill] sm:$0xff] }
 0x2cf   : > { %6096 = vst [vmem:[#allocation47_spill] sm:$0xff] %v4921_v51  ;;  %v4938_v60 = vmul.f32 0.5, %v4772_v21  ;;  %vm1238_vm1 = vcmp.ge.f32.partialorder %v4788_v59, 0.0  ;;  %v2262_v26 = vsub.f32 0.0, %v4797_v3  ;;  %v2577_v1 = vsub.f32 1.0, %v2513_v20 }
 0x2d0   : > { %v2003_v30 = vadd.f32 -0.28449672, %v1939_v16  ;;  %v4943_v28 = vand.u32 2147483647, %v4925_v49  ;;  %v4947_v7 = vadd.f32 %v6098_v14, %v4891_v29  ;;  %v2639_v18 = vmul.f32 %v2575_v33, %v4749_v40 }
 0x2d1   : > { %v2420_v50 = vmul.f32 1.442695, %v2325_v47  ;;  %v1878_v61 = vadd.f32 1.4214138, %v1814_v36  ;;  %v2264_v21 = vsub.f32 0.0, %v4822_v41  ;;  %v1816_v19 = vmul.f32 %v4897_v42, %v1752_v5  ;;  %v4967_v47 = vpop.f32.mrb[32].mxu1 }
 0x2d2   : > { %3363 = vrcp.f32 %v1497_v24  ;;  %v1434_v31 = vmul.f32 0.3275911, %v4943_v28  ;;  %v4954_v54 = vmul.f32 0.70710677, %v4947_v7  ;;  %v1877_v16 = vadd.f32 1.4214138, %v1813_v37 }
 0x2d3   : > { %v4956_v20 = vpop.eup %3359  ;;  %v4961_v14 = vsel %vm1238_vm1, 1.0, %v6045_v17  ;;  %v2326_v40 = vmul.f32 %v2262_v26, %v4797_v3  ;;  %v4965_v33 = vmul.f32 0.5, %v4804_v6  ;;  %6099 = vst [vmem:[#allocation24_spill] sm:$0xff] %v4967_v47  ;;  %v2641_v36 = vmul.f32 %v2577_v1, %v4780_v45 }
 0x2d4   : > { %v2067_v5 = vmul.f32 %v4819_v10, %v2003_v30  ;;  %v1498_v24 = vadd.f32 1.0, %v1434_v31  ;;  %v4972_v32 = vand.u32 2147483647, %v4954_v54  ;;  %v2703_v37 = vadd.f32 1.0, %v2639_v18 }
 0x2d5   : > { %3365 = vpow2.f32 %v2420_v50  ;;  %v1942_v59 = vmul.f32 %v4858_v46, %v1878_v61  ;;  %v2328_v27 = vmul.f32 %v2264_v21, %v4822_v41  ;;  %v1880_v3 = vadd.f32 1.4214138, %v1816_v19  ;;  %v6100_v61 = vld [vmem:[#allocation25_spill] sm:$0xff] }
 0x2d6   : > { %v1687_v6 = vmul.f32 1.0614054, %v4956_v20  ;;  %3367 = vrcp.f32 %v1498_v24  ;;  %v1436_v26 = vmul.f32 0.3275911, %v4972_v32  ;;  %v1941_v45 = vmul.f32 %v4873_v35, %v1877_v16  ;;  %v4989_v16 = vpop.f32.mrb[33].mxu0 }
 0x2d7   : > { %v2422_v1 = vmul.f32 1.442695, %v2326_v40  ;;  %vm1240_vm2 = vcmp.ge.f32.partialorder %v4814_v8, 0.0  ;;  %v2263_v30 = vsub.f32 0.0, %v4850_v39  ;;  %v2705_v18 = vadd.f32 1.0, %v2641_v36  ;;  %6102 = vst [vmem:[#allocation49_spill] sm:$0xff] %v4989_v16 }
 0x2d8   : > { %v3362_v31 = vpop.eup %3361  ;;  %v2131_v50 = vadd.f32 0.2548296, %v2067_v5  ;;  %v1500_v2 = vadd.f32 1.0, %v1436_v26  ;;  %v4983_v41 = vadd.f32 %v6100_v61, %v4891_v29  ;;  %v4986_v21 = vmul.f32 %v2703_v37, %v4706_v53 }
 0x2d9   : > { %v2006_v19 = vadd.f32 -0.28449672, %v1942_v59  ;;  %v2426_v24 = vmul.f32 1.442695, %v2328_v27  ;;  %vm1239_vm3 = vcmp.ge.f32.partialorder %v4837_v38, 0.0  ;;  %v1944_v40 = vmul.f32 %v4897_v42, %v1880_v3 }
 0x2da   : > { %6101 = vst [vmem:[#allocation25_spill] sm:$0xff] %v4986_v21  ;;  %v1751_v51 = vadd.f32 -1.4531521, %v1687_v6  ;;  %3369 = vrcp.f32 %v1500_v2  ;;  %v4993_v36 = vmul.f32 0.70710677, %v4983_v41  ;;  %v4998_v53 = vsel %vm1240_vm2, 1.0, %v6045_v17 }
 0x2db   : > { %v2005_v5 = vadd.f32 -0.28449672, %v1941_v45  ;;  %3371 = vpow2.f32 %v2422_v1  ;;  %v2327_v27 = vmul.f32 %v2263_v30, %v4850_v39  ;;  %v2195_v59 = vmul.f32 %v4819_v10, %v2131_v50  ;;  %v6103_v6 = vld [vmem:[#allocation28_spill] sm:$0xff]  ;;  %v5023_v39 = vpop.f32.mrb[33].mxu1 }
 0x2dc   : > { %v5001_v37 = vpop.eup %3363  ;;  %v2266_v3 = vsub.f32 0.0, %v4943_v28  ;;  %v5006_v2 = vand.u32 2147483647, %v4993_v36  ;;  %v5010_v26 = vadd.f32 %v6103_v6, %v4891_v29  ;;  %v5013_v45 = vmul.f32 %v2705_v18, %v4756_v15  ;;  %6105 = vst [vmem:[#allocation50_spill] sm:$0xff] %v5023_v39 }
 0x2dd   : > { %3373 = vpow2.f32 %v2426_v24  ;;  %v5016_v8 = vmul.f32 0.5, %v4826_v9  ;;  %v5021_v10 = vsel %vm1239_vm3, 1.0, %v6045_v17  ;;  %v2070_v1 = vmul.f32 %v4858_v46, %v2006_v19 }
 0x2de   : > { %6104 = vst [vmem:[#allocation28_spill] sm:$0xff] %v5013_v45  ;;  %v2008_v30 = vadd.f32 -0.28449672, %v1944_v40  ;;  %v1815_v29 = vmul.f32 %v4956_v20, %v1751_v51  ;;  %v1435_v50 = vmul.f32 0.3275911, %v5006_v2  ;;  %v2069_v18 = vmul.f32 %v4873_v35, %v2005_v5  ;;  %v5040_v40 = vpop.permute.xlu0 %680 }
 0x2df   : > { %v3366_v15 = vpop.eup %3365  ;;  %v2424_v61 = vmul.f32 1.442695, %v2327_v27  ;;  %v5030_v9 = vmul.f32 0.5, %v4867_v12  ;;  %v1689_v38 = vmul.f32 1.0614054, %v5001_v37  ;;  %v2515_v6 = vmul.f32 %v3362_v31, %v2195_v59 }
 0x2e0   : > { %v5033_v24 = vpop.eup %3367  ;;  %v2330_v55 = vmul.f32 %v2266_v3, %v4943_v28  ;;  %v2268_v19 = vsub.f32 0.0, %v4972_v32  ;;  %v5038_v51 = vmul.f32 0.70710677, %v5010_v26  ;;  %vm1241_vm4 = vcmp.ge.f32.partialorder %v4889_v56, 0.0  ;;  %v6106_v28 = vld [vmem:[#allocation5_spill] sm:$0xff] }
 0x2e1   : > { %v5044_v5 = vmul.f32 0.5, %v4904_v0  ;;  %v1690_v12 = vmul.f32 1.0614054, %v5033_v24  ;;  %v1499_v27 = vadd.f32 1.0, %v1435_v50  ;;  %v2134_v57 = vadd.f32 0.2548296, %v2070_v1 }
 0x2e2   : > { %v2072_v31 = vmul.f32 %v4897_v42, %v2008_v30  ;;  %v1879_v59 = vadd.f32 1.4214138, %v1815_v29  ;;  %v5050_v3 = vadd.f32 %v6106_v28, %v5040_v40  ;;  %v2133_v45 = vadd.f32 0.2548296, %v2069_v18 }
 0x2e3   : > { %3375 = vpow2.f32 %v2424_v61  ;;  %v1753_v21 = vadd.f32 -1.4531521, %v1689_v38  ;;  %v1754_v22 = vadd.f32 -1.4531521, %v1690_v12  ;;  %v2579_v39 = vsub.f32 1.0, %v2515_v6 }
 0x2e4   : > { %v5052_v48 = vpop.eup %3369  ;;  %v2430_v0 = vmul.f32 1.442695, %v2330_v55  ;;  %v2332_v16 = vmul.f32 %v2268_v19, %v4972_v32  ;;  %v5056_v50 = vand.u32 2147483647, %v5038_v51  ;;  %v5061_v30 = vsel %vm1241_vm4, 1.0, %v6045_v17 }
 0x2e5   : > { %v3372_v1 = vpop.eup %3371  ;;  %v1818_v29 = vmul.f32 %v5033_v24, %v1754_v22  ;;  %v1692_v18 = vmul.f32 1.0614054, %v5052_v48  ;;  %3377 = vrcp.f32 %v1499_v27  ;;  %v2198_v61 = vmul.f32 %v4858_v46, %v2134_v57 }
 0x2e6   : > { %v2136_v38 = vadd.f32 0.2548296, %v2072_v31  ;;  %v1943_v55 = vmul.f32 %v4956_v20, %v1879_v59  ;;  %v5068_v32 = vmul.f32 0.70710677, %v5050_v3  ;;  %v2197_v19 = vmul.f32 %v4873_v35, %v2133_v45 }
 0x2e7   : > { %v3374_v6 = vpop.eup %3373  ;;  %v1817_v56 = vmul.f32 %v5001_v37, %v1753_v21  ;;  %v1882_v12 = vadd.f32 1.4214138, %v1818_v29  ;;  %v1756_v28 = vadd.f32 -1.4531521, %v1692_v18  ;;  %3379 = vpow2.f32 %v2430_v0 }
 0x2e8   : > { %v2434_v22 = vmul.f32 1.442695, %v2332_v16  ;;  %v1437_v47 = vmul.f32 0.3275911, %v5056_v50  ;;  %v5074_v27 = vand.u32 2147483647, %v5068_v32  ;;  %v2643_v46 = vmul.f32 %v2579_v39, %v4916_v25 }
 0x2e9   : > { %v2265_v57 = vsub.f32 0.0, %v4900_v62  ;;  %v1946_v31 = vmul.f32 %v5033_v24, %v1882_v12  ;;  %v1820_v59 = vmul.f32 %v5052_v48, %v1756_v28  ;;  %v2518_v35 = vmul.f32 %v3372_v1, %v2198_v61  ;;  %v6107_v25 = vld [vmem:[#allocation6_spill] sm:$0xff] }
 0x2ea   : > { %v2200_v21 = vmul.f32 %v4897_v42, %v2136_v38  ;;  %v2007_v45 = vadd.f32 -0.28449672, %v1943_v55  ;;  %v1438_v0 = vmul.f32 0.3275911, %v5074_v27  ;;  %v2517_v16 = vmul.f32 %v3366_v15, %v2197_v19 }
 0x2eb   : > { %v1881_v29 = vadd.f32 1.4214138, %v1817_v56  ;;  %v2010_v18 = vadd.f32 -0.28449672, %v1946_v31  ;;  %v1884_v34 = vadd.f32 1.4214138, %v1820_v59  ;;  %3381 = vpow2.f32 %v2434_v22 }
 0x2ec   : > { %v1501_v58 = vadd.f32 1.0, %v1437_v47  ;;  %v1502_v63 = vadd.f32 1.0, %v1438_v0  ;;  %v5084_v39 = vadd.f32 %v6107_v25, %v5040_v40  ;;  %v2707_v28 = vadd.f32 1.0, %v2643_v46  ;;  %v6108_v46 = vld [vmem:[#allocation8_spill] sm:$0xff] }
 0x2ed   : > { %v5086_v12 = vpop.eup %3375  ;;  %v2329_v1 = vmul.f32 %v2265_v57, %v4900_v62  ;;  %v2074_v42 = vmul.f32 %v5033_v24, %v2010_v18  ;;  %v1948_v61 = vmul.f32 %v5052_v48, %v1884_v34  ;;  %v2582_v15 = vsub.f32 1.0, %v2518_v35 }
 0x2ee   : > { %v2520_v38 = vmul.f32 %v3374_v6, %v2200_v21  ;;  %3383 = vrcp.f32 %v1502_v63  ;;  %v5092_v55 = vmul.f32 0.70710677, %v5084_v39  ;;  %v1945_v19 = vmul.f32 %v5001_v37, %v1881_v29  ;;  %v5105_v63 = vpop.f32.mrb[34].mxu0  ;;  %v5107_v6 = vpop.f32.mrb[34].mxu1 }
 0x2ef   : > { %v5094_v47 = vpop.eup %3377  ;;  %v2138_v56 = vadd.f32 0.2548296, %v2074_v42  ;;  %v2012_v22 = vadd.f32 -0.28449672, %v1948_v61  ;;  %v5099_v31 = vadd.f32 %v6108_v46, %v5040_v40  ;;  %v2581_v62 = vsub.f32 1.0, %v2517_v16 }
 0x2f0   : > { %v2071_v57 = vmul.f32 %v4956_v20, %v2007_v45  ;;  %3385 = vrcp.f32 %v1501_v58  ;;  %v5103_v34 = vand.u32 2147483647, %v5092_v55  ;;  %v2428_v59 = vmul.f32 1.442695, %v2329_v1 }
 0x2f1   : > { %vm1242_vm5 = vcmp.ge.f32.partialorder %v4925_v49, 0.0  ;;  %v2202_v35 = vmul.f32 %v5033_v24, %v2138_v56  ;;  %v2076_v21 = vmul.f32 %v5052_v48, %v2012_v22  ;;  %v3380_v0 = vpop.eup %3379  ;;  %v2646_v16 = vmul.f32 %v2582_v15, %v4961_v14 }
 0x2f2   : > { %v2584_v29 = vsub.f32 1.0, %v2520_v38  ;;  %v1691_v58 = vmul.f32 1.0614054, %v5094_v47  ;;  %v1440_v45 = vmul.f32 0.3275911, %v5103_v34  ;;  %v5119_v1 = vmul.f32 %v2707_v28, %v4877_v23 }
 0x2f3   : > { %v2009_v18 = vadd.f32 -0.28449672, %v1945_v19  ;;  %v2522_v25 = vmul.f32 %v3380_v0, %v2202_v35  ;;  %v2140_v42 = vadd.f32 0.2548296, %v2076_v21  ;;  %v5116_v61 = vmul.f32 0.70710677, %v5099_v31 }
 0x2f4   : > { %6109 = vst [vmem:[#allocation5_spill] sm:$0xff] %v5119_v1  ;;  %v2645_v24 = vmul.f32 %v2581_v62, %v4928_v11  ;;  %v2135_v56 = vadd.f32 0.2548296, %v2071_v57  ;;  %v1504_v22 = vadd.f32 1.0, %v1440_v45  ;;  %v1306_v14 = vsel %vm1242_vm5, 1.0, %v6045_v17 }
 0x2f5   : > { %v2586_v15 = vsub.f32 1.0, %v2522_v25  ;;  %vm1244_vm6 = vcmp.ge.f32.partialorder %v4954_v54, 0.0  ;;  %v2204_v38 = vmul.f32 %v5052_v48, %v2140_v42  ;;  %v3382_v19 = vpop.eup %3381  ;;  %v2710_v46 = vadd.f32 1.0, %v2646_v16  ;;  %v6110_v48 = vld [vmem:[#allocation9_spill] sm:$0xff] }
 0x2f6   : > { %v2648_v35 = vmul.f32 %v2584_v29, %v4998_v53  ;;  %v1755_v21 = vadd.f32 -1.4531521, %v1691_v58  ;;  %3387 = vrcp.f32 %v1504_v22  ;;  %v2073_v23 = vmul.f32 %v5001_v37, %v2009_v18  ;;  %v5143_v18 = vpop.f32.mrb[35].mxu0 }
 0x2f7   : > { %v2650_v11 = vmul.f32 %v2586_v15, %v1306_v14  ;;  %v2524_v28 = vmul.f32 %v3382_v19, %v2204_v38  ;;  %v5130_v62 = vand.u32 2147483647, %v5116_v61  ;;  %v2709_v57 = vadd.f32 1.0, %v2645_v24 }
 0x2f8   : > { %v5132_v49 = vpop.eup %3383  ;;  %v2199_v0 = vmul.f32 %v4956_v20, %v2135_v56  ;;  %3389 = vpow2.f32 %v2428_v59  ;;  %v5137_v16 = vadd.f32 %v6110_v48, %v5040_v40  ;;  %v1308_v29 = vsel %vm1244_vm6, 1.0, %v6045_v17 }
 0x2f9   : > { %v2714_v53 = vadd.f32 1.0, %v2650_v11  ;;  %v2588_v58 = vsub.f32 1.0, %v2524_v28  ;;  %v1694_v45 = vmul.f32 1.0614054, %v5132_v49  ;;  %v5148_v42 = vmul.f32 %v2710_v46, %v4938_v60 }
 0x2fa   : > { %v5145_v25 = vpop.eup %3385  ;;  %v2712_v20 = vadd.f32 1.0, %v2648_v35  ;;  %v1819_v59 = vmul.f32 %v5094_v47, %v1755_v21  ;;  %v2267_v40 = vsub.f32 0.0, %v5006_v2  ;;  %v2137_v24 = vadd.f32 0.2548296, %v2073_v23  ;;  %v5167_v21 = vpop.f32.mrb[35].mxu1 }
 0x2fb   : > { %6111 = vst [vmem:[#allocation6_spill] sm:$0xff] %v5148_v42  ;;  %v5153_v56 = vmul.f32 %v2714_v53, %v5044_v5  ;;  %v2652_v54 = vmul.f32 %v2588_v58, %v1308_v29  ;;  %v1439_v22 = vmul.f32 0.3275911, %v5130_v62  ;;  %v5157_v14 = vmul.f32 %v2709_v57, %v4919_v52 }
 0x2fc   : > { %v2519_v15 = vmul.f32 %v5086_v12, %v2199_v0  ;;  %v1116_v60 = vmul.f32 0.5, %v4947_v7  ;;  %v5162_v38 = vmul.f32 0.70710677, %v5137_v16  ;;  %v1693_v5 = vmul.f32 1.0614054, %v5145_v25  ;;  %v5174_v7 = vpop.permute.xlu1 %685 }
 0x2fd   : > { %6112 = vst [vmem:[#allocation8_spill] sm:$0xff] %v5153_v56  ;;  %6113 = vst [vmem:[#allocation9_spill] sm:$0xff] %v5157_v14  ;;  %v2716_v46 = vadd.f32 1.0, %v2652_v54  ;;  %v1758_v35 = vadd.f32 -1.4531521, %v1694_v45  ;;  %v2331_v52 = vmul.f32 %v2267_v40, %v5006_v2  ;;  %v2269_v11 = vsub.f32 0.0, %v5056_v50 }
 0x2fe   : > { %v1883_v23 = vadd.f32 1.4214138, %v1819_v59  ;;  %v5172_v12 = vand.u32 2147483647, %v5162_v38  ;;  %v5177_v28 = vmul.f32 %v2712_v20, %v4965_v33  ;;  %v2201_v57 = vmul.f32 %v5001_v37, %v2137_v24 }
 0x2ff   : > { %v5180_v0 = vmul.f32 %v2716_v46, %v1116_v60  ;;  %v1503_v48 = vadd.f32 1.0, %v1439_v22  ;;  %v2583_v29 = vsub.f32 1.0, %v2519_v15  ;;  %v5185_v2 = vmul.f32 0.5, %v4983_v41 }
 0x300   : > { %6114 = vst [vmem:[#allocation51_spill] sm:$0xff] %v5177_v28  ;;  %v5182_v53 = vpop.eup %3387  ;;  %vm1243_vm7 = vcmp.ge.f32.partialorder %v4993_v36, 0.0  ;;  %v5190_v58 = vadd.f32 %v4517_v43, %v5174_v7  ;;  %v1757_v45 = vadd.f32 -1.4531521, %v1693_v5  ;;  %v1822_v37 = vmul.f32 %v5132_v49, %v1758_v35 }
 0x301   : > { %6115 = vst [vmem:[#allocation52_spill] sm:$0xff] %v5180_v0  ;;  %v1441_v20 = vmul.f32 0.3275911, %v5172_v12  ;;  %v1947_v40 = vmul.f32 %v5094_v47, %v1883_v23  ;;  %v2432_v24 = vmul.f32 1.442695, %v2331_v52  ;;  %vm1245_vm8 = vcmp.ge.f32.partialorder %v5038_v51, 0.0 }
 0x302   : > { %v3390_v59 = vpop.eup %3389  ;;  %v2333_v41 = vmul.f32 %v2269_v11, %v5056_v50  ;;  %v1696_v43 = vmul.f32 1.0614054, %v5182_v53  ;;  %3391 = vrcp.f32 %v1503_v48  ;;  %v5201_v22 = vmul.f32 0.70710677, %v5190_v58 }
 0x303   : > { %v2521_v54 = vmul.f32 %v3390_v59, %v2201_v57  ;;  %v2647_v15 = vmul.f32 %v2583_v29, %v5021_v10  ;;  %v5207_v60 = vsel %vm1243_vm7, 1.0, %v6045_v17  ;;  %v5210_v46 = vmul.f32 0.5, %v5010_v26 }
 0x304   : > { %v2270_v5 = vsub.f32 0.0, %v5074_v27  ;;  %v1821_v50 = vmul.f32 %v5145_v25, %v1757_v45  ;;  %v1886_v35 = vadd.f32 1.4214138, %v1822_v37  ;;  %v1505_v23 = vadd.f32 1.0, %v1441_v20 }
 0x305   : > { %v5216_v52 = vadd.f32 %v4543_v4, %v5174_v7  ;;  %v2011_v11 = vadd.f32 -0.28449672, %v1947_v40  ;;  %3393 = vpow2.f32 %v2432_v24  ;;  %v5221_v36 = vsel %vm1245_vm8, 1.0, %v6045_v17 }
 0x306   : > { %v5224_v26 = vand.u32 2147483647, %v5201_v22  ;;  %v2585_v10 = vsub.f32 1.0, %v2521_v54  ;;  %v2436_v57 = vmul.f32 1.442695, %v2333_v41  ;;  %v2272_v29 = vsub.f32 0.0, %v5103_v34 }
 0x307   : > { %v1760_v48 = vadd.f32 -1.4531521, %v1696_v43  ;;  %v2711_v45 = vadd.f32 1.0, %v2647_v15  ;;  %vm1246_vm9 = vcmp.ge.f32.partialorder %v5068_v32, 0.0  ;;  %v2334_v4 = vmul.f32 %v2270_v5, %v5074_v27 }
 0x308   : > { %v1442_v37 = vmul.f32 0.3275911, %v5224_v26  ;;  %v1885_v20 = vadd.f32 1.4214138, %v1821_v50  ;;  %v1950_v51 = vmul.f32 %v5132_v49, %v1886_v35  ;;  %3395 = vrcp.f32 %v1505_v23 }
 0x309   : > { %v5232_v59 = vmul.f32 0.70710677, %v5216_v52  ;;  %v2075_v40 = vmul.f32 %v5094_v47, %v2011_v11  ;;  %v5236_v24 = vmul.f32 0.5, %v5050_v3  ;;  %v5240_v54 = vadd.f32 %v4582_v44, %v5174_v7 }
 0x30a   : > { %v1506_v41 = vadd.f32 1.0, %v1442_v37  ;;  %v2649_v27 = vmul.f32 %v2585_v10, %v5061_v30  ;;  %3397 = vpow2.f32 %v2436_v57  ;;  %v1824_v43 = vmul.f32 %v5182_v53, %v1760_v48 }
 0x30b   : > { %v2336_v15 = vmul.f32 %v2272_v29, %v5103_v34  ;;  %v5246_v5 = vmul.f32 %v2711_v45, %v5016_v8  ;;  %v5251_v3 = vsel %vm1246_vm9, 1.0, %v6045_v17  ;;  %v2438_v50 = vmul.f32 1.442695, %v2334_v4 }
 0x30c   : > { %3399 = vrcp.f32 %v1506_v41  ;;  %v5253_v35 = vpop.eup %3391  ;;  %v1949_v44 = vmul.f32 %v5145_v25, %v1885_v20  ;;  %v2014_v30 = vadd.f32 -0.28449672, %v1950_v51  ;;  %v5257_v23 = vmul.f32 0.5, %v5084_v39 }
 0x30d   : > { %6116 = vst [vmem:[#allocation53_spill] sm:$0xff] %v5246_v5  ;;  %v5260_v34 = vand.u32 2147483647, %v5232_v59  ;;  %v2139_v8 = vadd.f32 0.2548296, %v2075_v40  ;;  %vm1248_vm10 = vcmp.ge.f32.partialorder %v5092_v55, 0.0  ;;  %3401 = vpow2.f32 %v2438_v50 }
 0x30e   : > { %v2271_v32 = vsub.f32 0.0, %v5130_v62  ;;  %v5265_v11 = vmul.f32 0.70710677, %v5240_v54  ;;  %v2713_v10 = vadd.f32 1.0, %v2649_v27  ;;  %v1888_v57 = vadd.f32 1.4214138, %v1824_v43 }
 0x30f   : > { %v2442_v48 = vmul.f32 1.442695, %v2336_v15  ;;  %v5268_v29 = vmul.f32 0.5, %v5099_v31  ;;  %v3394_v45 = vpop.eup %3393  ;;  %v1695_v39 = vmul.f32 1.0614054, %v5253_v35  ;;  %v2078_v20 = vmul.f32 %v5132_v49, %v2014_v30 }
 0x310   : > { %v1444_v4 = vmul.f32 0.3275911, %v5260_v34  ;;  %v5273_v37 = vand.u32 2147483647, %v5265_v11  ;;  %v2013_v55 = vadd.f32 -0.28449672, %v1949_v44  ;;  %v2203_v31 = vmul.f32 %v5094_v47, %v2139_v8 }
 0x311   : > { %v5277_v51 = vsel %vm1248_vm10, 1.0, %v6045_v17  ;;  %vm1247_vm11 = vcmp.ge.f32.partialorder %v5116_v61, 0.0  ;;  %v2335_v40 = vmul.f32 %v2271_v32, %v5130_v62  ;;  %v2274_v41 = vsub.f32 0.0, %v5224_v26 }
 0x312   : > { %v1508_v27 = vadd.f32 1.0, %v1444_v4  ;;  %v5283_v43 = vpop.eup %3395  ;;  %v5286_v15 = vmul.f32 %v2713_v10, %v5030_v9  ;;  %v1952_v50 = vmul.f32 %v5182_v53, %v1888_v57  ;;  %3403 = vpow2.f32 %v2442_v48  ;;  %v6118_v9 = vld [vmem:[#allocation12_spill] sm:$0xff] }
 0x313   : > { %v1443_v44 = vmul.f32 0.3275911, %v5273_v37  ;;  %v5291_v30 = vsel %vm1247_vm11, 1.0, %v6045_v17  ;;  %v1759_v61 = vadd.f32 -1.4531521, %v1695_v39  ;;  %vm1249_vm12 = vcmp.ge.f32.partialorder %v5162_v38, 0.0 }
 0x314   : > { %6117 = vst [vmem:[#allocation54_spill] sm:$0xff] %v5286_v15  ;;  %3405 = vrcp.f32 %v1508_v27  ;;  %v3398_v47 = vpop.eup %3397  ;;  %v2077_v62 = vmul.f32 %v5145_v25, %v2013_v55  ;;  %v2142_v8 = vadd.f32 0.2548296, %v2078_v20  ;;  %v5296_v32 = vmul.f32 0.5, %v5137_v16  ;;  %v5306_v27 = vpop.permute.xlu0 %690 }
 0x315   : > { %v5300_v10 = vadd.f32 %v6118_v9, %v5174_v7  ;;  %v2523_v48 = vmul.f32 %v3394_v45, %v2203_v31  ;;  %v2440_v4 = vmul.f32 1.442695, %v2335_v40  ;;  %v1697_v39 = vmul.f32 1.0614054, %v5283_v43  ;;  %v6119_v31 = vld [vmem:[#allocation36_spill] sm:$0xff] }
 0x316   : > { %v5302_v57 = vpop.eup %3399  ;;  %v2338_v38 = vmul.f32 %v2274_v41, %v5224_v26  ;;  %v2016_v33 = vadd.f32 -0.28449672, %v1952_v50  ;;  %v5309_v55 = vsel %vm1249_vm12, 1.0, %v6045_v17  ;;  %v1507_v20 = vadd.f32 1.0, %v1443_v44 }
 0x317   : > { %v1698_v16 = vmul.f32 1.0614054, %v5302_v57  ;;  %v1823_v7 = vmul.f32 %v5253_v35, %v1759_v61  ;;  %v2273_v9 = vsub.f32 0.0, %v5172_v12  ;;  %v5315_v45 = vmul.f32 0.70710677, %v5300_v10  ;;  %v3402_v28 = vpop.eup %3401 }
 0x318   : > { %v5319_v40 = vadd.f32 %v6119_v31, %v5306_v27  ;;  %v2141_v26 = vadd.f32 0.2548296, %v2077_v62  ;;  %v2206_v41 = vmul.f32 %v5132_v49, %v2142_v8  ;;  %v2276_v19 = vsub.f32 0.0, %v5260_v34 }
 0x319   : > { %v1762_v50 = vadd.f32 -1.4531521, %v1698_v16  ;;  %3407 = vpow2.f32 %v2440_v4  ;;  %v1761_v44 = vadd.f32 -1.4531521, %v1697_v39  ;;  %v2446_v0 = vmul.f32 1.442695, %v2338_v38 }
 0x31a   : > { %v5324_v61 = vand.u32 2147483647, %v5315_v45  ;;  %v2587_v42 = vsub.f32 1.0, %v2523_v48  ;;  %v2080_v56 = vmul.f32 %v5182_v53, %v2016_v33  ;;  %3409 = vrcp.f32 %v1507_v20 }
 0x31b   : > { %v1826_v15 = vmul.f32 %v5302_v57, %v1762_v50  ;;  %v1887_v31 = vadd.f32 1.4214138, %v1823_v7  ;;  %v2337_v62 = vmul.f32 %v2273_v9, %v5172_v12  ;;  %v5331_v8 = vmul.f32 0.70710677, %v5319_v40  ;;  %v6120_v12 = vld [vmem:[#allocation37_spill] sm:$0xff] }
 0x31c   : > { %v1445_v49 = vmul.f32 0.3275911, %v5324_v61  ;;  %v3404_v4 = vpop.eup %3403  ;;  %v2205_v39 = vmul.f32 %v5145_v25, %v2141_v26  ;;  %v2526_v38 = vmul.f32 %v3402_v28, %v2206_v41  ;;  %v2340_v48 = vmul.f32 %v2276_v19, %v5260_v34 }
 0x31d   : > { %v1890_v16 = vadd.f32 1.4214138, %v1826_v15  ;;  %v1825_v33 = vmul.f32 %v5283_v43, %v1761_v44  ;;  %3411 = vpow2.f32 %v2446_v0  ;;  %v5339_v20 = vand.u32 2147483647, %v5331_v8 }
 0x31e   : > { %v5335_v5 = vpop.eup %3405  ;;  %v5343_v7 = vadd.f32 %v6120_v12, %v5306_v27  ;;  %v2144_v9 = vadd.f32 0.2548296, %v2080_v56  ;;  %v1509_v28 = vadd.f32 1.0, %v1445_v49  ;;  %v2651_v19 = vmul.f32 %v2587_v42, %v5207_v60 }
 0x31f   : > { %v1954_v50 = vmul.f32 %v5302_v57, %v1890_v16  ;;  %v1700_v25 = vmul.f32 1.0614054, %v5335_v5  ;;  %v1951_v34 = vmul.f32 %v5253_v35, %v1887_v31  ;;  %v5350_v15 = vmul.f32 0.5, %v5190_v58 }
 0x320   : > { %v1446_v0 = vmul.f32 0.3275911, %v5339_v20  ;;  %v2525_v26 = vmul.f32 %v3398_v47, %v2205_v39  ;;  %v2450_v12 = vmul.f32 1.442695, %v2340_v48  ;;  %v2590_v14 = vsub.f32 1.0, %v2526_v38 }
 0x321   : > { %v2018_v41 = vadd.f32 -0.28449672, %v1954_v50  ;;  %v1764_v44 = vadd.f32 -1.4531521, %v1700_v25  ;;  %v1889_v56 = vadd.f32 1.4214138, %v1825_v33  ;;  %v2208_v49 = vmul.f32 %v5182_v53, %v2144_v9 }
 0x322   : > { %v1510_v1 = vadd.f32 1.0, %v1446_v0  ;;  %v5354_v16 = vmul.f32 0.70710677, %v5343_v7  ;;  %3413 = vrcp.f32 %v1509_v28  ;;  %v2015_v31 = vadd.f32 -0.28449672, %v1951_v34 }
 0x323   : > { %v2082_v42 = vmul.f32 %v5302_v57, %v2018_v41  ;;  %v1828_v60 = vmul.f32 %v5335_v5, %v1764_v44  ;;  %v5359_v58 = vpop.eup %3407  ;;  %v2444_v47 = vmul.f32 1.442695, %v2337_v62  ;;  %v2715_v48 = vadd.f32 1.0, %v2651_v19 }
 0x324   : > { %3415 = vrcp.f32 %v1510_v1  ;;  %v5362_v39 = vand.u32 2147483647, %v5354_v16  ;;  %v5364_v38 = vpop.eup %3409  ;;  %vm1250_vm13 = vcmp.ge.f32.partialorder %v5201_v22, 0.0  ;;  %v2589_v9 = vsub.f32 1.0, %v2525_v26  ;;  %v6121_v26 = vld [vmem:[#allocation39_spill] sm:$0xff] }
 0x325   : > { %v2146_v33 = vadd.f32 0.2548296, %v2082_v42  ;;  %v1892_v53 = vadd.f32 1.4214138, %v1828_v60  ;;  %v1953_v50 = vmul.f32 %v5283_v43, %v1889_v56  ;;  %3417 = vpow2.f32 %v2450_v12 }
 0x326   : > { %v1448_v25 = vmul.f32 0.3275911, %v5362_v39  ;;  %v2654_v28 = vmul.f32 %v2590_v14, %v5251_v3  ;;  %v2528_v62 = vmul.f32 %v3404_v4, %v2208_v49  ;;  %v2079_v19 = vmul.f32 %v5253_v35, %v2015_v31 }
 0x327   : > { %v2210_v1 = vmul.f32 %v5302_v57, %v2146_v33  ;;  %v1956_v34 = vmul.f32 %v5335_v5, %v1892_v53  ;;  %v3412_v0 = vpop.eup %3411  ;;  %v1699_v41 = vmul.f32 1.0614054, %v5364_v38  ;;  %v5376_v42 = vadd.f32 %v6121_v26, %v5306_v27 }
 0x328   : > { %v1512_v44 = vadd.f32 1.0, %v1448_v25  ;;  %3419 = vpow2.f32 %v2444_v47  ;;  %v1314_v14 = vsel %vm1250_vm13, 1.0, %v6045_v17  ;;  %v2653_v57 = vmul.f32 %v2589_v9, %v5221_v36 }
 0x329   : > { %v2530_v3 = vmul.f32 %v3412_v0, %v2210_v1  ;;  %v2020_v4 = vadd.f32 -0.28449672, %v1956_v34  ;;  %v2017_v12 = vadd.f32 -0.28449672, %v1953_v50  ;;  %v5383_v56 = vmul.f32 0.70710677, %v5376_v42 }
 0x32a   : > { %3421 = vrcp.f32 %v1512_v44  ;;  %v2718_v49 = vadd.f32 1.0, %v2654_v28  ;;  %vm1252_vm14 = vcmp.ge.f32.partialorder %v5232_v59, 0.0  ;;  %v5388_v47 = vmul.f32 %v2715_v48, %v5185_v2  ;;  %v6123_v1 = vld [vmem:[#allocation41_spill] sm:$0xff] }
 0x32b   : > { %v2594_v60 = vsub.f32 1.0, %v2530_v3  ;;  %v2084_v31 = vmul.f32 %v5335_v5, %v2020_v4  ;;  %v2592_v22 = vsub.f32 1.0, %v2528_v62  ;;  %v2143_v33 = vadd.f32 0.2548296, %v2079_v19 }
 0x32c   : > { %6122 = vst [vmem:[#allocation12_spill] sm:$0xff] %v5388_v47  ;;  %v1763_v53 = vadd.f32 -1.4531521, %v1699_v41  ;;  %v5390_v25 = vpop.eup %3413  ;;  %v1124_v9 = vmul.f32 0.5, %v5216_v52  ;;  %v5395_v28 = vadd.f32 %v6123_v1, %v5306_v27  ;;  %v2717_v59 = vadd.f32 1.0, %v2653_v57  ;;  %v5432_v1 = vpop.permute.xlu1 %695 }
 0x32d   : > { %v2658_v36 = vmul.f32 %v2594_v60, %v1314_v14  ;;  %v2148_v50 = vadd.f32 0.2548296, %v2084_v31  ;;  %v2081_v0 = vmul.f32 %v5283_v43, %v2017_v12  ;;  %v1316_v2 = vsel %vm1252_vm14, 1.0, %v6045_v17 }
 0x32e   : > { %v5397_v34 = vpop.eup %3415  ;;  %v5402_v48 = vand.u32 2147483647, %v5383_v56  ;;  %v5405_v62 = vmul.f32 %v2718_v49, %v5236_v24  ;;  %v2275_v41 = vsub.f32 0.0, %v5273_v37  ;;  %v2656_v44 = vmul.f32 %v2592_v22, %v5277_v51 }
 0x32f   : > { %v2722_v19 = vadd.f32 1.0, %v2658_v36  ;;  %v2212_v52 = vmul.f32 %v5335_v5, %v2148_v50  ;;  %v3418_v27 = vpop.eup %3417  ;;  %v2207_v26 = vmul.f32 %v5253_v35, %v2143_v33  ;;  %v1827_v14 = vmul.f32 %v5364_v38, %v1763_v53 }
 0x330   : > { %6124 = vst [vmem:[#allocation36_spill] sm:$0xff] %v5405_v62  ;;  %v1702_v3 = vmul.f32 1.0614054, %v5397_v34  ;;  %v1701_v24 = vmul.f32 1.0614054, %v5390_v25  ;;  %v5421_v5 = vmul.f32 %v2717_v59, %v5210_v46  ;;  %vm1251_vm15 = vcmp.ge.f32.partialorder %v5265_v11, 0.0 }
 0x331   : > { %v5414_v4 = vmul.f32 %v2722_v19, %v5350_v15  ;;  %v2532_v57 = vmul.f32 %v3418_v27, %v2212_v52  ;;  %v5418_v12 = vmul.f32 0.70710677, %v5395_v28  ;;  %v2145_v49 = vadd.f32 0.2548296, %v2081_v0 }
 0x332   : > { %6126 = vst [vmem:[#allocation39_spill] sm:$0xff] %v5421_v5  ;;  %v1766_v51 = vadd.f32 -1.4531521, %v1702_v3  ;;  %v1447_v35 = vmul.f32 0.3275911, %v5402_v48  ;;  %v3420_v60 = vpop.eup %3419  ;;  %v2339_v15 = vmul.f32 %v2275_v41, %v5273_v37  ;;  %v2720_v53 = vadd.f32 1.0, %v2656_v44 }
 0x333   : > { %6125 = vst [vmem:[#allocation37_spill] sm:$0xff] %v5414_v4  ;;  %v2596_v22 = vsub.f32 1.0, %v2532_v57  ;;  %v2527_v36 = vmul.f32 %v5359_v58, %v2207_v26  ;;  %v1891_v46 = vadd.f32 1.4214138, %v1827_v14  ;;  %v1765_v0 = vadd.f32 -1.4531521, %v1701_v24 }
 0x334   : > { %v5428_v33 = vpop.eup %3421  ;;  %v1830_v50 = vmul.f32 %v5397_v34, %v1766_v51  ;;  %v5436_v52 = vand.u32 2147483647, %v5418_v12  ;;  %v2209_v27 = vmul.f32 %v5283_v43, %v2145_v49  ;;  %v5440_v37 = vmul.f32 0.5, %v5240_v54  ;;  %v6127_v58 = vld [vmem:[#allocation17_spill] sm:$0xff] }
 0x335   : > { %v2660_v59 = vmul.f32 %v2596_v22, %v1316_v2  ;;  %v1704_v19 = vmul.f32 1.0614054, %v5428_v33  ;;  %v1511_v41 = vadd.f32 1.0, %v1447_v35  ;;  %v5444_v44 = vadd.f32 %v6127_v58, %v5432_v1 }
 0x336   : > { %v5449_v2 = vsel %vm1251_vm15, 1.0, %v6045_v17  ;;  %v2448_v14 = vmul.f32 1.442695, %v2339_v15  ;;  %v1894_v3 = vadd.f32 1.4214138, %v1830_v50  ;;  %v5452_v57 = vmul.f32 %v2720_v53, %v5257_v23 }
 0x337   : > { %v2724_v26 = vadd.f32 1.0, %v2660_v59  ;;  %v2591_v43 = vsub.f32 1.0, %v2527_v36  ;;  %v1955_v54 = vmul.f32 %v5364_v38, %v1891_v46  ;;  %v2278_v24 = vsub.f32 0.0, %v5339_v20 }
 0x338   : > { %6128 = vst [vmem:[#allocation41_spill] sm:$0xff] %v5452_v57  ;;  %v1829_v51 = vmul.f32 %v5390_v25, %v1765_v0  ;;  %v1768_v35 = vadd.f32 -1.4531521, %v1704_v19  ;;  %v1449_v22 = vmul.f32 0.3275911, %v5436_v52  ;;  %v2529_v11 = vmul.f32 %v3420_v60, %v2209_v27 }
 0x339   : > { %v5456_v49 = vmul.f32 %v2724_v26, %v1124_v9  ;;  %v5461_v59 = vmul.f32 0.5, %v5300_v10  ;;  %3423 = vrcp.f32 %v1511_v41  ;;  %v5464_v23 = vmul.f32 0.70710677, %v5444_v44 }
 0x33a   : > { %vm1253_vm0 = vcmp.ge.f32.partialorder %v5315_v45, 0.0  ;;  %v2277_v9 = vsub.f32 0.0, %v5324_v61  ;;  %v1958_v53 = vmul.f32 %v5397_v34, %v1894_v3  ;;  %v2019_v36 = vadd.f32 -0.28449672, %v1955_v54 }
 0x33b   : > { %6129 = vst [vmem:[#allocation17_spill] sm:$0xff] %v5456_v49  ;;  %3425 = vpow2.f32 %v2448_v14  ;;  %v2342_v60 = vmul.f32 %v2278_v24, %v5339_v20  ;;  %v5473_v10 = vand.u32 2147483647, %v5464_v23  ;;  %v2655_v46 = vmul.f32 %v2591_v43, %v5291_v30 }
 0x33c   : > { %v1893_v50 = vadd.f32 1.4214138, %v1829_v51  ;;  %v1832_v0 = vmul.f32 %v5428_v33, %v1768_v35  ;;  %v1513_v19 = vadd.f32 1.0, %v1449_v22  ;;  %v2593_v27 = vsub.f32 1.0, %v2529_v11 }
 0x33d   : > { %v5478_v45 = vsel %vm1253_vm0, 1.0, %v6045_v17  ;;  %v5481_v41 = vmul.f32 0.5, %v5319_v40  ;;  %v1450_v58 = vmul.f32 0.3275911, %v5473_v10  ;;  %v2341_v20 = vmul.f32 %v2277_v9, %v5324_v61  ;;  %v6130_v9 = vld [vmem:[#allocation43_spill] sm:$0xff] }
 0x33e   : > { %v2022_v26 = vadd.f32 -0.28449672, %v1958_v53  ;;  %v5486_v14 = vmul.f32 0.5, %v5343_v7  ;;  %v5490_v30 = vadd.f32 %v4828_v13, %v5432_v1  ;;  %v2083_v3 = vmul.f32 %v5364_v38, %v2019_v36 }
 0x33f   : > { %vm1254_vm1 = vcmp.ge.f32.partialorder %v5331_v8, 0.0  ;;  %v2454_v43 = vmul.f32 1.442695, %v2342_v60  ;;  %v1514_v54 = vadd.f32 1.0, %v1450_v58  ;;  %v2719_v40 = vadd.f32 1.0, %v2655_v46 }
 0x340   : > { %v1957_v24 = vmul.f32 %v5390_v25, %v1893_v50  ;;  %v1896_v51 = vadd.f32 1.4214138, %v1832_v0  ;;  %3427 = vrcp.f32 %v1513_v19  ;;  %v2657_v61 = vmul.f32 %v2593_v27, %v5309_v55 }
 0x341   : > { %v2280_v7 = vsub.f32 0.0, %v5362_v39  ;;  %3429 = vrcp.f32 %v1514_v54  ;;  %v5498_v35 = vmul.f32 0.70710677, %v5490_v30  ;;  %v2452_v13 = vmul.f32 1.442695, %v2341_v20 }
 0x342   : > { %v2086_v22 = vmul.f32 %v5397_v34, %v2022_v26  ;;  %v2279_v11 = vsub.f32 0.0, %v5402_v48  ;;  %v5504_v53 = vadd.f32 %v6130_v9, %v5432_v1  ;;  %v2147_v60 = vadd.f32 0.2548296, %v2083_v3 }
 0x343   : > { %v5506_v36 = vpop.eup %3423  ;;  %v5511_v55 = vsel %vm1254_vm1, 1.0, %v6045_v17  ;;  %3431 = vpow2.f32 %v2454_v43  ;;  %v5514_v46 = vand.u32 2147483647, %v5498_v35  ;;  %v5517_v50 = vmul.f32 %v2719_v40, %v5268_v29 }
 0x344   : > { %v2021_v0 = vadd.f32 -0.28449672, %v1957_v24  ;;  %v1960_v19 = vmul.f32 %v5428_v33, %v1896_v51  ;;  %v2281_v27 = vsub.f32 0.0, %v5436_v52  ;;  %v2721_v20 = vadd.f32 1.0, %v2657_v61  ;;  %v6132_v61 = vld [vmem:[#allocation45_spill] sm:$0xff] }
 0x345   : > { %6131 = vst [vmem:[#allocation43_spill] sm:$0xff] %v5517_v50  ;;  %v3426_v58 = vpop.eup %3425  ;;  %vm1256_vm2 = vcmp.ge.f32.partialorder %v5354_v16, 0.0  ;;  %v2344_v8 = vmul.f32 %v2280_v7, %v5362_v39  ;;  %v1452_v26 = vmul.f32 0.3275911, %v5514_v46  ;;  %v2150_v3 = vadd.f32 0.2548296, %v2086_v22 }
 0x346   : > { %v1703_v43 = vmul.f32 1.0614054, %v5506_v36  ;;  %v2343_v54 = vmul.f32 %v2279_v11, %v5402_v48  ;;  %v5527_v29 = vmul.f32 0.70710677, %v5504_v53  ;;  %v2211_v40 = vmul.f32 %v5364_v38, %v2147_v60 }
 0x347   : > { %v2282_v24 = vsub.f32 0.0, %v5473_v10  ;;  %v1516_v51 = vadd.f32 1.0, %v1452_v26  ;;  %v5533_v9 = vadd.f32 %v6132_v61, %v5432_v1  ;;  %v2085_v39 = vmul.f32 %v5390_v25, %v2021_v0 }
 0x348   : > { %3433 = vpow2.f32 %v2452_v13  ;;  %v2024_v7 = vadd.f32 -0.28449672, %v1960_v19  ;;  %v2345_v22 = vmul.f32 %v2281_v27, %v5436_v52  ;;  %v5538_v48 = vmul.f32 %v2721_v20, %v5296_v32 }
 0x349   : > { %v5543_v38 = vsel %vm1256_vm2, 1.0, %v6045_v17  ;;  %v2458_v11 = vmul.f32 1.442695, %v2344_v8  ;;  %3435 = vrcp.f32 %v1516_v51  ;;  %v2214_v1 = vmul.f32 %v5397_v34, %v2150_v3 }
 0x34a   : > { %6133 = vst [vmem:[#allocation45_spill] sm:$0xff] %v5538_v48  ;;  %v5545_v60 = vpop.eup %3427  ;;  %v5549_v0 = vmul.f32 0.5, %v5376_v42  ;;  %v1767_v13 = vadd.f32 -1.4531521, %v1703_v43  ;;  %v5552_v52 = vand.u32 2147483647, %v5527_v29  ;;  %v5556_v19 = vmul.f32 %v3426_v58, %v2211_v40 }
 0x34b   : > { %v5554_v32 = vpop.eup %3429  ;;  %v2456_v16 = vmul.f32 1.442695, %v2343_v54  ;;  %v2346_v27 = vmul.f32 %v2282_v24, %v5473_v10  ;;  %v5560_v20 = vmul.f32 0.70710677, %v5533_v9  ;;  %v2149_v8 = vadd.f32 0.2548296, %v2085_v39  ;;  %v5569_v54 = vpop.permute.xlu0 %700 }
 0x34c   : > { %v2088_v34 = vmul.f32 %v5428_v33, %v2024_v7  ;;  %v2460_v26 = vmul.f32 1.442695, %v2345_v22  ;;  %v1706_v42 = vmul.f32 1.0614054, %v5554_v32  ;;  %3437 = vpow2.f32 %v2458_v11  ;;  %v6134_v11 = vld [vmem:[#allocation48_spill] sm:$0xff] }
 0x34d   : > { %v3432_v3 = vpop.eup %3431  ;;  %v1705_v43 = vmul.f32 1.0614054, %v5545_v60  ;;  %v1451_v51 = vmul.f32 0.3275911, %v5552_v52  ;;  %v5567_v58 = vand.u32 2147483647, %v5560_v20  ;;  %v1831_v40 = vmul.f32 %v5506_v36, %v1767_v13 }
 0x34e   : > { %v2534_v10 = vmul.f32 %v3432_v3, %v2214_v1  ;;  %v1770_v24 = vadd.f32 -1.4531521, %v1706_v42  ;;  %v2284_v61 = vsub.f32 0.0, %v5514_v46  ;;  %v2462_v39 = vmul.f32 1.442695, %v2346_v27 }
 0x34f   : > { %v1515_v7 = vadd.f32 1.0, %v1451_v51  ;;  %v1453_v22 = vmul.f32 0.3275911, %v5567_v58  ;;  %v5576_v15 = vadd.f32 %v6134_v11, %v5569_v54  ;;  %v2152_v57 = vadd.f32 0.2548296, %v2088_v34 }
 0x350   : > { %3439 = vpow2.f32 %v2456_v16  ;;  %v1834_v49 = vmul.f32 %v5554_v32, %v1770_v24  ;;  %v1769_v1 = vadd.f32 -1.4531521, %v1705_v43  ;;  %v5581_v13 = vmul.f32 0.5, %v5444_v44 }
 0x351   : > { %3441 = vrcp.f32 %v1515_v7  ;;  %v1517_v42 = vadd.f32 1.0, %v1453_v22  ;;  %v1895_v3 = vadd.f32 1.4214138, %v1831_v40  ;;  %v2348_v62 = vmul.f32 %v2284_v61, %v5514_v46  ;;  %v6137_v22 = vld [vmem:[#allocation49_spill] sm:$0xff] }
 0x352   : > { %v3434_v27 = vpop.eup %3433  ;;  %3443 = vpow2.f32 %v2460_v26  ;;  %v1898_v51 = vadd.f32 1.4214138, %v1834_v49  ;;  %v2213_v31 = vmul.f32 %v5390_v25, %v2149_v8  ;;  %v2598_v34 = vsub.f32 1.0, %v2534_v10  ;;  %v6135_v25 = vld [vmem:[#allocation24_spill] sm:$0xff] }
 0x353   : > { %v5584_v11 = vpop.eup %3435  ;;  %3445 = vpow2.f32 %v2462_v39  ;;  %v5588_v16 = vmul.f32 0.70710677, %v5576_v15  ;;  %v2216_v44 = vmul.f32 %v5428_v33, %v2152_v57  ;;  %vm1258_vm3 = vcmp.ge.f32.partialorder %v5464_v23, 0.0 }
 0x354   : > { %v1962_v43 = vmul.f32 %v5554_v32, %v1898_v51  ;;  %v1708_v26 = vmul.f32 1.0614054, %v5584_v11  ;;  %v1833_v49 = vmul.f32 %v5545_v60, %v1769_v1  ;;  %3447 = vrcp.f32 %v1517_v42 }
 0x355   : > { %v5596_v46 = vand.u32 2147483647, %v5588_v16  ;;  %v5600_v8 = vadd.f32 %v6135_v25, %v5569_v54  ;;  %v1959_v10 = vmul.f32 %v5506_v36, %v1895_v3  ;;  %v2466_v57 = vmul.f32 1.442695, %v2348_v62 }
 0x356   : > { %v2026_v40 = vadd.f32 -0.28449672, %v1962_v43  ;;  %v1772_v33 = vadd.f32 -1.4531521, %v1708_v26  ;;  %v3438_v24 = vpop.eup %3437  ;;  %v5603_v61 = vmul.f32 %v3434_v27, %v2213_v31  ;;  %v2662_v39 = vmul.f32 %v2598_v34, %v5511_v55 }
 0x357   : > { %6136 = vst [vmem:[#allocation48_spill] sm:$0xff] %v5600_v8  ;;  %v1454_v7 = vmul.f32 0.3275911, %v5596_v46  ;;  %v5609_v1 = vadd.f32 %v6137_v22, %v5569_v54  ;;  %v1322_v42 = vsel %vm1258_vm3, 1.0, %v6045_v17  ;;  %vm1260_vm4 = vcmp.ge.f32.partialorder %v5498_v35, 0.0 }
 0x358   : > { %v2090_v3 = vmul.f32 %v5554_v32, %v2026_v40  ;;  %v1836_v62 = vmul.f32 %v5584_v11, %v1772_v33  ;;  %v2536_v31 = vmul.f32 %v3438_v24, %v2216_v44  ;;  %v1897_v27 = vadd.f32 1.4214138, %v1833_v49 }
 0x359   : > { %6138 = vst [vmem:[#allocation24_spill] sm:$0xff] %v5609_v1  ;;  %v1518_v51 = vadd.f32 1.0, %v1454_v7  ;;  %v5618_v55 = vmul.f32 0.70710677, %v5600_v8  ;;  %v2023_v43 = vadd.f32 -0.28449672, %v1959_v10  ;;  %3449 = vpow2.f32 %v2466_v57 }
 0x35a   : > { %v5620_v34 = vpop.eup %3439  ;;  %v2154_v26 = vadd.f32 0.2548296, %v2090_v3  ;;  %v1900_v25 = vadd.f32 1.4214138, %v1836_v62  ;;  %v2726_v22 = vadd.f32 1.0, %v2662_v39  ;;  %v2600_v3 = vsub.f32 1.0, %v2536_v31 }
 0x35b   : > { %6139 = vst [vmem:[#allocation49_spill] sm:$0xff] %v5618_v55  ;;  %v5622_v23 = vpop.eup %3441  ;;  %3451 = vrcp.f32 %v1518_v51  ;;  %v5625_v40 = vand.u32 2147483647, %v5618_v55  ;;  %v5628_v44 = vmul.f32 0.70710677, %v5609_v1  ;;  %v1961_v39 = vmul.f32 %v5545_v60, %v1897_v27 }
 0x35c   : > { %v5630_v49 = vpop.eup %3443  ;;  %v2218_v24 = vmul.f32 %v5554_v32, %v2154_v26  ;;  %v1964_v10 = vmul.f32 %v5584_v11, %v1900_v25  ;;  %v1707_v57 = vmul.f32 1.0614054, %v5622_v23  ;;  %v1324_v62 = vsel %vm1260_vm4, 1.0, %v6045_v17 }
 0x35d   : > { %6140 = vst [vmem:[#allocation55_spill] sm:$0xff] %v5628_v44  ;;  %v3446_v7 = vpop.eup %3445  ;;  %v1456_v51 = vmul.f32 0.3275911, %v5625_v40  ;;  %v2087_v1 = vmul.f32 %v5506_v36, %v2023_v43  ;;  %v5645_v26 = vmul.f32 %v2726_v22, %v5481_v41  ;;  %v2283_v31 = vsub.f32 0.0, %v5552_v52 }
 0x35e   : > { %v2538_v8 = vmul.f32 %v3446_v7, %v2218_v24  ;;  %v2028_v33 = vadd.f32 -0.28449672, %v1964_v10  ;;  %v1771_v4 = vadd.f32 -1.4531521, %v1707_v57  ;;  %v5642_v32 = vpop.eup %3447  ;;  %v5649_v27 = vand.u32 2147483647, %v5628_v44 }
 0x35f   : > { %v1520_v25 = vadd.f32 1.0, %v1456_v51  ;;  %v1709_v43 = vmul.f32 1.0614054, %v5642_v32  ;;  %v2664_v24 = vmul.f32 %v2600_v3, %v5543_v38  ;;  %v2025_v10 = vadd.f32 -0.28449672, %v1961_v39 }
 0x360   : > { %v2602_v35 = vsub.f32 1.0, %v2538_v8  ;;  %v2092_v55 = vmul.f32 %v5584_v11, %v2028_v33  ;;  %v1835_v48 = vmul.f32 %v5622_v23, %v1771_v4  ;;  %v2285_v57 = vsub.f32 0.0, %v5567_v58  ;;  %v6141_v33 = vld [vmem:[#allocation50_spill] sm:$0xff] }
 0x361   : > { %v1455_v41 = vmul.f32 0.3275911, %v5649_v27  ;;  %v1773_v50 = vadd.f32 -1.4531521, %v1709_v43  ;;  %v2347_v44 = vmul.f32 %v2283_v31, %v5552_v52  ;;  %3453 = vrcp.f32 %v1520_v25 }
 0x362   : > { %v2666_v22 = vmul.f32 %v2602_v35, %v1322_v42  ;;  %v2156_v7 = vadd.f32 0.2548296, %v2092_v55  ;;  %v1899_v51 = vadd.f32 1.4214138, %v1835_v48  ;;  %v5660_v4 = vadd.f32 %v6141_v33, %v5569_v54 }
 0x363   : > { %v1519_v8 = vadd.f32 1.0, %v1455_v41  ;;  %v3450_v5 = vpop.eup %3449  ;;  %v1837_v39 = vmul.f32 %v5642_v32, %v1773_v50  ;;  %v2728_v48 = vadd.f32 1.0, %v2664_v24  ;;  %vm1255_vm5 = vcmp.ge.f32.partialorder %v5383_v56, 0.0  ;;  %v6142_v24 = vld [vmem:[#allocation20_spill] sm:$0xff] }
 0x364   : > { %v2730_v47 = vadd.f32 1.0, %v2666_v22  ;;  %v2220_v38 = vmul.f32 %v5584_v11, %v2156_v7  ;;  %v1963_v3 = vmul.f32 %v5622_v23, %v1899_v51  ;;  %v2151_v52 = vadd.f32 0.2548296, %v2087_v1  ;;  %v6143_v22 = vld [vmem:[#allocation23_spill] sm:$0xff] }
 0x365   : > { %v5665_v42 = vpop.eup %3451  ;;  %v2089_v55 = vmul.f32 %v5545_v60, %v2025_v10  ;;  %v5670_v31 = vmul.f32 0.70710677, %v5660_v4  ;;  %v1901_v11 = vadd.f32 1.4214138, %v1837_v39  ;;  %v2349_v35 = vmul.f32 %v2285_v57, %v5567_v58  ;;  %v5688_v57 = vpop.permute.xlu1 %705  ;;  %v6145_v39 = vld [vmem:[#allocation22_spill] sm:$0xff] }
 0x366   : > { %v5673_v54 = vmul.f32 %v2730_v47, %v5581_v13  ;;  %v2540_v25 = vmul.f32 %v3450_v5, %v2220_v38  ;;  %v2027_v43 = vadd.f32 -0.28449672, %v1963_v3  ;;  %v2464_v50 = vmul.f32 1.442695, %v2347_v44 }
 0x367   : > { %v1710_v41 = vmul.f32 1.0614054, %v5665_v42  ;;  %v3137_v7 = vpack.c.bf16 %v6143_v22, %v6142_v24  ;;  %v1965_v51 = vmul.f32 %v5642_v32, %v1901_v11  ;;  %3455 = vrcp.f32 %v1519_v8  ;;  %v6147_v11 = vld [vmem:[#allocation14_spill] sm:$0xff]  ;;  %v6148_v8 = vld [vmem:[#allocation13_spill] sm:$0xff] }
 0x368   : > { %v3163_v1 = vpack.c.bf16 %v5673_v54, %v5645_v26  ;;  %v2604_v10 = vsub.f32 1.0, %v2540_v25  ;;  %v6144_v47 = vsub.f32 1.0, %v5556_v19  ;;  %v2153_v13 = vadd.f32 0.2548296, %v2089_v55  ;;  %v6146_v25 = vld [vmem:[#allocation7_spill] sm:$0xff] }
 0x369   : > { %v1774_v58 = vadd.f32 -1.4531521, %v1710_v41  ;;  %v5686_v44 = vand.u32 2147483647, %v5670_v31  ;;  %3138 = vmatprep.subr.bf16.mxu0 %v3137_v7  ;;  %v2029_v38 = vadd.f32 -0.28449672, %v1965_v51  ;;  %v3169_v24 = vpack.c.bf16 %v6146_v25, %v6145_v39 }
 0x36a   : > { %v2659_v5 = vmul.f32 %v6144_v47, %v5449_v2  ;;  %v2668_v33 = vmul.f32 %v2604_v10, %v1324_v62  ;;  %v2468_v3 = vmul.f32 1.442695, %v2349_v35  ;;  %v6149_v22 = vpack.c.bf16 %v6147_v11, %v6148_v8  ;;  %v6150_v47 = vld [vmem:[#allocation16_spill] sm:$0xff]  ;;  %v6151_v39 = vld [vmem:[#allocation15_spill] sm:$0xff] }
 0x36b   : > { %v2215_v2 = vmul.f32 %v5506_v36, %v2151_v52  ;;  %v2091_v19 = vmul.f32 %v5622_v23, %v2027_v43  ;;  %v1457_v55 = vmul.f32 0.3275911, %v5686_v44  ;;  %v5700_v41 = vadd.f32 %v5105_v63, %v5688_v57  ;;  %3170 = vmatprep.subr.bf16.mxu1 %v3169_v24  ;;  %v5704_v10 = vpop.eup %3453 }
 0x36c   : > { %3140 = vmatpush1.bf16.msra.mxu0 %v6149_v22  ;;  %v1132_v62 = vmul.f32 0.5, %v5490_v30  ;;  %v2732_v35 = vadd.f32 1.0, %v2668_v33  ;;  %3457 = vpow2.f32 %v2464_v50  ;;  %v1838_v7 = vmul.f32 %v5665_v42, %v1774_v58 }
 0x36d   : > { %v2723_v51 = vadd.f32 1.0, %v2659_v5  ;;  %v2217_v36 = vmul.f32 %v5545_v60, %v2153_v13  ;;  %v2093_v52 = vmul.f32 %v5642_v32, %v2029_v38  ;;  %v1521_v43 = vadd.f32 1.0, %v1457_v55 }
 0x36e   : > { %v6152_v25 = vpack.c.bf16 %v6150_v47, %v6151_v39  ;;  %v6153_v63 = vsub.f32 1.0, %v5603_v61  ;;  %v5715_v50 = vmul.f32 %v2728_v48, %v5486_v14  ;;  %v5717_v58 = vmul.f32 %v2732_v35, %v1132_v62 }
 0x36f   : > { %3459 = vpow2.f32 %v2468_v3  ;;  %v2535_v5 = vmul.f32 %v5620_v34, %v2215_v2  ;;  %vm1257_vm6 = vcmp.ge.f32.partialorder %v5418_v12, 0.0  ;;  %v2155_v60 = vadd.f32 0.2548296, %v2091_v19 }
 0x370   : > { %3172 = vmatpush1.bf16.msra.mxu1 %v6152_v25  ;;  %v2661_v30 = vmul.f32 %v6153_v63, %v5478_v45  ;;  %v5722_v13 = vmul.f32 0.70710677, %v5700_v41  ;;  %v1319_v33 = vsel %vm1255_vm5, 1.0, %v6045_v17  ;;  %v3195_v45 = vpack.c.bf16 %v5717_v58, %v5715_v50 }
 0x371   : > { %v1902_v14 = vadd.f32 1.4214138, %v1838_v7  ;;  %v1712_v61 = vmul.f32 1.0614054, %v5704_v10  ;;  %v5731_v48 = vmul.f32 0.5, %v5395_v28  ;;  %v2537_v34 = vmul.f32 %v5630_v49, %v2217_v36  ;;  %v5734_v38 = vpop.eup %3455 }
 0x372   : > { %v2157_v12 = vadd.f32 0.2548296, %v2093_v52  ;;  %3461 = vrcp.f32 %v1521_v43  ;;  %v5737_v3 = vmul.f32 %v2723_v51, %v5440_v37  ;;  %v2725_v56 = vadd.f32 1.0, %v2661_v30 }
 0x373   : > { %v1321_v24 = vsel %vm1257_vm6, 1.0, %v6045_v17  ;;  %v2286_v11 = vsub.f32 0.0, %v5596_v46  ;;  %v2599_v8 = vsub.f32 1.0, %v2535_v5  ;;  %vm1259_vm7 = vcmp.ge.f32.partialorder %v5527_v29, 0.0 }
 0x374   : > { %v2219_v28 = vmul.f32 %v5622_v23, %v2155_v60  ;;  %v5744_v22 = vand.u32 2147483647, %v5722_v13  ;;  %v5747_v49 = vmul.f32 0.5, %v5504_v53  ;;  %v1966_v2 = vmul.f32 %v5665_v42, %v1902_v14 }
 0x375   : > { %v1776_v37 = vadd.f32 -1.4531521, %v1712_v61  ;;  %v5752_v19 = vadd.f32 %v5107_v6, %v5688_v57  ;;  %v2601_v55 = vsub.f32 1.0, %v2537_v34  ;;  %v2221_v62 = vmul.f32 %v5642_v32, %v2157_v12 }
 0x376   : > { %v1711_v29 = vmul.f32 1.0614054, %v5734_v38  ;;  %v1458_v23 = vmul.f32 0.3275911, %v5744_v22  ;;  %v3458_v35 = vpop.eup %3457  ;;  %v5758_v7 = vmul.f32 %v2725_v56, %v5461_v59  ;;  %v1323_v53 = vsel %vm1259_vm7, 1.0, %v6045_v17 }
 0x377   : > { %vm1261_vm8 = vcmp.ge.f32.partialorder %v5560_v20, 0.0  ;;  %v2350_v51 = vmul.f32 %v2286_v11, %v5596_v46  ;;  %v2663_v36 = vmul.f32 %v2599_v8, %v1319_v33  ;;  %v2539_v6 = vmul.f32 %v3458_v35, %v2219_v28 }
 0x378   : > { %v2288_v52 = vsub.f32 0.0, %v5625_v40  ;;  %v1522_v43 = vadd.f32 1.0, %v1458_v23  ;;  %v2030_v47 = vadd.f32 -0.28449672, %v1966_v2  ;;  %v1840_v39 = vmul.f32 %v5704_v10, %v1776_v37  ;;  %v6154_v37 = vld [vmem:[#allocation31_spill] sm:$0xff] }
 0x379   : > { %v3460_v32 = vpop.eup %3459  ;;  %v5766_v25 = vmul.f32 0.70710677, %v5752_v19  ;;  %v5770_v59 = vadd.f32 %v5143_v18, %v5688_v57  ;;  %v2665_v63 = vmul.f32 %v2601_v55, %v1321_v24  ;;  %v1775_v5 = vadd.f32 -1.4531521, %v1711_v29  ;;  %v6155_v55 = vld [vmem:[#allocation10_spill] sm:$0xff] }
 0x37a   : > { %v2541_v30 = vmul.f32 %v3460_v32, %v2221_v62  ;;  %3463 = vrcp.f32 %v1522_v43  ;;  %v5773_v46 = vmul.f32 0.5, %v5533_v9  ;;  %v1325_v60 = vsel %vm1261_vm8, 1.0, %v6045_v17 }
 0x37b   : > { %v2470_v33 = vmul.f32 1.442695, %v2350_v51  ;;  %v2287_v14 = vsub.f32 0.0, %v5649_v27  ;;  %v2727_v34 = vadd.f32 1.0, %v2663_v36  ;;  %v2603_v12 = vsub.f32 1.0, %v2539_v6 }
 0x37c   : > { %v5779_v61 = vpop.eup %3461  ;;  %v5782_v18 = vmul.f32 0.5, %v5576_v15  ;;  %v2352_v56 = vmul.f32 %v2288_v52, %v5625_v40  ;;  %v2094_v24 = vmul.f32 %v5665_v42, %v2030_v47  ;;  %v1904_v9 = vadd.f32 1.4214138, %v1840_v39  ;;  %v6157_v47 = vld [vmem:[#allocation26_spill] sm:$0xff] }
 0x37d   : > { %v5787_v11 = vand.u32 2147483647, %v5766_v25  ;;  %v5790_v20 = vmul.f32 0.70710677, %v5770_v59  ;;  %v2729_v8 = vadd.f32 1.0, %v2665_v63  ;;  %v2605_v28 = vsub.f32 1.0, %v2541_v30 }
 0x37e   : > { %v1839_v2 = vmul.f32 %v5734_v38, %v1775_v5  ;;  %v3141_v62 = vpack.c.bf16 %v6155_v55, %v6154_v37  ;;  %3465 = vpow2.f32 %v2470_v33  ;;  %v2351_v15 = vmul.f32 %v2287_v14, %v5649_v27  ;;  %v6156_v27 = vld [vmem:[#allocation27_spill] sm:$0xff]  ;;  %v6159_v37 = vld [vmem:[#allocation32_spill] sm:$0xff]  ;;  %v6160_v55 = vld [vmem:[#allocation38_spill] sm:$0xff] }
 0x37f   : > { %v1713_v40 = vmul.f32 1.0614054, %v5779_v61  ;;  %v1460_v29 = vmul.f32 0.3275911, %v5787_v11  ;;  %v5799_v23 = vmul.f32 %v2727_v34, %v5549_v0  ;;  %v2667_v35 = vmul.f32 %v2603_v12, %v1323_v53 }
 0x380   : > { %v2290_v51 = vsub.f32 0.0, %v5744_v22  ;;  %v5803_v36 = vand.u32 2147483647, %v5790_v20  ;;  %3142 = vmatprep.subr.bf16.mxu0 %v3141_v62  ;;  %v2158_v6 = vadd.f32 0.2548296, %v2094_v24  ;;  %v1968_v52 = vmul.f32 %v5704_v10, %v1904_v9 }
 0x381   : > { %v2474_v43 = vmul.f32 1.442695, %v2352_v56  ;;  %v1524_v32 = vadd.f32 1.0, %v1460_v29  ;;  %v6158_v39 = vpack.c.bf16 %v6156_v27, %v6157_v47  ;;  %v2669_v63 = vmul.f32 %v2605_v28, %v1325_v60 }
 0x382   : > { %v1903_v30 = vadd.f32 1.4214138, %v1839_v2  ;;  %v1459_v0 = vmul.f32 0.3275911, %v5803_v36  ;;  %v5812_v53 = vadd.f32 %v5167_v21, %v5688_v57  ;;  %v5815_v5 = vmul.f32 %v2729_v8, %v5731_v48 }
 0x383   : > { %3144 = vmatpush1.bf16.msra.mxu0 %v6158_v39  ;;  %v2472_v33 = vmul.f32 1.442695, %v2351_v15  ;;  %v1777_v14 = vadd.f32 -1.4531521, %v1713_v40  ;;  %3467 = vrcp.f32 %v1524_v32  ;;  %v2731_v12 = vadd.f32 1.0, %v2667_v35  ;;  %v6162_v32 = vld [vmem:[#allocation18_spill] sm:$0xff] }
 0x384   : > { %v5817_v34 = vpop.eup %3463  ;;  %v2289_v56 = vsub.f32 0.0, %v5686_v44  ;;  %v2354_v60 = vmul.f32 %v2290_v51, %v5744_v22  ;;  %v1523_v24 = vadd.f32 1.0, %v1459_v0  ;;  %v2222_v9 = vmul.f32 %v5665_v42, %v2158_v6 }
 0x385   : > { %v2032_v28 = vadd.f32 -0.28449672, %v1968_v52  ;;  %3469 = vpow2.f32 %v2474_v43  ;;  %v1714_v21 = vmul.f32 1.0614054, %v5817_v34  ;;  %v2733_v57 = vadd.f32 1.0, %v2669_v63  ;;  %v6161_v43 = vld [vmem:[#allocation40_spill] sm:$0xff] }
 0x386   : > { %vm1262_vm9 = vcmp.ge.f32.partialorder %v5588_v16, 0.0  ;;  %v1967_v48 = vmul.f32 %v5734_v38, %v1903_v30  ;;  %3471 = vrcp.f32 %v1523_v24  ;;  %v5826_v8 = vmul.f32 0.70710677, %v5812_v53  ;;  %v6163_v63 = vld [vmem:[#allocation30_spill] sm:$0xff]  ;;  %v6164_v30 = vld [vmem:[#allocation29_spill] sm:$0xff] }
 0x387   : > { %3473 = vpow2.f32 %v2472_v33  ;;  %v1841_v2 = vmul.f32 %v5779_v61, %v1777_v14  ;;  %v1778_v22 = vadd.f32 -1.4531521, %v1714_v21  ;;  %v3173_v42 = vpack.c.bf16 %v6160_v55, %v6159_v37  ;;  %v6168_v24 = vld [vmem:[#allocation25_spill] sm:$0xff]  ;;  %v6173_v37 = vld [vmem:[#allocation28_spill] sm:$0xff] }
 0x388   : > { %v5832_v62 = vmul.f32 %v2731_v12, %v5747_v49  ;;  %v2353_v15 = vmul.f32 %v2289_v56, %v5686_v44  ;;  %v2478_v40 = vmul.f32 1.442695, %v2354_v60  ;;  %v5836_v29 = vand.u32 2147483647, %v5826_v8  ;;  %v3466_v35 = vpop.eup %3465  ;;  %v6166_v12 = vld [vmem:[#allocation42_spill] sm:$0xff]  ;;  %v6167_v56 = vld [vmem:[#allocation19_spill] sm:$0xff] }
 0x389   : > { %v2096_v51 = vmul.f32 %v5704_v10, %v2032_v28  ;;  %v1842_v6 = vmul.f32 %v5817_v34, %v1778_v22  ;;  %v2292_v52 = vsub.f32 0.0, %v5787_v11  ;;  %3174 = vmatprep.subr.bf16.mxu1 %v3173_v42  ;;  %v3145_v27 = vpack.c.bf16 %v6162_v32, %v6161_v43  ;;  %v6169_v28 = vld [vmem:[#allocation5_spill] sm:$0xff]  ;;  %v6176_v32 = vld [vmem:[#allocation12_spill] sm:$0xff] }
 0x38a   : > { %v5844_v49 = vmul.f32 %v2733_v57, %v5773_v46  ;;  %v5846_v47 = vmul.f32 %v3466_v35, %v2222_v9  ;;  %v2031_v44 = vadd.f32 -0.28449672, %v1967_v48  ;;  %v1461_v39 = vmul.f32 0.3275911, %v5836_v29  ;;  %v6170_v57 = vld [vmem:[#allocation33_spill] sm:$0xff]  ;;  %v6171_v48 = vld [vmem:[#allocation11_spill] sm:$0xff] }
 0x38b   : > { %v6165_v0 = vpack.c.bf16 %v6163_v63, %v6164_v30  ;;  %v1905_v33 = vadd.f32 1.4214138, %v1841_v2  ;;  %v1906_v14 = vadd.f32 1.4214138, %v1842_v6  ;;  %3146 = vmatprep.subr.bf16.mxu0 %v3145_v27  ;;  %v3177_v60 = vpack.c.bf16 %v6167_v56, %v6166_v12  ;;  %v6174_v55 = vld [vmem:[#allocation9_spill] sm:$0xff]  ;;  %v6177_v30 = vld [vmem:[#allocation35_spill] sm:$0xff] }
 0x38c   : > { %v3149_v21 = vpack.c.bf16 %v6169_v28, %v6168_v24  ;;  %3475 = vpow2.f32 %v2478_v40  ;;  %v2291_v46 = vsub.f32 0.0, %v5803_v36  ;;  %v1525_v9 = vadd.f32 1.0, %v1461_v39  ;;  %v6175_v40 = vld [vmem:[#allocation53_spill] sm:$0xff]  ;;  %v6180_v56 = vld [vmem:[#allocation54_spill] sm:$0xff] }
 0x38d   : > { %3176 = vmatpush1.bf16.msra.mxu1 %v6165_v0  ;;  %v6172_v22 = vpack.c.bf16 %v6170_v57, %v6171_v48  ;;  %v3181_v42 = vpack.c.bf16 %v6174_v55, %v6173_v37  ;;  %v5862_v2 = vpop.eup %3467  ;;  %v2160_v35 = vadd.f32 0.2548296, %v2096_v51  ;;  %v1970_v6 = vmul.f32 %v5817_v34, %v1906_v14  ;;  %v6178_v0 = vld [vmem:[#allocation34_spill] sm:$0xff]  ;;  %v6181_v51 = vld [vmem:[#allocation39_spill] sm:$0xff]  ;;  %v6185_v37 = vld [vmem:[#allocation44_spill] sm:$0xff] }
 0x38e   : > { %v2356_v43 = vmul.f32 %v2292_v52, %v5787_v11  ;;  %3178 = vmatprep.subr.bf16.mxu1 %v3177_v60  ;;  %v3153_v27 = vpack.c.bf16 %v6176_v32, %v6175_v40  ;;  %v2095_v39 = vmul.f32 %v5734_v38, %v2031_v44  ;;  %v1716_v63 = vmul.f32 1.0614054, %v5862_v2  ;;  %v6182_v60 = vld [vmem:[#allocation43_spill] sm:$0xff] }
 0x38f   : > { %3148 = vmatpush1.bf16.msra.mxu0 %v6172_v22  ;;  %3477 = vrcp.f32 %v1525_v9  ;;  %v6179_v12 = vpack.c.bf16 %v6177_v30, %v6178_v0  ;;  %v3185_v24 = vpack.c.bf16 %v6181_v51, %v6180_v56  ;;  %v3470_v14 = vpop.eup %3469  ;;  %v1969_v11 = vmul.f32 %v5779_v61, %v1905_v33  ;;  %v6184_v22 = vld [vmem:[#allocation21_spill] sm:$0xff]  ;;  %v6188_v30 = vld [vmem:[#allocation46_spill] sm:$0xff]  ;;  %v6190_v51 = vld [vmem:[#allocation8_spill] sm:$0xff] }
 0x390   : > { %3150 = vmatprep.subr.bf16.mxu0 %v3149_v21  ;;  %v2034_v52 = vadd.f32 -0.28449672, %v1970_v6  ;;  %v3157_v28 = vpack.c.bf16 %v5737_v3, %v6182_v60  ;;  %v6183_v21 = vld [vmem:[#allocation45_spill] sm:$0xff]  ;;  %v5880_v57 = vpop.eup %3471  ;;  %v1780_v9 = vadd.f32 -1.4531521, %v1716_v63  ;;  %v2355_v48 = vmul.f32 %v2291_v46, %v5803_v36 }
 0x391   : > { %3180 = vmatpush1.bf16.msra.mxu1 %v6179_v12  ;;  %v3189_v44 = vpack.c.bf16 %v5758_v7, %v6183_v21  ;;  %v6186_v55 = vpack.c.bf16 %v6184_v22, %v6185_v37  ;;  %v3161_v33 = vpack.c.bf16 %v5832_v62, %v5799_v23  ;;  %v3474_v6 = vpop.eup %3473  ;;  %v1326_v3 = vsel %vm1262_vm9, 1.0, %v6045_v17  ;;  %v6187_v62 = vld [vmem:[#allocation47_spill] sm:$0xff]  ;;  %v6194_v21 = vld [vmem:[#allocation52_spill] sm:$0xff] }
 0x392   : > { %3182 = vmatprep.subr.bf16.mxu1 %v3181_v42  ;;  %v3193_v42 = vpack.c.bf16 %v5844_v49, %v5815_v5  ;;  %v2098_v7 = vmul.f32 %v5817_v34, %v2034_v52  ;;  %v2482_v40 = vmul.f32 1.442695, %v2356_v43  ;;  %v1715_v36 = vmul.f32 1.0614054, %v5880_v57 }
 0x393   : > { %3152 = vmatpush1.bf16.msra.mxu0 %v6186_v55  ;;  %v2606_v46 = vsub.f32 1.0, %v5846_v47  ;;  %v2159_v32 = vadd.f32 0.2548296, %v2095_v39  ;;  %v2476_v63 = vmul.f32 1.442695, %v2353_v15  ;;  %v1844_v23 = vmul.f32 %v5862_v2, %v1780_v9  ;;  %v6191_v47 = vld [vmem:[#allocation6_spill] sm:$0xff] }
 0x394   : > { %3154 = vmatprep.subr.bf16.mxu0 %v3153_v27  ;;  %v6189_v5 = vpack.c.bf16 %v6187_v62, %v6188_v30  ;;  %v2033_v49 = vadd.f32 -0.28449672, %v1969_v11  ;;  %v2162_v0 = vadd.f32 0.2548296, %v2098_v7  ;;  %v1779_v16 = vadd.f32 -1.4531521, %v1715_v36 }
 0x395   : > { %v2224_v12 = vmul.f32 %v5704_v10, %v2160_v35  ;;  %v1908_v43 = vadd.f32 1.4214138, %v1844_v23  ;;  %v2480_v56 = vmul.f32 1.442695, %v2355_v48  ;;  %v2293_v27 = vsub.f32 0.0, %v5836_v29  ;;  %v6193_v15 = vld [vmem:[#allocation49_spill] sm:$0xff] }
 0x396   : > { %3184 = vmatpush1.bf16.msra.mxu1 %v6189_v5  ;;  %v6192_v39 = vpack.c.bf16 %v6190_v51, %v6191_v47  ;;  %vm1264_vm10 = vcmp.ge.f32.partialorder %v6193_v15, 0.0  ;;  %v2226_v52 = vmul.f32 %v5817_v34, %v2162_v0  ;;  %3479 = vpow2.f32 %v2482_v40  ;;  %v3476_v60 = vpop.eup %3475  ;;  %v6195_v9 = vld [vmem:[#allocation51_spill] sm:$0xff]  ;;  %v6197_v7 = vld [vmem:[#allocation37_spill] sm:$0xff]  ;;  %v6198_v40 = vld [vmem:[#allocation36_spill] sm:$0xff] }
 0x397   : > { %3186 = vmatprep.subr.bf16.mxu1 %v3185_v24  ;;  %v1843_v11 = vmul.f32 %v5880_v57, %v1779_v16  ;;  %v2670_v24 = vmul.f32 %v2606_v46, %v1326_v3  ;;  %v2223_v10 = vmul.f32 %v5734_v38, %v2159_v32  ;;  %3481 = vpow2.f32 %v2476_v63  ;;  %v6200_v30 = vld [vmem:[#allocation17_spill] sm:$0xff] }
 0x398   : > { %3156 = vmatpush1.bf16.msra.mxu0 %v6192_v39  ;;  %v1972_v35 = vmul.f32 %v5862_v2, %v1908_v43  ;;  %v6196_v48 = vpack.c.bf16 %v6194_v21, %v6195_v9  ;;  %v2097_v22 = vmul.f32 %v5779_v61, %v2033_v49  ;;  %vm1266_vm11 = vcmp.ge.f32.partialorder %v5722_v13, 0.0  ;;  %v6201_v5 = vld [vmem:[#allocation41_spill] sm:$0xff] }
 0x399   : > { %3158 = vmatprep.subr.bf16.mxu0 %v3157_v28  ;;  %v2546_v34 = vmul.f32 %v3476_v60, %v2226_v52  ;;  %v1907_v37 = vadd.f32 1.4214138, %v1843_v11  ;;  %v5915_v55 = vpop.eup %3477  ;;  %v2544_v28 = vmul.f32 %v3470_v14, %v2224_v12  ;;  %3483 = vpow2.f32 %v2480_v56 }
 0x39a   : > { %3188 = vmatpush1.bf16.msra.mxu1 %v6196_v48  ;;  %v2036_v3 = vadd.f32 -0.28449672, %v1972_v35  ;;  %v2357_v38 = vmul.f32 %v2293_v27, %v5836_v29  ;;  %v6199_v36 = vpack.c.bf16 %v6197_v7, %v6198_v40  ;;  %v1328_v46 = vsel %vm1264_vm10, 1.0, %v6045_v17  ;;  %v6203_v27 = vld [vmem:[#allocation55_spill] sm:$0xff] }
 0x39b   : > { %3190 = vmatprep.subr.bf16.mxu1 %v3189_v44  ;;  %v2610_v32 = vsub.f32 1.0, %v2546_v34  ;;  %v1971_v63 = vmul.f32 %v5880_v57, %v1907_v37  ;;  %v1717_v44 = vmul.f32 1.0614054, %v5915_v55  ;;  %v2734_v23 = vadd.f32 1.0, %v2670_v24  ;;  %v6204_v37 = vld [vmem:[#allocation48_spill] sm:$0xff] }
 0x39c   : > { %3160 = vmatpush1.bf16.msra.mxu0 %v6199_v36  ;;  %v2543_v14 = vmul.f32 %v3474_v6, %v2223_v10  ;;  %v1330_v29 = vsel %vm1266_vm11, 1.0, %v6045_v17  ;;  %v2100_v62 = vmul.f32 %v5862_v2, %v2036_v3  ;;  %v6202_v49 = vpack.c.bf16 %v6200_v30, %v6201_v5 }
 0x39d   : > { %3162 = vmatprep.subr.bf16.mxu0 %v3161_v33  ;;  %v2161_v0 = vadd.f32 0.2548296, %v2097_v22  ;;  %v2674_v16 = vmul.f32 %v2610_v32, %v1330_v29  ;;  %v2035_v12 = vadd.f32 -0.28449672, %v1971_v63  ;;  %v1781_v43 = vadd.f32 -1.4531521, %v1717_v44 }
 0x39e   : > { %3192 = vmatpush1.bf16.msra.mxu1 %v6202_v49  ;;  %v2608_v56 = vsub.f32 1.0, %v2544_v28  ;;  %vm1263_vm12 = vcmp.ge.f32.partialorder %v6203_v27, 0.0  ;;  %v2164_v33 = vadd.f32 0.2548296, %v2100_v62  ;;  %v2484_v6 = vmul.f32 1.442695, %v2357_v38 }
 0x39f   : > { %3194 = vmatprep.subr.bf16.mxu1 %v3193_v42  ;;  %v1138_v13 = vmul.f32 0.5, %v5700_v41  ;;  %v2738_v51 = vadd.f32 1.0, %v2674_v16  ;;  %v2099_v47 = vmul.f32 %v5880_v57, %v2035_v12  ;;  %v1845_v39 = vmul.f32 %v5915_v55, %v1781_v43 }
 0x3a0   : > { %3164 = vmatpush1.bf16.msra.mxu0 %v3163_v1  ;;  %v2798_v15 = vmul.f32 %v2734_v23, %v5782_v18  ;;  %v2607_v52 = vsub.f32 1.0, %v2543_v14  ;;  %vm1268_vm13 = vcmp.ge.f32.partialorder %v5766_v25, 0.0  ;;  %v2228_v42 = vmul.f32 %v5862_v2, %v2164_v33  ;;  %v3480_v26 = vpop.eup %3479  ;;  %v6205_v23 = vld [vmem:[#allocation24_spill] sm:$0xff] }
 0x3a1   : > { %v2225_v54 = vmul.f32 %v5779_v61, %v2161_v0  ;;  %v2802_v1 = vmul.f32 %v2738_v51, %v1138_v13  ;;  %v2163_v41 = vadd.f32 0.2548296, %v2099_v47  ;;  %v1909_v11 = vadd.f32 1.4214138, %v1845_v39  ;;  %v3482_v60 = vpop.eup %3481 }
 0x3a2   : > { %3196 = vmatpush1.bf16.msra.mxu1 %v3195_v45  ;;  %v2672_v24 = vmul.f32 %v2608_v56, %v1328_v46  ;;  %v2548_v10 = vmul.f32 %v3480_v26, %v2228_v42  ;;  %3485 = vpow2.f32 %v2484_v6  ;;  %v1327_v50 = vsel %vm1263_vm12, 1.0, %v6045_v17  ;;  %v2811_v42 = vpop.permute.xlu0 %2810 }
 0x3a3   : > { %v3167_v18 = vpack.c.bf16 %v2802_v1, %v2798_v15  ;;  %v2227_v35 = vmul.f32 %v5880_v57, %v2163_v41  ;;  %v1973_v21 = vmul.f32 %v5915_v55, %v1909_v11  ;;  %v3484_v2 = vpop.eup %3483  ;;  %v1332_v58 = vsel %vm1268_vm13, 1.0, %v6045_v17 }
 0x3a4   : > { %v2612_v45 = vsub.f32 1.0, %v2548_v10  ;;  %vm1267_vm14 = vcmp.ge.f32.partialorder %v5790_v20, 0.0  ;;  %v2671_v61 = vmul.f32 %v2607_v52, %v1327_v50  ;;  %v2545_v9 = vmul.f32 %v3482_v60, %v2225_v54 }
 0x3a5   : > { %v2547_v48 = vmul.f32 %v3484_v2, %v2227_v35  ;;  %v2037_v22 = vadd.f32 -0.28449672, %v1973_v21  ;;  %v2736_v34 = vadd.f32 1.0, %v2672_v24  ;;  %v1136_v28 = vmul.f32 0.5, %v6204_v37 }
 0x3a6   : > { %v2676_v57 = vmul.f32 %v2612_v45, %v1332_v58  ;;  %vm1265_vm15 = vcmp.ge.f32.partialorder %v5670_v31, 0.0  ;;  %v1140_v7 = vmul.f32 0.5, %v5752_v19  ;;  %v1331_v40 = vsel %vm1267_vm14, 1.0, %v6045_v17 }
 0x3a7   : > { %v2611_v3 = vsub.f32 1.0, %v2547_v48  ;;  %v2101_v38 = vmul.f32 %v5915_v55, %v2037_v22  ;;  %v2735_v36 = vadd.f32 1.0, %v2671_v61  ;;  %v2609_v20 = vsub.f32 1.0, %v2545_v9 }
 0x3a8   : > { %v2740_v25 = vadd.f32 1.0, %v2676_v57  ;;  %v2800_v63 = vmul.f32 %v2736_v34, %v1136_v28  ;;  %v1135_v14 = vmul.f32 0.5, %v6205_v23  ;;  %v1139_v29 = vmul.f32 0.5, %v5770_v59  ;;  %v2806_v59 = vld [vmem:[%s5993_s6] sm:$0x1] }
 0x3a9   : > { %v2675_v46 = vmul.f32 %v2611_v3, %v1331_v40  ;;  %v2165_v32 = vadd.f32 0.2548296, %v2101_v38  ;;  %v1329_v31 = vsel %vm1265_vm15, 1.0, %v6045_v17  ;;  %vm1269_vm0 = vcmp.ge.f32.partialorder %v5826_v8, 0.0 }
 0x3aa   : > { %v2804_v44 = vmul.f32 %v2740_v25, %v1140_v7  ;;  %v2799_v49 = vmul.f32 %v2735_v36, %v1135_v14  ;;  %v2673_v0 = vmul.f32 %v2609_v20, %v1329_v31  ;;  %v1333_v27 = vsel %vm1269_vm0, 1.0, %v6045_v17 }
 0x3ab   : > { %v2739_v62 = vadd.f32 1.0, %v2675_v46  ;;  %v2229_v30 = vmul.f32 %v5915_v55, %v2165_v32  ;;  %v1137_v55 = vmul.f32 0.5, %v5660_v4  ;;  %v1141_v8 = vmul.f32 0.5, %v5812_v53 }
 0x3ac   : > { %v3486_v5 = vpop.eup %3485  ;;  %v3199_v19 = vpack.c.bf16 %v2804_v44, %v2800_v63  ;;  %v2737_v33 = vadd.f32 1.0, %v2673_v0  ;;  %v2813_v17 = vlaneseq  ;;  %v3514_v54 = vmov 1966171168  }
 0x3ad   : > { %v2803_v16 = vmul.f32 %v2739_v62, %v1139_v29  ;;  %v2549_v12 = vmul.f32 %v3486_v5, %v2229_v30  ;;  %v2966_v1 = vunpack.c.l.s4 %v3514_v54 }
 0x3ae   : > { %v2801_v51 = vmul.f32 %v2737_v33, %v1137_v55  ;;  %v2814_v15 = vshrl.u32 %v2813_v17, 7  ;;  %vm2990_vm1 = vcmp.lt.s32.totalorder %v2813_v17, 512 }
 0x3af   : > { %v2613_v43 = vsub.f32 1.0, %v2549_v12  ;;  %v3165_v56 = vpack.c.bf16 %v2803_v16, %v2799_v49  ;;  %v2967_v60 = vunpack.c.0.s8 %v2966_v1 }
 0x3b0   : > { %v2815_v52 = vsub.s32 0, %v2814_v15 }
 0x3b1   : > { %v2677_v6 = vmul.f32 %v2613_v43, %v1333_v27  ;;  %3166 = vmatprep.subr.bf16.mxu0 %v3165_v56  ;;  %v2970_v10 = vsub.s32 %v2967_v60, %v2814_v15 }
 0x3b2   : > { %3168 = vmatpush1.bf16.msra.mxu0 %v3167_v18  ;;  %v2816_v26 = vrot.slane %v2811_v42, %v2815_v52 }
 0x3b3   : > { %v2741_v13 = vadd.f32 1.0, %v2677_v6 }
 0x3b5   : > { %v2805_v47 = vmul.f32 %v2741_v13, %v1141_v8  ;;  %2882 = vmatmul.mubr.f32.vlgmr.msra.gmra.mrb[36].mxu0 %v2806_v59 }
 0x3b7   : > { %v3197_v39 = vpack.c.bf16 %v2805_v47, %v2801_v51 }
 0x3b9   : > { %3198 = vmatprep.subr.bf16.mxu1 %v3197_v39 }
 0x3ba   : > { %3200 = vmatpush1.bf16.msra.mxu1 %v3199_v19 }
 0x3bd   : > { %2953 = vmatmul.mubr.f32.vlgmr.msra.gmra.mrb[36].mxu1 %v2806_v59 }
 0x488   : > { %v2883_v41 = vpop.f32.mrb[36].mxu0 }
 0x489   : > { %v2884_v4 = vadd.f32 %v2883_v41, %v2816_v26  ;;  %v2885_v11 = vpop.f32.mrb[37].mxu0 }
 0x48a   : > { %v2886_v53 = vadd.f32 %v2885_v11, %v2816_v26 }
 0x48c   : > { %v2963_v24 = vcombine.low %v2884_v4, %v2886_v53 }
 0x48e   : > { %v2971_v50 = vrot.slane %v2963_v24, %v2970_v10 }
 0x490   : > { %v2954_v18 = vpop.f32.mrb[36].mxu1 }
 0x491   : > { %v2955_v35 = vadd.f32 %v2954_v18, %v2816_v26  ;;  %v2956_v21 = vpop.f32.mrb[37].mxu1 }
 0x492   : > { %v2957_v2 = vadd.f32 %v2956_v21, %v2816_v26 }
 0x494   : > { %v2964_v58 = vcombine.low %v2955_v35, %v2957_v2 }
 0x496   : > { %v2978_v45 = vrot.slane %v2964_v58, %v2970_v10 }
 0x498   : > { %v2979_v61 = vcombine.low %v2971_v50, %v2978_v45 }
 0x49a   : > { %v2986_v9 = vrot.slane %v2979_v61, %v2970_v10 }
 0x49c   : > { %2992 = vst.msk [vmem:[%s395_s21] sm:$0xf] %vm2990_vm1, %v2986_v9 }
 0x49d PF: > { %p17_p9 = scmp.ge.s32.totalorder %s3580_s10, 4   ;;  %s6206_s29 = smov %s3505_s30 }
 0x49e   : > { %s6207_s30 = smov %s3589_s13  ;;  %s6208_s9 = smov %s3580_s10 }
 0x49f   :  { %19 = sbr.rel (!%p17_p9) target bundleno = 5 (0x5), region = 141 }

</bundles_post_ra>
